<compile_context>
chip_gen: v7x
topology: tpu7x:2x2x1
jax: 0.10.0
libtpu: 0.0.40
codegen_flags: <defaults>
</compile_context>

<pallas_src>
import functools

import jax
import jax.numpy as jnp
import numpy as np
from jax.experimental import pallas as pl
from jax.experimental.pallas import tpu as pltpu


def _layer_norm(x, g, b, eps=1e-5):
    mu = jnp.mean(x, axis=-1, keepdims=True)
    var = jnp.mean(jnp.square(x - mu), axis=-1, keepdims=True)
    return (x - mu) * jax.lax.rsqrt(var + eps) * g + b


def _transformer_dqn_kernel(
    x_ref,                                    # (TB*S, state_dim)
    emb_w_ref, emb_b_ref, pos_ref, qtok_ref,  # embedding / pos / query token
    sa_w_ref, sa_b_ref,                       # fused self-attn (Wv@Wo, bv@Wo+bo)
    ca_wq_ref, ca_bq_ref, ca_wkv_ref, ca_bkv_ref, ca_wo_ref, ca_bo_ref,
    ln1_g_ref, ln1_b_ref, ln2_g_ref, ln2_b_ref, ln3_g_ref, ln3_b_ref,
    ff1_w_ref, ff1_b_ref, ff2_w_ref, ff2_b_ref,
    out_w_ref, out_b_ref,
    head_mask_ref,                            # (D, D) block-diag "same head"
    seg_ref,                                  # (TB, TB*S) per-sequence selector
    o_ref,                                    # (TB, A)
    *, num_heads,
):
    D = qtok_ref.shape[-1]
    head_dim = D // num_heads
    scale = 1.0 / float(head_dim) ** 0.5

    def dot(a, w_ref):
        # bf16 x bf16 MXU matmul with f32 accumulation.
        return jnp.dot(a.astype(jnp.bfloat16), w_ref[...],
                       preferred_element_type=jnp.float32)

    # --- constant target path: self-attn (len-1 => softmax == 1) + LN1 + Q ---
    tgt = qtok_ref[...]                                                # (1, D)
    x1 = _layer_norm(tgt + dot(tgt, sa_w_ref) + sa_b_ref[...],
                     ln1_g_ref[...], ln1_b_ref[...])                   # (1, D)
    q2 = dot(x1, ca_wq_ref) + ca_bq_ref[...]                           # (1, D)

    # --- memory: embedding + positional encodings for all TB sequences ------
    mem = dot(x_ref[...], emb_w_ref) + emb_b_ref[...] + pos_ref[...]   # (TB*S, D)

    # --- cross-attention: fused K/V projection -------------------------------
    kv = dot(mem, ca_wkv_ref) + ca_bkv_ref[...]                        # (TB*S, 2D)
    k2 = kv[:, :D]
    v2 = kv[:, D:]

    # Per-head scores via the block-diagonal "same head" matmul:
    #   scores[r, d] = sum_{d' in head(d)} q2[0, d'] * k2[r, d']
    # so the score is constant across the lanes of a head.
    scores = jnp.dot(k2 * q2, head_mask_ref[...],
                     preferred_element_type=jnp.float32) * scale       # (TB*S, D)
    # Per-lane global max is constant within each (sequence, head) group, so
    # subtracting it leaves the softmax exactly unchanged (stability only).
    e = jnp.exp(scores - jnp.max(scores, axis=0, keepdims=True))       # (TB*S, D)
    seg = seg_ref[...]
    denom = jnp.dot(seg, e, preferred_element_type=jnp.float32)        # (TB, D)
    numer = jnp.dot(seg, e * v2, preferred_element_type=jnp.float32)   # (TB, D)
    ctx = numer / denom                                                # (TB, D)

    ca = dot(ctx, ca_wo_ref) + ca_bo_ref[...]                          # (TB, D)
    x2 = _layer_norm(x1 + ca, ln2_g_ref[...], ln2_b_ref[...])          # (TB, D)

    # --- feed-forward (ReLU); dropout is identity in eval mode ---------------
    h1 = jnp.maximum(dot(x2, ff1_w_ref) + ff1_b_ref[...], 0.0)         # (TB, F)
    ff = dot(h1, ff2_w_ref) + ff2_b_ref[...]                           # (TB, D)
    x3 = _layer_norm(x2 + ff, ln3_g_ref[...], ln3_b_ref[...])          # (TB, D)

    # --- output head ----------------------------------------------------------
    o_ref[...] = (dot(x3, out_w_ref) + out_b_ref[...]).astype(o_ref.dtype)


def _pick_block_batch(B, requested=None):
    tb = requested if requested is not None else min(B, 64)
    tb = max(1, min(tb, B))
    while B % tb != 0:
        tb -= 1
    if tb != B and tb % 8 != 0:
        # sublane rule for the (TB, A) output block: TB % 8 == 0 unless TB == B
        mult8 = [d for d in range(8, B, 8) if B % d == 0]
        tb = mult8[-1] if mult8 else B
    return tb


def transformer_dqn_forward(x, kp, *, num_heads, block_batch=None):
    B, S, state_dim = x.shape
    D = kp["q_tok"].shape[-1]
    A = kp["out_b"].shape[-1]
    assert D % num_heads == 0
    TB = _pick_block_batch(B, block_batch)

    # Wrapper-built constants (tiny; constant-folded under jit).
    x2d = x.reshape(B * S, state_dim)
    pos_tiled = jnp.tile(kp["pos"], (TB, 1))                           # (TB*S, D)
    hd = D // num_heads
    hid = jnp.arange(D) // hd
    head_mask = (hid[:, None] == hid[None, :]).astype(jnp.float32)     # (D, D)
    seg = (jnp.arange(TB)[:, None] ==
           (jnp.arange(TB * S)[None, :] // S)).astype(jnp.float32)     # (TB, TB*S)

    plist = [
        kp["emb_w"], kp["emb_b"], pos_tiled, kp["q_tok"],
        kp["sa_w"], kp["sa_b"],
        kp["ca_wq"], kp["ca_bq"], kp["ca_wkv"], kp["ca_bkv"],
        kp["ca_wo"], kp["ca_bo"],
        kp["ln1_g"], kp["ln1_b"], kp["ln2_g"], kp["ln2_b"],
        kp["ln3_g"], kp["ln3_b"],
        kp["ff1_w"], kp["ff1_b"], kp["ff2_w"], kp["ff2_b"],
        kp["out_w"], kp["out_b"],
        head_mask, seg,
    ]

    def full_spec(a):
        return pl.BlockSpec(a.shape, lambda b: (0, 0))

    in_specs = [pl.BlockSpec((TB * S, state_dim), lambda b: (b, 0))]
    in_specs += [full_spec(a) for a in plist]
    out_specs = pl.BlockSpec((TB, A), lambda b: (b, 0))

    return pl.pallas_call(
        functools.partial(_transformer_dqn_kernel, num_heads=num_heads),
        out_shape=jax.ShapeDtypeStruct((B, A), jnp.float32),
        grid=(B // TB,),
        in_specs=in_specs,
        out_specs=out_specs,
        compiler_params=pltpu.CompilerParams(dimension_semantics=("parallel",)),
    )(x2d, *plist)


# ----------------------------------------------------------------------------
# Parameter construction / preparation
# ----------------------------------------------------------------------------

def init_params(key, *, state_dim, action_dim, seq_len, d_model, dim_feedforward):
    """Raw module parameters in JAX layout: W pre-transposed to (in, out)."""
    ks = iter(jax.random.split(key, 16))

    def linear(k, fan_in, fan_out):
        kw, kb = jax.random.split(k)
        bound = 1.0 / float(fan_in) ** 0.5
        w_t = jax.random.uniform(kw, (fan_in, fan_out), jnp.float32, -bound, bound)
        b = jax.random.uniform(kb, (1, fan_out), jnp.float32, -bound, bound)
        return w_t, b

    p = {}
    p["emb_w_t"], p["emb_b"] = linear(next(ks), state_dim, d_model)
    p["pos"] = jax.random.normal(next(ks), (seq_len, d_model), jnp.float32)
    p["q_tok"] = jax.random.normal(next(ks), (1, d_model), jnp.float32)
    # self-attn: only V + out_proj matter (length-1 target => softmax == 1)
    p["sa_wv_t"], p["sa_bv"] = linear(next(ks), d_model, d_model)
    p["sa_wo_t"], p["sa_bo"] = linear(next(ks), d_model, d_model)
    # cross-attn (multihead_attn) projections
    p["ca_wq_t"], p["ca_bq"] = linear(next(ks), d_model, d_model)
    p["ca_wk_t"], p["ca_bk"] = linear(next(ks), d_model, d_model)
    p["ca_wv_t"], p["ca_bv"] = linear(next(ks), d_model, d_model)
    p["ca_wo_t"], p["ca_bo"] = linear(next(ks), d_model, d_model)
    for i in (1, 2, 3):
        p[f"ln{i}_g"] = jnp.ones((1, d_model), jnp.float32)
        p[f"ln{i}_b"] = jnp.zeros((1, d_model), jnp.float32)
    p["ff1_w_t"], p["ff1_b"] = linear(next(ks), d_model, dim_feedforward)
    p["ff2_w_t"], p["ff2_b"] = linear(next(ks), dim_feedforward, d_model)
    p["out_w_t"], p["out_b"] = linear(next(ks), d_model, action_dim)
    return p


def prepare_params(p):
    """Fuse / concat / bf16-cast the weights for the kernel (one-time)."""
    bf16 = jnp.bfloat16
    kp = {}
    kp["emb_w"] = p["emb_w_t"].astype(bf16)
    kp["emb_b"] = p["emb_b"]
    kp["pos"] = p["pos"]
    kp["q_tok"] = p["q_tok"]
    # Length-1 self-attention is linear: out = tgt@(Wv@Wo) + (bv@Wo + bo).
    kp["sa_w"] = (p["sa_wv_t"] @ p["sa_wo_t"]).astype(bf16)
    kp["sa_b"] = p["sa_bv"] @ p["sa_wo_t"] + p["sa_bo"]
    kp["ca_wq"] = p["ca_wq_t"].astype(bf16)
    kp["ca_bq"] = p["ca_bq"]
    kp["ca_wkv"] = jnp.concatenate([p["ca_wk_t"], p["ca_wv_t"]], axis=1).astype(bf16)
    kp["ca_bkv"] = jnp.concatenate([p["ca_bk"], p["ca_bv"]], axis=1)
    kp["ca_wo"] = p["ca_wo_t"].astype(bf16)
    kp["ca_bo"] = p["ca_bo"]
    for i in (1, 2, 3):
        kp[f"ln{i}_g"] = p[f"ln{i}_g"]
        kp[f"ln{i}_b"] = p[f"ln{i}_b"]
    kp["ff1_w"] = p["ff1_w_t"].astype(bf16)
    kp["ff1_b"] = p["ff1_b"]
    kp["ff2_w"] = p["ff2_w_t"].astype(bf16)
    kp["ff2_b"] = p["ff2_b"]
    kp["out_w"] = p["out_w_t"].astype(bf16)
    kp["out_b"] = p["out_b"]
    return kp


# ----------------------------------------------------------------------------
# Pure-JAX references
# ----------------------------------------------------------------------------

def reference_forward(x, p, *, num_heads):
    """f32 reference mirroring nn.TransformerDecoderLayer (post-norm, eval)."""
    B, S, _ = x.shape
    D = p["pos"].shape[-1]
    hd = D // num_heads
    mem = x @ p["emb_w_t"] + p["emb_b"] + p["pos"][None]
    tgt = jnp.broadcast_to(p["q_tok"][None], (B, 1, D))
    sa = (tgt @ p["sa_wv_t"] + p["sa_bv"]) @ p["sa_wo_t"] + p["sa_bo"]
    x1 = _layer_norm(tgt + sa, p["ln1_g"], p["ln1_b"])
    q2 = x1 @ p["ca_wq_t"] + p["ca_bq"]
    k2 = mem @ p["ca_wk_t"] + p["ca_bk"]
    v2 = mem @ p["ca_wv_t"] + p["ca_bv"]
    qh = q2.reshape(B, 1, num_heads, hd).transpose(0, 2, 1, 3)
    kh = k2.reshape(B, S, num_heads, hd).transpose(0, 2, 1, 3)
    vh = v2.reshape(B, S, num_heads, hd).transpose(0, 2, 1, 3)
    attn = jax.nn.softmax(jnp.einsum("bhqe,bhke->bhqk", qh, kh) / float(hd) ** 0.5, -1)
    ctx = jnp.einsum("bhqk,bhke->bhqe", attn, vh).transpose(0, 2, 1, 3).reshape(B, 1, D)
    x2 = _layer_norm(x1 + ctx @ p["ca_wo_t"] + p["ca_bo"], p["ln2_g"], p["ln2_b"])
    h1 = jax.nn.relu(x2 @ p["ff1_w_t"] + p["ff1_b"])
    x3 = _layer_norm(x2 + h1 @ p["ff2_w_t"] + p["ff2_b"], p["ln3_g"], p["ln3_b"])
    return (x3 @ p["out_w_t"] + p["out_b"])[:, 0, :]


def reference_from_prepared(x, kp, *, num_heads):
    """Reference using the prepared (fused, bf16-rounded) parameters, in f32."""
    B, S, _ = x.shape
    D = kp["q_tok"].shape[-1]
    hd = D // num_heads
    w = lambda k: kp[k].astype(jnp.float32)
    mem = x @ w("emb_w") + kp["emb_b"] + kp["pos"][None]
    tgt = jnp.broadcast_to(kp["q_tok"][None], (B, 1, D))
    x1 = _layer_norm(tgt + tgt @ w("sa_w") + kp["sa_b"], kp["ln1_g"], kp["ln1_b"])
    q2 = x1 @ w("ca_wq") + kp["ca_bq"]
    kv = mem @ w("ca_wkv") + kp["ca_bkv"]
    k2, v2 = kv[..., :D], kv[..., D:]
    qh = q2.reshape(B, 1, num_heads, hd).transpose(0, 2, 1, 3)
    kh = k2.reshape(B, S, num_heads, hd).transpose(0, 2, 1, 3)
    vh = v2.reshape(B, S, num_heads, hd).transpose(0, 2, 1, 3)
    attn = jax.nn.softmax(jnp.einsum("bhqe,bhke->bhqk", qh, kh) / float(hd) ** 0.5, -1)
    ctx = jnp.einsum("bhqk,bhke->bhqe", attn, vh).transpose(0, 2, 1, 3).reshape(B, 1, D)
    x2 = _layer_norm(x1 + ctx @ w("ca_wo") + kp["ca_bo"], kp["ln2_g"], kp["ln2_b"])
    h1 = jax.nn.relu(x2 @ w("ff1_w") + kp["ff1_b"])
    x3 = _layer_norm(x2 + h1 @ w("ff2_w") + kp["ff2_b"], kp["ln3_g"], kp["ln3_b"])
    return (x3 @ w("out_w") + kp["out_b"])[:, 0, :]


if __name__ == "__main__":
    # CartPole-like dims; d_model=128 / dim_feedforward=2048 are the module
    # defaults. B=16 with TB=8 exercises a multi-tile "parallel" batch grid.
    B, seq_len, state_dim, action_dim = 16, 8, 4, 2
    d_model, nhead = 128, 4
    dim_feedforward = 2048

    key = jax.random.PRNGKey(0)
    kparam_key, kx = jax.random.split(key)
    raw = init_params(kparam_key, state_dim=state_dim, action_dim=action_dim,
                      seq_len=seq_len, d_model=d_model,
                      dim_feedforward=dim_feedforward)
    kparams = prepare_params(raw)
    x = jax.random.normal(kx, (B, seq_len, state_dim), jnp.float32)

    q_kernel = transformer_dqn_forward(x, kparams, num_heads=nhead, block_batch=8)
    q_kernel = jax.block_until_ready(q_kernel)

    # Tight check vs. the prepared (bf16-rounded, fused) parameters.
    q_ref_prep = reference_from_prepared(x, kparams, num_heads=nhead)
    np.testing.assert_allclose(np.asarray(q_kernel), np.asarray(q_ref_prep),
                               rtol=2e-2, atol=3e-2)
    # Looser check vs. the original full-precision module math.
    q_ref_full = reference_forward(x, raw, num_heads=nhead)
    np.testing.assert_allclose(np.asarray(q_kernel), np.asarray(q_ref_full),
                               rtol=5e-2, atol=5e-2)
    print("KERNEL_OK")
</pallas_src>

<mosaic_0001>
module attributes {stable_mosaic.version = 11 : i64} {
  func.func @_transformer_dqn_kernel(%arg0: i32, %arg1: memref<64x4xf32, #tpu.memory_space<vmem>>, %arg2: memref<4x128xbf16, #tpu.memory_space<vmem>>, %arg3: memref<1x128xf32, #tpu.memory_space<vmem>>, %arg4: memref<64x128xf32, #tpu.memory_space<vmem>>, %arg5: memref<1x128xf32, #tpu.memory_space<vmem>>, %arg6: memref<128x128xbf16, #tpu.memory_space<vmem>>, %arg7: memref<1x128xf32, #tpu.memory_space<vmem>>, %arg8: memref<128x128xbf16, #tpu.memory_space<vmem>>, %arg9: memref<1x128xf32, #tpu.memory_space<vmem>>, %arg10: memref<128x256xbf16, #tpu.memory_space<vmem>>, %arg11: memref<1x256xf32, #tpu.memory_space<vmem>>, %arg12: memref<128x128xbf16, #tpu.memory_space<vmem>>, %arg13: memref<1x128xf32, #tpu.memory_space<vmem>>, %arg14: memref<1x128xf32, #tpu.memory_space<vmem>>, %arg15: memref<1x128xf32, #tpu.memory_space<vmem>>, %arg16: memref<1x128xf32, #tpu.memory_space<vmem>>, %arg17: memref<1x128xf32, #tpu.memory_space<vmem>>, %arg18: memref<1x128xf32, #tpu.memory_space<vmem>>, %arg19: memref<1x128xf32, #tpu.memory_space<vmem>>, %arg20: memref<128x2048xbf16, #tpu.memory_space<vmem>>, %arg21: memref<1x2048xf32, #tpu.memory_space<vmem>>, %arg22: memref<2048x128xbf16, #tpu.memory_space<vmem>>, %arg23: memref<1x128xf32, #tpu.memory_space<vmem>>, %arg24: memref<128x2xbf16, #tpu.memory_space<vmem>>, %arg25: memref<1x2xf32, #tpu.memory_space<vmem>>, %arg26: memref<128x128xf32, #tpu.memory_space<vmem>>, %arg27: memref<8x64xf32, #tpu.memory_space<vmem>>, %arg28: memref<8x2xf32, #tpu.memory_space<vmem>>) attributes {dimension_semantics = [#tpu.dimension_semantics<parallel>], iteration_bounds = array<i64: 2>, scalar_prefetch = 0 : i64, scratch_operands = 0 : i64, tpu.core_type = #tpu.core_type<tc>, window_params = [{transform_indices = @transform_0, window_bounds = array<i64: 64, 4>}, {pipeline_mode = #tpu.pipeline_mode<synchronous>, transform_indices = @transform_1, window_bounds = array<i64: 4, 128>}, {pipeline_mode = #tpu.pipeline_mode<synchronous>, transform_indices = @transform_2, window_bounds = array<i64: 1, 128>}, {pipeline_mode = #tpu.pipeline_mode<synchronous>, transform_indices = @transform_3, window_bounds = array<i64: 64, 128>}, {pipeline_mode = #tpu.pipeline_mode<synchronous>, transform_indices = @transform_4, window_bounds = array<i64: 1, 128>}, {pipeline_mode = #tpu.pipeline_mode<synchronous>, transform_indices = @transform_5, window_bounds = array<i64: 128, 128>}, {pipeline_mode = #tpu.pipeline_mode<synchronous>, transform_indices = @transform_6, window_bounds = array<i64: 1, 128>}, {pipeline_mode = #tpu.pipeline_mode<synchronous>, transform_indices = @transform_7, window_bounds = array<i64: 128, 128>}, {pipeline_mode = #tpu.pipeline_mode<synchronous>, transform_indices = @transform_8, window_bounds = array<i64: 1, 128>}, {pipeline_mode = #tpu.pipeline_mode<synchronous>, transform_indices = @transform_9, window_bounds = array<i64: 128, 256>}, {pipeline_mode = #tpu.pipeline_mode<synchronous>, transform_indices = @transform_10, window_bounds = array<i64: 1, 256>}, {pipeline_mode = #tpu.pipeline_mode<synchronous>, transform_indices = @transform_11, window_bounds = array<i64: 128, 128>}, {pipeline_mode = #tpu.pipeline_mode<synchronous>, transform_indices = @transform_12, window_bounds = array<i64: 1, 128>}, {pipeline_mode = #tpu.pipeline_mode<synchronous>, transform_indices = @transform_13, window_bounds = array<i64: 1, 128>}, {pipeline_mode = #tpu.pipeline_mode<synchronous>, transform_indices = @transform_14, window_bounds = array<i64: 1, 128>}, {pipeline_mode = #tpu.pipeline_mode<synchronous>, transform_indices = @transform_15, window_bounds = array<i64: 1, 128>}, {pipeline_mode = #tpu.pipeline_mode<synchronous>, transform_indices = @transform_16, window_bounds = array<i64: 1, 128>}, {pipeline_mode = #tpu.pipeline_mode<synchronous>, transform_indices = @transform_17, window_bounds = array<i64: 1, 128>}, {pipeline_mode = #tpu.pipeline_mode<synchronous>, transform_indices = @transform_18, window_bounds = array<i64: 1, 128>}, {pipeline_mode = #tpu.pipeline_mode<synchronous>, transform_indices = @transform_19, window_bounds = array<i64: 128, 2048>}, {pipeline_mode = #tpu.pipeline_mode<synchronous>, transform_indices = @transform_20, window_bounds = array<i64: 1, 2048>}, {pipeline_mode = #tpu.pipeline_mode<synchronous>, transform_indices = @transform_21, window_bounds = array<i64: 2048, 128>}, {pipeline_mode = #tpu.pipeline_mode<synchronous>, transform_indices = @transform_22, window_bounds = array<i64: 1, 128>}, {pipeline_mode = #tpu.pipeline_mode<synchronous>, transform_indices = @transform_23, window_bounds = array<i64: 128, 2>}, {pipeline_mode = #tpu.pipeline_mode<synchronous>, transform_indices = @transform_24, window_bounds = array<i64: 1, 2>}, {pipeline_mode = #tpu.pipeline_mode<synchronous>, transform_indices = @transform_25, window_bounds = array<i64: 128, 128>}, {pipeline_mode = #tpu.pipeline_mode<synchronous>, transform_indices = @transform_26, window_bounds = array<i64: 8, 64>}, {transform_indices = @transform_27, window_bounds = array<i64: 8, 2>}]} {
    %c0 = arith.constant 0 : index
    %c0_0 = arith.constant 0 : index
    %0 = vector.load %arg5[%c0, %c0_0] : memref<1x128xf32, #tpu.memory_space<vmem>>, vector<1x128xf32>
    %1 = arith.truncf %0 : vector<1x128xf32> to vector<1x128xbf16>
    %c0_1 = arith.constant 0 : index
    %c0_2 = arith.constant 0 : index
    %2 = vector.load %arg6[%c0_1, %c0_2] : memref<128x128xbf16, #tpu.memory_space<vmem>>, vector<128x128xbf16>
    %cst = arith.constant dense<0.000000e+00> : vector<1x128xf32>
    %3 = tpu.matmul %1, %2, %cst {dimension_numbers = #tpu.dot_dimension_numbers<[1], [0], [0], [1], [0, 0, 1, 1], [], []>} : vector<1x128xbf16>, vector<128x128xbf16>, vector<1x128xf32> -> vector<1x128xf32>
    %4 = arith.addf %0, %3 : vector<1x128xf32>
    %c0_3 = arith.constant 0 : index
    %c0_4 = arith.constant 0 : index
    %5 = vector.load %arg7[%c0_3, %c0_4] : memref<1x128xf32, #tpu.memory_space<vmem>>, vector<1x128xf32>
    %6 = arith.addf %4, %5 : vector<1x128xf32>
    %c0_5 = arith.constant 0 : index
    %c0_6 = arith.constant 0 : index
    %7 = vector.load %arg14[%c0_5, %c0_6] : memref<1x128xf32, #tpu.memory_space<vmem>>, vector<1x128xf32>
    %c0_7 = arith.constant 0 : index
    %c0_8 = arith.constant 0 : index
    %8 = vector.load %arg15[%c0_7, %c0_8] : memref<1x128xf32, #tpu.memory_space<vmem>>, vector<1x128xf32>
    %cst_9 = arith.constant dense<0.000000e+00> : vector<1xf32>
    %9 = vector.multi_reduction <add>, %6, %cst_9 [1] : vector<1x128xf32> to vector<1xf32>
    %10 = vector.shape_cast %9 : vector<1xf32> to vector<1x1xf32>
    %cst_10 = arith.constant 1.280000e+02 : f32
    %11 = vector.broadcast %cst_10 : f32 to vector<1x1xf32>
    %12 = arith.divf %10, %11 : vector<1x1xf32>
    %13 = vector.broadcast %12 : vector<1x1xf32> to vector<1x128xf32>
    %14 = arith.subf %6, %13 : vector<1x128xf32>
    %15 = arith.mulf %14, %14 : vector<1x128xf32>
    %cst_11 = arith.constant dense<0.000000e+00> : vector<1xf32>
    %16 = vector.multi_reduction <add>, %15, %cst_11 [1] : vector<1x128xf32> to vector<1xf32>
    %17 = vector.shape_cast %16 : vector<1xf32> to vector<1x1xf32>
    %cst_12 = arith.constant 1.280000e+02 : f32
    %18 = vector.broadcast %cst_12 : f32 to vector<1x1xf32>
    %19 = arith.divf %17, %18 : vector<1x1xf32>
    %20 = vector.broadcast %12 : vector<1x1xf32> to vector<1x128xf32>
    %21 = arith.subf %6, %20 : vector<1x128xf32>
    %cst_13 = arith.constant 9.99999974E-6 : f32
    %22 = vector.broadcast %cst_13 : f32 to vector<1x1xf32>
    %23 = arith.addf %19, %22 : vector<1x1xf32>
    %24 = math.rsqrt %23 : vector<1x1xf32>
    %25 = vector.broadcast %24 : vector<1x1xf32> to vector<1x128xf32>
    %26 = arith.mulf %21, %25 : vector<1x128xf32>
    %27 = arith.mulf %26, %7 : vector<1x128xf32>
    %28 = arith.addf %27, %8 : vector<1x128xf32>
    %29 = arith.truncf %28 : vector<1x128xf32> to vector<1x128xbf16>
    %c0_14 = arith.constant 0 : index
    %c0_15 = arith.constant 0 : index
    %30 = vector.load %arg8[%c0_14, %c0_15] : memref<128x128xbf16, #tpu.memory_space<vmem>>, vector<128x128xbf16>
    %cst_16 = arith.constant dense<0.000000e+00> : vector<1x128xf32>
    %31 = tpu.matmul %29, %30, %cst_16 {dimension_numbers = #tpu.dot_dimension_numbers<[1], [0], [0], [1], [0, 0, 1, 1], [], []>} : vector<1x128xbf16>, vector<128x128xbf16>, vector<1x128xf32> -> vector<1x128xf32>
    %c0_17 = arith.constant 0 : index
    %c0_18 = arith.constant 0 : index
    %32 = vector.load %arg9[%c0_17, %c0_18] : memref<1x128xf32, #tpu.memory_space<vmem>>, vector<1x128xf32>
    %33 = arith.addf %31, %32 : vector<1x128xf32>
    %c0_19 = arith.constant 0 : index
    %c0_20 = arith.constant 0 : index
    %34 = vector.load %arg1[%c0_19, %c0_20] : memref<64x4xf32, #tpu.memory_space<vmem>>, vector<64x4xf32>
    %35 = arith.truncf %34 : vector<64x4xf32> to vector<64x4xbf16>
    %c0_21 = arith.constant 0 : index
    %c0_22 = arith.constant 0 : index
    %36 = vector.load %arg2[%c0_21, %c0_22] : memref<4x128xbf16, #tpu.memory_space<vmem>>, vector<4x128xbf16>
    %cst_23 = arith.constant dense<0.000000e+00> : vector<64x128xf32>
    %37 = tpu.matmul %35, %36, %cst_23 {dimension_numbers = #tpu.dot_dimension_numbers<[1], [0], [0], [1], [0, 0, 1, 1], [], []>} : vector<64x4xbf16>, vector<4x128xbf16>, vector<64x128xf32> -> vector<64x128xf32>
    %c0_24 = arith.constant 0 : index
    %c0_25 = arith.constant 0 : index
    %38 = vector.load %arg3[%c0_24, %c0_25] : memref<1x128xf32, #tpu.memory_space<vmem>>, vector<1x128xf32>
    %39 = vector.broadcast %38 : vector<1x128xf32> to vector<64x128xf32>
    %40 = arith.addf %37, %39 : vector<64x128xf32>
    %c0_26 = arith.constant 0 : index
    %c0_27 = arith.constant 0 : index
    %41 = vector.load %arg4[%c0_26, %c0_27] : memref<64x128xf32, #tpu.memory_space<vmem>>, vector<64x128xf32>
    %42 = arith.addf %40, %41 : vector<64x128xf32>
    %43 = arith.truncf %42 : vector<64x128xf32> to vector<64x128xbf16>
    %c0_28 = arith.constant 0 : index
    %c0_29 = arith.constant 0 : index
    %44 = vector.load %arg10[%c0_28, %c0_29] : memref<128x256xbf16, #tpu.memory_space<vmem>>, vector<128x256xbf16>
    %cst_30 = arith.constant dense<0.000000e+00> : vector<64x256xf32>
    %45 = tpu.matmul %43, %44, %cst_30 {dimension_numbers = #tpu.dot_dimension_numbers<[1], [0], [0], [1], [0, 0, 1, 1], [], []>} : vector<64x128xbf16>, vector<128x256xbf16>, vector<64x256xf32> -> vector<64x256xf32>
    %c0_31 = arith.constant 0 : index
    %c0_32 = arith.constant 0 : index
    %46 = vector.load %arg11[%c0_31, %c0_32] : memref<1x256xf32, #tpu.memory_space<vmem>>, vector<1x256xf32>
    %47 = vector.broadcast %46 : vector<1x256xf32> to vector<64x256xf32>
    %48 = arith.addf %45, %47 : vector<64x256xf32>
    %49 = vector.extract_strided_slice %48 {offsets = [0, 0], sizes = [64, 128], strides = [1, 1]} : vector<64x256xf32> to vector<64x128xf32>
    %50 = vector.extract_strided_slice %48 {offsets = [0, 128], sizes = [64, 128], strides = [1, 1]} : vector<64x256xf32> to vector<64x128xf32>
    %51 = vector.broadcast %33 : vector<1x128xf32> to vector<64x128xf32>
    %52 = arith.mulf %49, %51 : vector<64x128xf32>
    %c0_33 = arith.constant 0 : index
    %c0_34 = arith.constant 0 : index
    %53 = vector.load %arg26[%c0_33, %c0_34] : memref<128x128xf32, #tpu.memory_space<vmem>>, vector<128x128xf32>
    %cst_35 = arith.constant dense<0.000000e+00> : vector<64x128xf32>
    %54 = tpu.matmul %52, %53, %cst_35 {dimension_numbers = #tpu.dot_dimension_numbers<[1], [0], [0], [1], [0, 0, 1, 1], [], []>} : vector<64x128xf32>, vector<128x128xf32>, vector<64x128xf32> -> vector<64x128xf32>
    %cst_36 = arith.constant 0.176776692 : f32
    %55 = vector.broadcast %cst_36 : f32 to vector<64x128xf32>
    %56 = arith.mulf %54, %55 : vector<64x128xf32>
    %cst_37 = arith.constant dense<0xFF800000> : vector<128xf32>
    %57 = vector.multi_reduction <maximumf>, %56, %cst_37 [0] : vector<64x128xf32> to vector<128xf32>
    %58 = vector.shape_cast %57 : vector<128xf32> to vector<1x128xf32>
    %59 = vector.broadcast %58 : vector<1x128xf32> to vector<64x128xf32>
    %60 = arith.subf %56, %59 : vector<64x128xf32>
    %61 = math.exp %60 : vector<64x128xf32>
    %c0_38 = arith.constant 0 : index
    %c0_39 = arith.constant 0 : index
    %62 = vector.load %arg27[%c0_38, %c0_39] : memref<8x64xf32, #tpu.memory_space<vmem>>, vector<8x64xf32>
    %cst_40 = arith.constant dense<0.000000e+00> : vector<8x128xf32>
    %63 = tpu.matmul %62, %61, %cst_40 {dimension_numbers = #tpu.dot_dimension_numbers<[1], [0], [0], [1], [0, 0, 1, 1], [], []>} : vector<8x64xf32>, vector<64x128xf32>, vector<8x128xf32> -> vector<8x128xf32>
    %64 = arith.mulf %61, %50 : vector<64x128xf32>
    %cst_41 = arith.constant dense<0.000000e+00> : vector<8x128xf32>
    %65 = tpu.matmul %62, %64, %cst_41 {dimension_numbers = #tpu.dot_dimension_numbers<[1], [0], [0], [1], [0, 0, 1, 1], [], []>} : vector<8x64xf32>, vector<64x128xf32>, vector<8x128xf32> -> vector<8x128xf32>
    %66 = arith.divf %65, %63 : vector<8x128xf32>
    %67 = arith.truncf %66 : vector<8x128xf32> to vector<8x128xbf16>
    %c0_42 = arith.constant 0 : index
    %c0_43 = arith.constant 0 : index
    %68 = vector.load %arg12[%c0_42, %c0_43] : memref<128x128xbf16, #tpu.memory_space<vmem>>, vector<128x128xbf16>
    %cst_44 = arith.constant dense<0.000000e+00> : vector<8x128xf32>
    %69 = tpu.matmul %67, %68, %cst_44 {dimension_numbers = #tpu.dot_dimension_numbers<[1], [0], [0], [1], [0, 0, 1, 1], [], []>} : vector<8x128xbf16>, vector<128x128xbf16>, vector<8x128xf32> -> vector<8x128xf32>
    %c0_45 = arith.constant 0 : index
    %c0_46 = arith.constant 0 : index
    %70 = vector.load %arg13[%c0_45, %c0_46] : memref<1x128xf32, #tpu.memory_space<vmem>>, vector<1x128xf32>
    %71 = vector.broadcast %70 : vector<1x128xf32> to vector<8x128xf32>
    %72 = arith.addf %69, %71 : vector<8x128xf32>
    %73 = vector.broadcast %28 : vector<1x128xf32> to vector<8x128xf32>
    %74 = arith.addf %73, %72 : vector<8x128xf32>
    %c0_47 = arith.constant 0 : index
    %c0_48 = arith.constant 0 : index
    %75 = vector.load %arg16[%c0_47, %c0_48] : memref<1x128xf32, #tpu.memory_space<vmem>>, vector<1x128xf32>
    %c0_49 = arith.constant 0 : index
    %c0_50 = arith.constant 0 : index
    %76 = vector.load %arg17[%c0_49, %c0_50] : memref<1x128xf32, #tpu.memory_space<vmem>>, vector<1x128xf32>
    %cst_51 = arith.constant dense<0.000000e+00> : vector<8xf32>
    %77 = vector.multi_reduction <add>, %74, %cst_51 [1] : vector<8x128xf32> to vector<8xf32>
    %78 = vector.shape_cast %77 : vector<8xf32> to vector<8x1xf32>
    %cst_52 = arith.constant 1.280000e+02 : f32
    %79 = vector.broadcast %cst_52 : f32 to vector<8x1xf32>
    %80 = arith.divf %78, %79 : vector<8x1xf32>
    %81 = vector.broadcast %80 : vector<8x1xf32> to vector<8x128xf32>
    %82 = arith.subf %74, %81 : vector<8x128xf32>
    %83 = arith.mulf %82, %82 : vector<8x128xf32>
    %cst_53 = arith.constant dense<0.000000e+00> : vector<8xf32>
    %84 = vector.multi_reduction <add>, %83, %cst_53 [1] : vector<8x128xf32> to vector<8xf32>
    %85 = vector.shape_cast %84 : vector<8xf32> to vector<8x1xf32>
    %cst_54 = arith.constant 1.280000e+02 : f32
    %86 = vector.broadcast %cst_54 : f32 to vector<8x1xf32>
    %87 = arith.divf %85, %86 : vector<8x1xf32>
    %88 = vector.broadcast %80 : vector<8x1xf32> to vector<8x128xf32>
    %89 = arith.subf %74, %88 : vector<8x128xf32>
    %cst_55 = arith.constant 9.99999974E-6 : f32
    %90 = vector.broadcast %cst_55 : f32 to vector<8x1xf32>
    %91 = arith.addf %87, %90 : vector<8x1xf32>
    %92 = math.rsqrt %91 : vector<8x1xf32>
    %93 = vector.broadcast %92 : vector<8x1xf32> to vector<8x128xf32>
    %94 = arith.mulf %89, %93 : vector<8x128xf32>
    %95 = vector.broadcast %75 : vector<1x128xf32> to vector<8x128xf32>
    %96 = arith.mulf %94, %95 : vector<8x128xf32>
    %97 = vector.broadcast %76 : vector<1x128xf32> to vector<8x128xf32>
    %98 = arith.addf %96, %97 : vector<8x128xf32>
    %99 = arith.truncf %98 : vector<8x128xf32> to vector<8x128xbf16>
    %c0_56 = arith.constant 0 : index
    %c0_57 = arith.constant 0 : index
    %100 = vector.load %arg20[%c0_56, %c0_57] : memref<128x2048xbf16, #tpu.memory_space<vmem>>, vector<128x2048xbf16>
    %cst_58 = arith.constant dense<0.000000e+00> : vector<8x2048xf32>
    %101 = tpu.matmul %99, %100, %cst_58 {dimension_numbers = #tpu.dot_dimension_numbers<[1], [0], [0], [1], [0, 0, 1, 1], [], []>} : vector<8x128xbf16>, vector<128x2048xbf16>, vector<8x2048xf32> -> vector<8x2048xf32>
    %c0_59 = arith.constant 0 : index
    %c0_60 = arith.constant 0 : index
    %102 = vector.load %arg21[%c0_59, %c0_60] : memref<1x2048xf32, #tpu.memory_space<vmem>>, vector<1x2048xf32>
    %103 = vector.broadcast %102 : vector<1x2048xf32> to vector<8x2048xf32>
    %104 = arith.addf %101, %103 : vector<8x2048xf32>
    %cst_61 = arith.constant 0.000000e+00 : f32
    %105 = vector.broadcast %cst_61 : f32 to vector<8x2048xf32>
    %106 = arith.maximumf %104, %105 : vector<8x2048xf32>
    %107 = arith.truncf %106 : vector<8x2048xf32> to vector<8x2048xbf16>
    %c0_62 = arith.constant 0 : index
    %c0_63 = arith.constant 0 : index
    %108 = vector.load %arg22[%c0_62, %c0_63] : memref<2048x128xbf16, #tpu.memory_space<vmem>>, vector<2048x128xbf16>
    %cst_64 = arith.constant dense<0.000000e+00> : vector<8x128xf32>
    %109 = tpu.matmul %107, %108, %cst_64 {dimension_numbers = #tpu.dot_dimension_numbers<[1], [0], [0], [1], [0, 0, 1, 1], [], []>} : vector<8x2048xbf16>, vector<2048x128xbf16>, vector<8x128xf32> -> vector<8x128xf32>
    %c0_65 = arith.constant 0 : index
    %c0_66 = arith.constant 0 : index
    %110 = vector.load %arg23[%c0_65, %c0_66] : memref<1x128xf32, #tpu.memory_space<vmem>>, vector<1x128xf32>
    %111 = vector.broadcast %110 : vector<1x128xf32> to vector<8x128xf32>
    %112 = arith.addf %109, %111 : vector<8x128xf32>
    %113 = arith.addf %98, %112 : vector<8x128xf32>
    %c0_67 = arith.constant 0 : index
    %c0_68 = arith.constant 0 : index
    %114 = vector.load %arg18[%c0_67, %c0_68] : memref<1x128xf32, #tpu.memory_space<vmem>>, vector<1x128xf32>
    %c0_69 = arith.constant 0 : index
    %c0_70 = arith.constant 0 : index
    %115 = vector.load %arg19[%c0_69, %c0_70] : memref<1x128xf32, #tpu.memory_space<vmem>>, vector<1x128xf32>
    %cst_71 = arith.constant dense<0.000000e+00> : vector<8xf32>
    %116 = vector.multi_reduction <add>, %113, %cst_71 [1] : vector<8x128xf32> to vector<8xf32>
    %117 = vector.shape_cast %116 : vector<8xf32> to vector<8x1xf32>
    %cst_72 = arith.constant 1.280000e+02 : f32
    %118 = vector.broadcast %cst_72 : f32 to vector<8x1xf32>
    %119 = arith.divf %117, %118 : vector<8x1xf32>
    %120 = vector.broadcast %119 : vector<8x1xf32> to vector<8x128xf32>
    %121 = arith.subf %113, %120 : vector<8x128xf32>
    %122 = arith.mulf %121, %121 : vector<8x128xf32>
    %cst_73 = arith.constant dense<0.000000e+00> : vector<8xf32>
    %123 = vector.multi_reduction <add>, %122, %cst_73 [1] : vector<8x128xf32> to vector<8xf32>
    %124 = vector.shape_cast %123 : vector<8xf32> to vector<8x1xf32>
    %cst_74 = arith.constant 1.280000e+02 : f32
    %125 = vector.broadcast %cst_74 : f32 to vector<8x1xf32>
    %126 = arith.divf %124, %125 : vector<8x1xf32>
    %127 = vector.broadcast %119 : vector<8x1xf32> to vector<8x128xf32>
    %128 = arith.subf %113, %127 : vector<8x128xf32>
    %cst_75 = arith.constant 9.99999974E-6 : f32
    %129 = vector.broadcast %cst_75 : f32 to vector<8x1xf32>
    %130 = arith.addf %126, %129 : vector<8x1xf32>
    %131 = math.rsqrt %130 : vector<8x1xf32>
    %132 = vector.broadcast %131 : vector<8x1xf32> to vector<8x128xf32>
    %133 = arith.mulf %128, %132 : vector<8x128xf32>
    %134 = vector.broadcast %114 : vector<1x128xf32> to vector<8x128xf32>
    %135 = arith.mulf %133, %134 : vector<8x128xf32>
    %136 = vector.broadcast %115 : vector<1x128xf32> to vector<8x128xf32>
    %137 = arith.addf %135, %136 : vector<8x128xf32>
    %138 = arith.truncf %137 : vector<8x128xf32> to vector<8x128xbf16>
    %c0_76 = arith.constant 0 : index
    %c0_77 = arith.constant 0 : index
    %139 = vector.load %arg24[%c0_76, %c0_77] : memref<128x2xbf16, #tpu.memory_space<vmem>>, vector<128x2xbf16>
    %cst_78 = arith.constant dense<0.000000e+00> : vector<8x2xf32>
    %140 = tpu.matmul %138, %139, %cst_78 {dimension_numbers = #tpu.dot_dimension_numbers<[1], [0], [0], [1], [0, 0, 1, 1], [], []>} : vector<8x128xbf16>, vector<128x2xbf16>, vector<8x2xf32> -> vector<8x2xf32>
    %c0_79 = arith.constant 0 : index
    %c0_80 = arith.constant 0 : index
    %141 = vector.load %arg25[%c0_79, %c0_80] : memref<1x2xf32, #tpu.memory_space<vmem>>, vector<1x2xf32>
    %142 = vector.broadcast %141 : vector<1x2xf32> to vector<8x2xf32>
    %143 = arith.addf %140, %142 : vector<8x2xf32>
    %c0_81 = arith.constant 0 : index
    %c0_82 = arith.constant 0 : index
    %144 = vector.load %arg28[%c0_81, %c0_82] : memref<8x2xf32, #tpu.memory_space<vmem>>, vector<8x2xf32>
    tpu.vector_store %arg28[%c0_81, %c0_82], %143 {strides = array<i32>} : memref<8x2xf32, #tpu.memory_space<vmem>>, vector<8x2xf32>,
    return
  }
  func.func @transform_0(%arg0: i32) -> (i32, i32) {
    %c0_i32 = arith.constant 0 : i32
    %c0_i32_0 = arith.constant 0 : i32
    return %arg0, %c0_i32 : i32, i32
  }
  func.func @transform_1(%arg0: i32) -> (i32, i32) {
    %c0_i32 = arith.constant 0 : i32
    %c0_i32_0 = arith.constant 0 : i32
    %c0_i32_1 = arith.constant 0 : i32
    return %c0_i32, %c0_i32_0 : i32, i32
  }
  func.func @transform_2(%arg0: i32) -> (i32, i32) {
    %c0_i32 = arith.constant 0 : i32
    %c0_i32_0 = arith.constant 0 : i32
    %c0_i32_1 = arith.constant 0 : i32
    return %c0_i32, %c0_i32_0 : i32, i32
  }
  func.func @transform_3(%arg0: i32) -> (i32, i32) {
    %c0_i32 = arith.constant 0 : i32
    %c0_i32_0 = arith.constant 0 : i32
    %c0_i32_1 = arith.constant 0 : i32
    return %c0_i32, %c0_i32_0 : i32, i32
  }
  func.func @transform_4(%arg0: i32) -> (i32, i32) {
    %c0_i32 = arith.constant 0 : i32
    %c0_i32_0 = arith.constant 0 : i32
    %c0_i32_1 = arith.constant 0 : i32
    return %c0_i32, %c0_i32_0 : i32, i32
  }
  func.func @transform_5(%arg0: i32) -> (i32, i32) {
    %c0_i32 = arith.constant 0 : i32
    %c0_i32_0 = arith.constant 0 : i32
    %c0_i32_1 = arith.constant 0 : i32
    return %c0_i32, %c0_i32_0 : i32, i32
  }
  func.func @transform_6(%arg0: i32) -> (i32, i32) {
    %c0_i32 = arith.constant 0 : i32
    %c0_i32_0 = arith.constant 0 : i32
    %c0_i32_1 = arith.constant 0 : i32
    return %c0_i32, %c0_i32_0 : i32, i32
  }
  func.func @transform_7(%arg0: i32) -> (i32, i32) {
    %c0_i32 = arith.constant 0 : i32
    %c0_i32_0 = arith.constant 0 : i32
    %c0_i32_1 = arith.constant 0 : i32
    return %c0_i32, %c0_i32_0 : i32, i32
  }
  func.func @transform_8(%arg0: i32) -> (i32, i32) {
    %c0_i32 = arith.constant 0 : i32
    %c0_i32_0 = arith.constant 0 : i32
    %c0_i32_1 = arith.constant 0 : i32
    return %c0_i32, %c0_i32_0 : i32, i32
  }
  func.func @transform_9(%arg0: i32) -> (i32, i32) {
    %c0_i32 = arith.constant 0 : i32
    %c0_i32_0 = arith.constant 0 : i32
    %c0_i32_1 = arith.constant 0 : i32
    return %c0_i32, %c0_i32_0 : i32, i32
  }
  func.func @transform_10(%arg0: i32) -> (i32, i32) {
    %c0_i32 = arith.constant 0 : i32
    %c0_i32_0 = arith.constant 0 : i32
    %c0_i32_1 = arith.constant 0 : i32
    return %c0_i32, %c0_i32_0 : i32, i32
  }
  func.func @transform_11(%arg0: i32) -> (i32, i32) {
    %c0_i32 = arith.constant 0 : i32
    %c0_i32_0 = arith.constant 0 : i32
    %c0_i32_1 = arith.constant 0 : i32
    return %c0_i32, %c0_i32_0 : i32, i32
  }
  func.func @transform_12(%arg0: i32) -> (i32, i32) {
    %c0_i32 = arith.constant 0 : i32
    %c0_i32_0 = arith.constant 0 : i32
    %c0_i32_1 = arith.constant 0 : i32
    return %c0_i32, %c0_i32_0 : i32, i32
  }
  func.func @transform_13(%arg0: i32) -> (i32, i32) {
    %c0_i32 = arith.constant 0 : i32
    %c0_i32_0 = arith.constant 0 : i32
    %c0_i32_1 = arith.constant 0 : i32
    return %c0_i32, %c0_i32_0 : i32, i32
  }
  func.func @transform_14(%arg0: i32) -> (i32, i32) {
    %c0_i32 = arith.constant 0 : i32
    %c0_i32_0 = arith.constant 0 : i32
    %c0_i32_1 = arith.constant 0 : i32
    return %c0_i32, %c0_i32_0 : i32, i32
  }
  func.func @transform_15(%arg0: i32) -> (i32, i32) {
    %c0_i32 = arith.constant 0 : i32
    %c0_i32_0 = arith.constant 0 : i32
    %c0_i32_1 = arith.constant 0 : i32
    return %c0_i32, %c0_i32_0 : i32, i32
  }
  func.func @transform_16(%arg0: i32) -> (i32, i32) {
    %c0_i32 = arith.constant 0 : i32
    %c0_i32_0 = arith.constant 0 : i32
    %c0_i32_1 = arith.constant 0 : i32
    return %c0_i32, %c0_i32_0 : i32, i32
  }
  func.func @transform_17(%arg0: i32) -> (i32, i32) {
    %c0_i32 = arith.constant 0 : i32
    %c0_i32_0 = arith.constant 0 : i32
    %c0_i32_1 = arith.constant 0 : i32
    return %c0_i32, %c0_i32_0 : i32, i32
  }
  func.func @transform_18(%arg0: i32) -> (i32, i32) {
    %c0_i32 = arith.constant 0 : i32
    %c0_i32_0 = arith.constant 0 : i32
    %c0_i32_1 = arith.constant 0 : i32
    return %c0_i32, %c0_i32_0 : i32, i32
  }
  func.func @transform_19(%arg0: i32) -> (i32, i32) {
    %c0_i32 = arith.constant 0 : i32
    %c0_i32_0 = arith.constant 0 : i32
    %c0_i32_1 = arith.constant 0 : i32
    return %c0_i32, %c0_i32_0 : i32, i32
  }
  func.func @transform_20(%arg0: i32) -> (i32, i32) {
    %c0_i32 = arith.constant 0 : i32
    %c0_i32_0 = arith.constant 0 : i32
    %c0_i32_1 = arith.constant 0 : i32
    return %c0_i32, %c0_i32_0 : i32, i32
  }
  func.func @transform_21(%arg0: i32) -> (i32, i32) {
    %c0_i32 = arith.constant 0 : i32
    %c0_i32_0 = arith.constant 0 : i32
    %c0_i32_1 = arith.constant 0 : i32
    return %c0_i32, %c0_i32_0 : i32, i32
  }
  func.func @transform_22(%arg0: i32) -> (i32, i32) {
    %c0_i32 = arith.constant 0 : i32
    %c0_i32_0 = arith.constant 0 : i32
    %c0_i32_1 = arith.constant 0 : i32
    return %c0_i32, %c0_i32_0 : i32, i32
  }
  func.func @transform_23(%arg0: i32) -> (i32, i32) {
    %c0_i32 = arith.constant 0 : i32
    %c0_i32_0 = arith.constant 0 : i32
    %c0_i32_1 = arith.constant 0 : i32
    return %c0_i32, %c0_i32_0 : i32, i32
  }
  func.func @transform_24(%arg0: i32) -> (i32, i32) {
    %c0_i32 = arith.constant 0 : i32
    %c0_i32_0 = arith.constant 0 : i32
    %c0_i32_1 = arith.constant 0 : i32
    return %c0_i32, %c0_i32_0 : i32, i32
  }
  func.func @transform_25(%arg0: i32) -> (i32, i32) {
    %c0_i32 = arith.constant 0 : i32
    %c0_i32_0 = arith.constant 0 : i32
    %c0_i32_1 = arith.constant 0 : i32
    return %c0_i32, %c0_i32_0 : i32, i32
  }
  func.func @transform_26(%arg0: i32) -> (i32, i32) {
    %c0_i32 = arith.constant 0 : i32
    %c0_i32_0 = arith.constant 0 : i32
    %c0_i32_1 = arith.constant 0 : i32
    return %c0_i32, %c0_i32_0 : i32, i32
  }
  func.func @transform_27(%arg0: i32) -> (i32, i32) {
    %c0_i32 = arith.constant 0 : i32
    %c0_i32_0 = arith.constant 0 : i32
    return %arg0, %c0_i32 : i32, i32
  }
}

</mosaic_0001>

<bundles_post_ra>
// kernel: tpu_custom_call.1
= control target key start
LH: loop header
LB: loop body
LE: loop exit
PB: predicated region body
PF: predicated region fallthrough
CT: control target
= control target key end

     0   :  { %s7942_s0 = inlined_call_operand.vmem [shape: f32[128,4], index: 0, kind: input, shape index: {}]   ;;  %s7943_s1 = inlined_call_operand.hbm [shape: bf16[4,128], index: 1, kind: input, shape index: {}]   ;;  %s7944_s2 = inlined_call_operand.hbm [shape: f32[1,128], index: 2, kind: input, shape index: {}]   ;;  %s7945_s3 = inlined_call_operand.hbm [shape: f32[64,128], index: 3, kind: input, shape index: {}]   ;;  %s7946_s4 = inlined_call_operand.hbm [shape: f32[1,128], index: 4, kind: input, shape index: {}]   ;;  %s7947_s5 = inlined_call_operand.hbm [shape: bf16[128,128], index: 5, kind: input, shape index: {}]   ;;  %s7948_s6 = inlined_call_operand.hbm [shape: f32[1,128], index: 6, kind: input, shape index: {}]   ;;  %s7949_s7 = inlined_call_operand.hbm [shape: bf16[128,128], index: 7, kind: input, shape index: {}]   ;;  %s7950_s8 = inlined_call_operand.hbm [shape: f32[1,128], index: 8, kind: input, shape index: {}]   ;;  %s7951_s9 = inlined_call_operand.vmem [shape: bf16[128,256], index: 9, kind: input, shape index: {}]   ;;  %s7952_s10 = inlined_call_operand.hbm [shape: f32[1,256], index: 10, kind: input, shape index: {}]   ;;  %s7953_s11 = inlined_call_operand.hbm [shape: bf16[128,128], index: 11, kind: input, shape index: {}]   ;;  %s7954_s12 = inlined_call_operand.hbm [shape: f32[1,128], index: 12, kind: input, shape index: {}]   ;;  %s7955_s13 = inlined_call_operand.hbm [shape: f32[1,128], index: 13, kind: input, shape index: {}]   ;;  %s7956_s14 = inlined_call_operand.hbm [shape: f32[1,128], index: 14, kind: input, shape index: {}]   ;;  %s7957_s15 = inlined_call_operand.hbm [shape: f32[1,128], index: 15, kind: input, shape index: {}]   ;;  %s7958_s16 = inlined_call_operand.hbm [shape: f32[1,128], index: 16, kind: input, shape index: {}]   ;;  %s7959_s17 = inlined_call_operand.hbm [shape: f32[1,128], index: 17, kind: input, shape index: {}]   ;;  %s7960_s18 = inlined_call_operand.hbm [shape: f32[1,128], index: 18, kind: input, shape index: {}]   ;;  %s7961_s19 = inlined_call_operand.hbm [shape: bf16[128,2048], index: 19, kind: input, shape index: {}]   ;;  %s7962_s20 = inlined_call_operand.vmem [shape: f32[1,2048], index: 20, kind: input, shape index: {}]   ;;  %s7963_s21 = inlined_call_operand.hbm [shape: bf16[2048,128], index: 21, kind: input, shape index: {}]   ;;  %s7964_s22 = inlined_call_operand.hbm [shape: f32[1,128], index: 22, kind: input, shape index: {}]   ;;  %s7965_s23 = inlined_call_operand.vmem [shape: bf16[128,2], index: 23, kind: input, shape index: {}]   ;;  %s7966_s24 = inlined_call_operand.vmem [shape: f32[1,2], index: 24, kind: input, shape index: {}]   ;;  %s7967_s25 = inlined_call_operand.vmem [shape: f32[128,128], index: 25, kind: input, shape index: {}]   ;;  %s7968_s26 = inlined_call_operand.vmem [shape: f32[8,64], index: 26, kind: input, shape index: {}]   ;;  %s7969_s27 = inlined_call_operand.vmem [shape: f32[16,2], index: 27, kind: output, shape index: {}]  }
   0x1   :  { %7996 = sst [smem:[#allocation45_spill]] %s7942_s0 }
   0x2   :  { %7997 = sst [smem:[#allocation46_spill]] %s7943_s1 }
   0x3   :  { %7998 = sst [smem:[#allocation47_spill]] %s7944_s2 }
   0x4   :  { %7999 = sst [smem:[#allocation48_spill]] %s7945_s3 }
   0x5   :  { %8000 = sst [smem:[#allocation49_spill]] %s7946_s4 }
   0x6   :  { %8001 = sst [smem:[#allocation50_spill]] %s7947_s5 }
   0x7   :  { %8002 = sst [smem:[#allocation51_spill]] %s7948_s6 }
   0x8   :  { %8003 = sst [smem:[#allocation52_spill]] %s7949_s7 }
   0x9   :  { %8004 = sst [smem:[#allocation53_spill]] %s7950_s8 }
   0xa   :  { %8005 = sst [smem:[#allocation54_spill]] %s7951_s9 }
   0xb   :  { %8006 = sst [smem:[#allocation55_spill]] %s7952_s10 }
   0xc   :  { %8007 = sst [smem:[#allocation56_spill]] %s7953_s11 }
   0xd   :  { %8008 = sst [smem:[#allocation57_spill]] %s7955_s13 }
   0xe   :  { %8009 = sst [smem:[#allocation58_spill]] %s7957_s15 }
   0xf   :  { %8010 = sst [smem:[#allocation59_spill]] %s7959_s17 }
  0x10   :  { %8011 = sst [smem:[#allocation60_spill]] %s7961_s19 }
  0x11   :  { %8012 = sst [smem:[#allocation61_spill]] %s7962_s20 }
  0x12   :  { %8013 = sst [smem:[#allocation62_spill]] %s7965_s23 }
  0x13   :  { %8014 = sst [smem:[#allocation63_spill]] %s7966_s24 }
  0x14   :  { %8015 = sst [smem:[#allocation64_spill]] %s7969_s27 }
  0x15   :  { %32 = vsyncpa [#allocation3], 0 }
  0x16   :  { %33 = vsyncpa [#allocation5], 0 }
  0x17   :  { %34 = vsyncpa [#allocation8], 0 }
  0x18   :  { %35 = vsyncpa [#allocation11], 0 }
  0x19   :  { %36 = vsyncpa [#allocation14], 0 }
  0x1a   :  { %37 = vsyncpa [#allocation17], 0 }
  0x1b   :  { %38 = vsyncpa [#allocation20], 0 }
  0x1c   :  { %39 = vsyncpa [#allocation23], 0 }
  0x1d   :  { %40 = vsyncpa [#allocation26], 0 }
  0x1e   :  { %41 = vsyncpa [#allocation29], 0 }
  0x1f   :  { %42 = vsyncpa [#allocation32], 0  ;;  %s7114_s7 = smov 0  }
  0x20 LB: > { %8016 = sst [smem:[#allocation44_spill]] %s6943_s7  ;;  %s6945_s4 = smov [#allocation4]   ;;  %s6943_s7 = sphi %s7114_s7, %s48_s7  }
  0x21   : > { %s675_s8 = sshll.u32 %s6945_s4, 4  ;;  %s7120_s30 = sadd.s32 4294967295, %s6943_s7   ;;  %s7125_s8 = int_to_ptr.vmem [resolvable:$true] %s675_s8 }
  0x22   : > { %p5053_p0 = scmp.ge.s32.totalorder %s6943_s7, 1  ;;  %p651_p1 = scmp.lt.s32.totalorder %s6943_s7, 3 }
  0x23   : > { %p7987_p2 = scmp.eq.s32.totalorder %s7120_s30, 0  ;;  %s6946_s5 = smov [#allocation7]  }
  0x24   : > { %p7127_p3 = pnand %p5053_p0, %p651_p1  ;;  %s699_s28 = sshll.u32 %s6946_s5, 4  ;;  %s7133_s28 = int_to_ptr.vmem [resolvable:$true] %s699_s28 }
  0x25   : > { %s6947_s0 = smov [#allocation10]   ;;  %s6948_s1 = smov [#allocation13]  }
  0x26   : > { %s8017_s9 = scalar_select %p7127_p3, 1, 0 }
  0x27   : > { %p5987_p4 = pneg %p7127_p3  ;;  %s723_s10 = sshll.u32 %s6947_s0, 4  ;;  %s7141_s10 = int_to_ptr.vmem [resolvable:$true] %s723_s10 }
  0x28   : > { %s747_s6 = sshll.u32 %s6948_s1, 4  ;;  %s8019_s3 = sld [smem:[#allocation47_spill]]  ;;  %s7143_s6 = int_to_ptr.vmem [resolvable:$true] %s747_s6 }
  0x29   : > { %p7137_p5 = pnand %p7987_p2, %p5987_p4 }
  0x2b   : > { %p7153_p7 = pneg %p7137_p5 }
  0x2e   : > { %s6333_s4 = scalar_lea.hbm %s8019_s3, 16 }
  0x2f   : > { %p6334_p6 = scmp.ne.s32.totalorder %s8019_s3, %s6333_s4  ;;  %p6340_p10 = scmp.lt.u32.totalorder %s6333_s4, %s8019_s3 }
  0x31   : > { %p6336_p8 = pnand %p7153_p7, %p6334_p6 }
  0x33   : > { %p6337_p9 = pneg %p6336_p8 }
  0x35   : > { %p6342_p11 = pnand %p6340_p10, %p6337_p9 }
  0x37   : > { %6345 = shalt.err (!%p6342_p11)
}
  0x38   : > { %s6346_s7 = scalar_lea.vmem %s7125_s8, 16  ;;  %s6353_s11 = scalar_lea.vmem %s7125_s8, 32 }
  0x39   : > { %p6347_p12 = scmp.ne.s32.totalorder %s7125_s8, %s6346_s7  ;;  %p6354_p1 = scmp.lt.s32.totalorder %s7125_s8, %s7125_s8 }
  0x3a   : > { %p6355_p4 = scmp.lt.s32.totalorder %s6353_s11, %s6346_s7 }
  0x3b   : > { %p6349_p13 = pnand %p6347_p12, %p7153_p7 }
  0x3c   : > { %p6356_p6 = por %p6355_p4, %p6354_p1 }
  0x3d   : > { %p6350_p0 = pneg %p6349_p13 }
  0x3f   : > { %p6357_p8 = pnand %p6356_p6, %p6350_p0 }
  0x41   : > { %6360 = shalt.err (!%p6357_p8)
}
  0x42   : > { %5993 = dma.hbm_to_vmem [thread:$0]  (!%p7137_p5), %s8019_s3, 16, %s7125_s8, [#allocation5]  }
  0x43   : > { %s8021_s1 = sld [smem:[#allocation49_spill]] }
  0x49   : > { %s6361_s24 = scalar_lea.hbm %s8021_s1, 16 }
  0x4a   : > { %p6362_p9 = scmp.ne.s32.totalorder %s8021_s1, %s6361_s24  ;;  %p6368_p12 = scmp.lt.u32.totalorder %s6361_s24, %s8021_s1 }
  0x4c   : > { %p6364_p10 = pnand %p6362_p9, %p7153_p7 }
  0x4e   : > { %p6365_p11 = pneg %p6364_p10 }
  0x50   : > { %p6370_p13 = pnand %p6368_p12, %p6365_p11 }
  0x52   : > { %6373 = shalt.err (!%p6370_p13)
}
  0x53   : > { %s6374_s8 = scalar_lea.vmem %s7133_s28, 16  ;;  %s6381_s20 = scalar_lea.vmem %s7133_s28, 32 }
  0x54   : > { %p6375_p0 = scmp.ne.s32.totalorder %s7133_s28, %s6374_s8  ;;  %p6382_p6 = scmp.lt.s32.totalorder %s7133_s28, %s7133_s28 }
  0x55   : > { %p6383_p8 = scmp.lt.s32.totalorder %s6381_s20, %s6374_s8 }
  0x56   : > { %p6377_p1 = pnand %p6375_p0, %p7153_p7 }
  0x57   : > { %p6384_p9 = por %p6383_p8, %p6382_p6 }
  0x58   : > { %p6378_p4 = pneg %p6377_p1 }
  0x5a   : > { %p6385_p10 = pnand %p6384_p9, %p6378_p4 }
  0x5c   : > { %6388 = shalt.err (!%p6385_p10)
}
  0x5d   : > { %5999 = dma.hbm_to_vmem [thread:$0]  (!%p7137_p5), %s8021_s1, 16, %s7133_s28, [#allocation8]  }
  0x5e   : > { %s8022_s4 = sld [smem:[#allocation51_spill]] }
  0x64   : > { %s6389_s5 = scalar_lea.hbm %s8022_s4, 16 }
  0x65   : > { %p6390_p11 = scmp.ne.s32.totalorder %s8022_s4, %s6389_s5  ;;  %p6396_p0 = scmp.lt.u32.totalorder %s6389_s5, %s8022_s4 }
  0x67   : > { %p6392_p12 = pnand %p6390_p11, %p7153_p7 }
  0x69   : > { %p6393_p13 = pneg %p6392_p12 }
  0x6b   : > { %p6398_p1 = pnand %p6396_p0, %p6393_p13 }
  0x6d   : > { %6401 = shalt.err (!%p6398_p1)
}
  0x6e   : > { %s6402_s28 = scalar_lea.vmem %s7141_s10, 16  ;;  %s6409_s23 = scalar_lea.vmem %s7141_s10, 32 }
  0x6f   : > { %p6403_p4 = scmp.ne.s32.totalorder %s7141_s10, %s6402_s28  ;;  %p6410_p9 = scmp.lt.s32.totalorder %s7141_s10, %s7141_s10 }
  0x70   : > { %p6411_p10 = scmp.lt.s32.totalorder %s6409_s23, %s6402_s28 }
  0x71   : > { %p6405_p6 = pnand %p6403_p4, %p7153_p7 }
  0x72   : > { %p6412_p11 = por %p6411_p10, %p6410_p9 }
  0x73   : > { %p6406_p8 = pneg %p6405_p6 }
  0x75   : > { %p6413_p12 = pnand %p6412_p11, %p6406_p8 }
  0x77   : > { %6416 = shalt.err (!%p6413_p12)
}
  0x78   : > { %6005 = dma.hbm_to_vmem [thread:$0]  (!%p7137_p5), %s8022_s4, 16, %s7141_s10, [#allocation11]  }
  0x79   : > { %s8023_s7 = sld [smem:[#allocation53_spill]] }
  0x7f   : > { %s8024_s11 = smov %s8023_s7  ;;  %s6417_s8 = scalar_lea.hbm %s8023_s7, 16 }
  0x80   : > { %p6418_p13 = scmp.ne.s32.totalorder %s8024_s11, %s6417_s8  ;;  %p6424_p4 = scmp.lt.u32.totalorder %s6417_s8, %s8024_s11 }
  0x82   : > { %p6420_p0 = pnand %p6418_p13, %p7153_p7 }
  0x84   : > { %p6421_p1 = pneg %p6420_p0 }
  0x86   : > { %p6426_p6 = pnand %p6424_p4, %p6421_p1 }
  0x88   : > { %6429 = shalt.err (!%p6426_p6)
}
  0x89   : > { %s6430_s10 = scalar_lea.vmem %s7143_s6, 16  ;;  %s6437_s1 = scalar_lea.vmem %s7143_s6, 32 }
  0x8a   : > { %p6431_p8 = scmp.ne.s32.totalorder %s7143_s6, %s6430_s10  ;;  %p6438_p11 = scmp.lt.s32.totalorder %s7143_s6, %s7143_s6 }
  0x8b   : > { %p6439_p12 = scmp.lt.s32.totalorder %s6437_s1, %s6430_s10 }
  0x8c   : > { %p6433_p9 = pnand %p6431_p8, %p7153_p7 }
  0x8d   : > { %p6440_p13 = por %p6439_p12, %p6438_p11 }
  0x8e   : > { %p6434_p10 = pneg %p6433_p9 }
  0x90   : > { %p6441_p0 = pnand %p6440_p13, %p6434_p10 }
  0x92   : > { %6444 = shalt.err (!%p6441_p0)
}
  0x93   : > { %6011 = dma.hbm_to_vmem [thread:$0]  (!%p7137_p5), %s8024_s11, 16, %s7143_s6, [#allocation14]  }
  0x94   : > { %s6949_s2 = smov [#allocation16]   ;;  %s6950_s7 = smov [#allocation19]  }
  0x95   : > { %s771_s5 = sshll.u32 %s6949_s2, 4  ;;  %s796_s8 = sshll.u32 %s6950_s7, 4  ;;  %s772_s5 = int_to_ptr.vmem [resolvable:$true] %s771_s5  ;;  %s797_s8 = int_to_ptr.vmem [resolvable:$true] %s796_s8 }
  0x96   : > { %s8025_s23 = sld [smem:[#allocation56_spill]] }
  0x9c   : > { %s6445_s10 = scalar_lea.hbm %s8025_s23, 1024 }
  0x9d   : > { %p6446_p1 = scmp.ne.s32.totalorder %s8025_s23, %s6445_s10  ;;  %p6452_p8 = scmp.lt.u32.totalorder %s6445_s10, %s8025_s23 }
  0x9f   : > { %p6448_p4 = pnand %p6446_p1, %p7153_p7 }
  0xa1   : > { %p6449_p6 = pneg %p6448_p4 }
  0xa3   : > { %p6454_p9 = pnand %p6452_p8, %p6449_p6 }
  0xa5   : > { %6457 = shalt.err (!%p6454_p9)
}
  0xa6   : > { %s6458_s6 = scalar_lea.vmem %s772_s5, 1024  ;;  %p6466_p13 = scmp.lt.s32.totalorder %s772_s5, %s772_s5 }
  0xa7   : > { %p6459_p10 = scmp.ne.s32.totalorder %s772_s5, %s6458_s6  ;;  %p6467_p0 = scmp.lt.s32.totalorder %s6458_s6, %s6458_s6 }
  0xa9   : > { %p6461_p11 = pnand %p6459_p10, %p7153_p7  ;;  %p6468_p2 = por %p6467_p0, %p6466_p13 }
  0xab   : > { %p6462_p12 = pneg %p6461_p11 }
  0xad   : > { %p6469_p3 = pnand %p6468_p2, %p6462_p12 }
  0xaf   : > { %6472 = shalt.err (!%p6469_p3)
}
  0xb0   : > { %s7991_s3 = smov 64   ;;  %s7989_s27 = smov 4  }
  0xb1   : > { %6017 = dma.hbm_to_vmem [thread:$0]  (!%p7137_p5), %s8025_s23, 1024, %s772_s5, [#allocation17], %s7991_s3, %s7991_s3, %s7989_s27  }
  0xb2   : > { %s8026_s13 = sld [smem:[#allocation57_spill]] }
  0xb8   : > { %s6473_s28 = scalar_lea.hbm %s8026_s13, 16 }
  0xb9   : > { %p6474_p2 = scmp.ne.s32.totalorder %s8026_s13, %s6473_s28  ;;  %p6480_p4 = scmp.lt.u32.totalorder %s6473_s28, %s8026_s13 }
  0xbb   : > { %p6476_p3 = pnand %p6474_p2, %p7153_p7 }
  0xbd   : > { %p6477_p1 = pneg %p6476_p3 }
  0xbf   : > { %p6482_p6 = pnand %p6480_p4, %p6477_p1 }
  0xc1   : > { %6485 = shalt.err (!%p6482_p6)
}
  0xc2   : > { %s6486_s4 = scalar_lea.vmem %s797_s8, 16  ;;  %s6493_s5 = scalar_lea.vmem %s797_s8, 32 }
  0xc3   : > { %p6487_p8 = scmp.ne.s32.totalorder %s797_s8, %s6486_s4  ;;  %p6494_p11 = scmp.lt.s32.totalorder %s797_s8, %s797_s8 }
  0xc4   : > { %p6495_p12 = scmp.lt.s32.totalorder %s6493_s5, %s6486_s4 }
  0xc5   : > { %p6489_p9 = pnand %p6487_p8, %p7153_p7 }
  0xc6   : > { %p6496_p13 = por %p6495_p12, %p6494_p11 }
  0xc7   : > { %p6490_p10 = pneg %p6489_p9 }
  0xc9   : > { %p6497_p0 = pnand %p6496_p13, %p6490_p10 }
  0xcb   : > { %6500 = shalt.err (!%p6497_p0)
}
  0xcc   : > { %6023 = dma.hbm_to_vmem [thread:$0]  (!%p7137_p5), %s8026_s13, 16, %s797_s8, [#allocation20]  }
  0xcd   : > { %s6953_s20 = smov [#allocation22]   ;;  %s6954_s10 = smov [#allocation25]  }
  0xce   : > { %s818_s28 = sshll.u32 %s6953_s20, 4  ;;  %s840_s1 = sshll.u32 %s6954_s10, 4  ;;  %s819_s28 = int_to_ptr.vmem [resolvable:$true] %s818_s28  ;;  %s841_s1 = int_to_ptr.vmem [resolvable:$true] %s840_s1 }
  0xcf   : > { %s8027_s15 = sld [smem:[#allocation58_spill]] }
  0xd5   : > { %s6501_s27 = scalar_lea.hbm %s8027_s15, 16 }
  0xd6   : > { %p6502_p2 = scmp.ne.s32.totalorder %s8027_s15, %s6501_s27  ;;  %p6508_p4 = scmp.lt.u32.totalorder %s6501_s27, %s8027_s15 }
  0xd8   : > { %p6504_p3 = pnand %p6502_p2, %p7153_p7 }
  0xda   : > { %p6505_p1 = pneg %p6504_p3 }
  0xdc   : > { %p6510_p6 = pnand %p6508_p4, %p6505_p1 }
  0xde   : > { %6513 = shalt.err (!%p6510_p6)
}
  0xdf   : > { %s6514_s8 = scalar_lea.vmem %s819_s28, 16  ;;  %s6521_s7 = scalar_lea.vmem %s819_s28, 32 }
  0xe0   : > { %p6515_p8 = scmp.ne.s32.totalorder %s819_s28, %s6514_s8  ;;  %p6522_p11 = scmp.lt.s32.totalorder %s819_s28, %s819_s28 }
  0xe1   : > { %p6523_p12 = scmp.lt.s32.totalorder %s6521_s7, %s6514_s8 }
  0xe2   : > { %p6517_p9 = pnand %p6515_p8, %p7153_p7 }
  0xe3   : > { %p6524_p13 = por %p6523_p12, %p6522_p11 }
  0xe4   : > { %p6518_p10 = pneg %p6517_p9 }
  0xe6   : > { %p6525_p0 = pnand %p6524_p13, %p6518_p10 }
  0xe8   : > { %6528 = shalt.err (!%p6525_p0)
}
  0xe9   : > { %6029 = dma.hbm_to_vmem [thread:$0]  (!%p7137_p5), %s8027_s15, 16, %s819_s28, [#allocation23]  }
  0xea   : > { %s8028_s17 = sld [smem:[#allocation59_spill]] }
  0xf0   : > { %s6529_s24 = scalar_lea.hbm %s8028_s17, 16 }
  0xf1   : > { %p6530_p2 = scmp.ne.s32.totalorder %s8028_s17, %s6529_s24  ;;  %p6536_p4 = scmp.lt.u32.totalorder %s6529_s24, %s8028_s17 }
  0xf3   : > { %p6532_p3 = pnand %p6530_p2, %p7153_p7 }
  0xf5   : > { %p6533_p1 = pneg %p6532_p3 }
  0xf7   : > { %p6538_p6 = pnand %p6536_p4, %p6533_p1 }
  0xf9   : > { %6541 = shalt.err (!%p6538_p6)
}
  0xfa   : > { %s6542_s8 = scalar_lea.vmem %s841_s1, 16  ;;  %s6549_s28 = scalar_lea.vmem %s841_s1, 32 }
  0xfb   : > { %p6543_p8 = scmp.ne.s32.totalorder %s841_s1, %s6542_s8  ;;  %p6550_p11 = scmp.lt.s32.totalorder %s841_s1, %s841_s1 }
  0xfc   : > { %p6551_p12 = scmp.lt.s32.totalorder %s6549_s28, %s6542_s8 }
  0xfd   : > { %p6545_p9 = pnand %p6543_p8, %p7153_p7 }
  0xfe   : > { %p6552_p13 = por %p6551_p12, %p6550_p11 }
  0xff   : > { %p6546_p10 = pneg %p6545_p9 }
 0x101   : > { %p6553_p0 = pnand %p6552_p13, %p6546_p10 }
 0x103   : > { %6556 = shalt.err (!%p6553_p0)
}
 0x104   : > { %6035 = dma.hbm_to_vmem [thread:$0]  (!%p7137_p5), %s8028_s17, 16, %s841_s1, [#allocation26]  }
 0x105   : > { %s6955_s10 = smov [#allocation28]   ;;  %s8029_s19 = sld [smem:[#allocation60_spill]] }
 0x106   : > { %s861_s3 = sshll.u32 %s6955_s10, 4  ;;  %s862_s3 = int_to_ptr.vmem [resolvable:$true] %s861_s3 }
 0x10b   : > { %s6557_s6 = scalar_lea.hbm %s8029_s19, 16384 }
 0x10c   : > { %p6558_p2 = scmp.ne.s32.totalorder %s8029_s19, %s6557_s6  ;;  %p6564_p4 = scmp.lt.u32.totalorder %s6557_s6, %s8029_s19 }
 0x10e   : > { %p6560_p3 = pnand %p6558_p2, %p7153_p7 }
 0x110   : > { %p6561_p1 = pneg %p6560_p3 }
 0x112   : > { %p6566_p6 = pnand %p6564_p4, %p6561_p1 }
 0x114   : > { %6569 = shalt.err (!%p6566_p6)
}
 0x115   : > { %s6570_s1 = scalar_lea.vmem %s862_s3, 16384  ;;  %p6578_p11 = scmp.lt.s32.totalorder %s862_s3, %s862_s3 }
 0x116   : > { %p6571_p8 = scmp.ne.s32.totalorder %s862_s3, %s6570_s1  ;;  %p6579_p12 = scmp.lt.s32.totalorder %s6570_s1, %s6570_s1 }
 0x118   : > { %p6573_p9 = pnand %p6571_p8, %p7153_p7  ;;  %p6580_p13 = por %p6579_p12, %p6578_p11 }
 0x11a   : > { %p6574_p10 = pneg %p6573_p9 }
 0x11c   : > { %p6581_p0 = pnand %p6580_p13, %p6574_p10 }
 0x11e   : > { %6584 = shalt.err (!%p6581_p0)
}
 0x11f   : > { %s6956_s28 = smov 1024   ;;  %s8030_s7 = smov 64  }
 0x120   : > { %6041 = dma.hbm_to_vmem [thread:$0]  (!%p7137_p5), %s8029_s19, 16384, %s862_s3, [#allocation29], %s6956_s28, %s6956_s28, %s8030_s7  }
 0x121   : > { %s6957_s27 = smov [#allocation2]   ;;  %s6958_s6 = smov [#allocation6]  }
 0x122   : > { %s664_s24 = sshll.u32 %s6957_s27, 4  ;;  %s685_s4 = sshll.u32 %s6958_s6, 4  ;;  %s665_s24 = int_to_ptr.vmem [resolvable:$true] %s664_s24  ;;  %s686_s4 = int_to_ptr.vmem [resolvable:$true] %s685_s4 }
 0x123   : > { %s8031_s8 = sld [smem:[#allocation46_spill]] }
 0x129   : > { %s6585_s1 = scalar_lea.hbm %s8031_s8, 32 }
 0x12a   : > { %p6586_p2 = scmp.ne.s32.totalorder %s8031_s8, %s6585_s1  ;;  %p6592_p4 = scmp.lt.u32.totalorder %s6585_s1, %s8031_s8 }
 0x12c   : > { %p6588_p3 = pnand %p6586_p2, %p7153_p7 }
 0x12e   : > { %p6589_p1 = pneg %p6588_p3 }
 0x130   : > { %p6594_p6 = pnand %p6592_p4, %p6589_p1 }
 0x132   : > { %6597 = shalt.err (!%p6594_p6)
}
 0x133   : > { %s6598_s3 = scalar_lea.vmem %s665_s24, 32  ;;  %p6606_p11 = scmp.lt.s32.totalorder %s665_s24, %s665_s24 }
 0x134   : > { %p6599_p8 = scmp.ne.s32.totalorder %s665_s24, %s6598_s3  ;;  %p6607_p12 = scmp.lt.s32.totalorder %s6598_s3, %s6598_s3 }
 0x136   : > { %p6601_p9 = pnand %p6599_p8, %p7153_p7  ;;  %p6608_p13 = por %p6607_p12, %p6606_p11 }
 0x138   : > { %p6602_p10 = pneg %p6601_p9 }
 0x13a   : > { %p6609_p0 = pnand %p6608_p13, %p6602_p10 }
 0x13c   : > { %6612 = shalt.err (!%p6609_p0)
}
 0x13d   : > { %5990 = dma.hbm_to_vmem [thread:$0]  (!%p7137_p5), %s8031_s8, 32, %s665_s24, [#allocation3]  }
 0x13e   : > { %s8032_s10 = sld [smem:[#allocation48_spill]] }
 0x144   : > { %s6613_s27 = scalar_lea.hbm %s8032_s10, 1024 }
 0x145   : > { %p6614_p2 = scmp.ne.s32.totalorder %s8032_s10, %s6613_s27  ;;  %p6620_p4 = scmp.lt.u32.totalorder %s6613_s27, %s8032_s10 }
 0x147   : > { %p6616_p3 = pnand %p6614_p2, %p7153_p7 }
 0x149   : > { %p6617_p1 = pneg %p6616_p3 }
 0x14b   : > { %p6622_p6 = pnand %p6620_p4, %p6617_p1 }
 0x14d   : > { %6625 = shalt.err (!%p6622_p6)
}
 0x14e   : > { %s6626_s20 = scalar_lea.vmem %s686_s4, 1024  ;;  %p6634_p11 = scmp.lt.s32.totalorder %s686_s4, %s686_s4 }
 0x14f   : > { %p6627_p8 = scmp.ne.s32.totalorder %s686_s4, %s6626_s20  ;;  %p6635_p12 = scmp.lt.s32.totalorder %s6626_s20, %s6626_s20 }
 0x151   : > { %p6629_p9 = pnand %p6627_p8, %p7153_p7  ;;  %p6636_p13 = por %p6635_p12, %p6634_p11 }
 0x153   : > { %p6630_p10 = pneg %p6629_p9 }
 0x155   : > { %p6637_p0 = pnand %p6636_p13, %p6630_p10 }
 0x157   : > { %6640 = shalt.err (!%p6637_p0)
}
 0x158   : > { %s6959_s24 = smov 128   ;;  %s6960_s3 = smov 8  }
 0x159   : > { %5996 = dma.hbm_to_vmem [thread:$0]  (!%p7137_p5), %s8032_s10, 1024, %s686_s4, [#allocation5], %s6959_s24, %s6959_s24, %s6960_s3  }
 0x15a   : > { %s6961_s15 = smov [#allocation9]   ;;  %s6962_s27 = smov [#allocation12]  }
 0x15b   : > { %s709_s28 = sshll.u32 %s6961_s15, 4  ;;  %s733_s6 = sshll.u32 %s6962_s27, 4  ;;  %s710_s28 = int_to_ptr.vmem [resolvable:$true] %s709_s28  ;;  %s734_s6 = int_to_ptr.vmem [resolvable:$true] %s733_s6 }
 0x15c   : > { %s8033_s1 = sld [smem:[#allocation50_spill]] }
 0x162   : > { %s6641_s20 = scalar_lea.hbm %s8033_s1, 1024 }
 0x163   : > { %p6642_p2 = scmp.ne.s32.totalorder %s8033_s1, %s6641_s20  ;;  %p6648_p4 = scmp.lt.u32.totalorder %s6641_s20, %s8033_s1 }
 0x165   : > { %p6644_p3 = pnand %p6642_p2, %p7153_p7 }
 0x167   : > { %p6645_p1 = pneg %p6644_p3 }
 0x169   : > { %p6650_p6 = pnand %p6648_p4, %p6645_p1 }
 0x16b   : > { %6653 = shalt.err (!%p6650_p6)
}
 0x16c   : > { %s6654_s4 = scalar_lea.vmem %s710_s28, 1024  ;;  %p6662_p11 = scmp.lt.s32.totalorder %s710_s28, %s710_s28 }
 0x16d   : > { %p6655_p8 = scmp.ne.s32.totalorder %s710_s28, %s6654_s4  ;;  %p6663_p12 = scmp.lt.s32.totalorder %s6654_s4, %s6654_s4 }
 0x16f   : > { %p6657_p9 = pnand %p6655_p8, %p7153_p7  ;;  %p6664_p13 = por %p6663_p12, %p6662_p11 }
 0x171   : > { %p6658_p10 = pneg %p6657_p9 }
 0x173   : > { %p6665_p0 = pnand %p6664_p13, %p6658_p10 }
 0x175   : > { %6668 = shalt.err (!%p6665_p0)
}
 0x176   : > { %s8034_s17 = smov 4   ;;  %s8035_s3 = sld [smem:[#allocation52_spill]] }
 0x177   : > { %6002 = dma.hbm_to_vmem [thread:$0]  (!%p7137_p5), %s8033_s1, 1024, %s710_s28, [#allocation8], %s8030_s7, %s8030_s7, %s8034_s17  }
 0x17c   : > { %s6669_s13 = scalar_lea.hbm %s8035_s3, 1024 }
 0x17d   : > { %p6670_p2 = scmp.ne.s32.totalorder %s8035_s3, %s6669_s13  ;;  %p6676_p4 = scmp.lt.u32.totalorder %s6669_s13, %s8035_s3 }
 0x17f   : > { %p6672_p3 = pnand %p6670_p2, %p7153_p7 }
 0x181   : > { %p6673_p1 = pneg %p6672_p3 }
 0x183   : > { %p6678_p6 = pnand %p6676_p4, %p6673_p1 }
 0x185   : > { %6681 = shalt.err (!%p6678_p6)
}
 0x186   : > { %s6682_s2 = scalar_lea.vmem %s734_s6, 1024  ;;  %p6690_p11 = scmp.lt.s32.totalorder %s734_s6, %s734_s6 }
 0x187   : > { %p6683_p8 = scmp.ne.s32.totalorder %s734_s6, %s6682_s2  ;;  %p6691_p12 = scmp.lt.s32.totalorder %s6682_s2, %s6682_s2 }
 0x189   : > { %p6685_p9 = pnand %p6683_p8, %p7153_p7  ;;  %p6692_p13 = por %p6691_p12, %p6690_p11 }
 0x18b   : > { %p6686_p10 = pneg %p6685_p9 }
 0x18d   : > { %p6693_p0 = pnand %p6692_p13, %p6686_p10 }
 0x18f   : > { %6696 = shalt.err (!%p6693_p0)
}
 0x190   : > { %6008 = dma.hbm_to_vmem [thread:$0]  (!%p7137_p5), %s8035_s3, 1024, %s734_s6, [#allocation11], %s8030_s7, %s8030_s7, %s8034_s17  }
 0x191   : > { %s6963_s4 = smov [#allocation15]   ;;  %s6964_s23 = smov [#allocation18]  }
 0x192   : > { %s761_s19 = sshll.u32 %s6963_s4, 4  ;;  %s785_s8 = sshll.u32 %s6964_s23, 4  ;;  %s762_s19 = int_to_ptr.vmem [resolvable:$true] %s761_s19  ;;  %s786_s8 = int_to_ptr.vmem [resolvable:$true] %s785_s8 }
 0x193   : > { %s8036_s11 = sld [smem:[#allocation55_spill]] }
 0x199   : > { %s6697_s15 = scalar_lea.hbm %s8036_s11, 32 }
 0x19a   : > { %p6698_p2 = scmp.ne.s32.totalorder %s8036_s11, %s6697_s15  ;;  %p6704_p4 = scmp.lt.u32.totalorder %s6697_s15, %s8036_s11 }
 0x19c   : > { %p6700_p3 = pnand %p6698_p2, %p7153_p7 }
 0x19e   : > { %p6701_p1 = pneg %p6700_p3 }
 0x1a0   : > { %p6706_p6 = pnand %p6704_p4, %p6701_p1 }
 0x1a2   : > { %6709 = shalt.err (!%p6706_p6)
}
 0x1a3   : > { %s6710_s6 = scalar_lea.vmem %s762_s19, 32  ;;  %p6718_p11 = scmp.lt.s32.totalorder %s762_s19, %s762_s19 }
 0x1a4   : > { %p6711_p8 = scmp.ne.s32.totalorder %s762_s19, %s6710_s6  ;;  %p6719_p12 = scmp.lt.s32.totalorder %s6710_s6, %s6710_s6 }
 0x1a6   : > { %p6713_p9 = pnand %p6711_p8, %p7153_p7  ;;  %p6720_p13 = por %p6719_p12, %p6718_p11 }
 0x1a8   : > { %p6714_p10 = pneg %p6713_p9 }
 0x1aa   : > { %p6721_p0 = pnand %p6720_p13, %p6714_p10 }
 0x1ac   : > { %6724 = shalt.err (!%p6721_p0)
}
 0x1ad   : > { %6014 = dma.hbm_to_vmem [thread:$0]  (!%p7137_p5), %s8036_s11, 32, %s762_s19, [#allocation14]  }
 0x1ae   : > { %s6725_s13 = scalar_lea.hbm %s7954_s12, 16 }
 0x1af   : > { %p6726_p2 = scmp.ne.s32.totalorder %s7954_s12, %s6725_s13  ;;  %p6732_p4 = scmp.lt.u32.totalorder %s6725_s13, %s7954_s12 }
 0x1b1   : > { %p6728_p3 = pnand %p6726_p2, %p7153_p7 }
 0x1b3   : > { %p6729_p1 = pneg %p6728_p3 }
 0x1b5   : > { %p6734_p6 = pnand %p6732_p4, %p6729_p1 }
 0x1b7   : > { %6737 = shalt.err (!%p6734_p6)
}
 0x1b8   : > { %s6738_s28 = scalar_lea.vmem %s786_s8, 16  ;;  %s6745_s19 = scalar_lea.vmem %s786_s8, 32 }
 0x1b9   : > { %p6739_p8 = scmp.ne.s32.totalorder %s786_s8, %s6738_s28  ;;  %p6746_p11 = scmp.lt.s32.totalorder %s786_s8, %s786_s8 }
 0x1ba   : > { %p6747_p12 = scmp.lt.s32.totalorder %s6745_s19, %s6738_s28 }
 0x1bb   : > { %p6741_p9 = pnand %p6739_p8, %p7153_p7 }
 0x1bc   : > { %p6748_p13 = por %p6747_p12, %p6746_p11 }
 0x1bd   : > { %p6742_p10 = pneg %p6741_p9 }
 0x1bf   : > { %p6749_p0 = pnand %p6748_p13, %p6742_p10 }
 0x1c1   : > { %6752 = shalt.err (!%p6749_p0)
}
 0x1c2   : > { %6020 = dma.hbm_to_vmem [thread:$0]  (!%p7137_p5), %s7954_s12, 16, %s786_s8, [#allocation17]  }
 0x1c3   : > { %s6965_s4 = smov [#allocation21]   ;;  %s6966_s24 = smov [#allocation24]  }
 0x1c4   : > { %s807_s23 = sshll.u32 %s6965_s4, 4  ;;  %s829_s13 = sshll.u32 %s6966_s24, 4  ;;  %s808_s23 = int_to_ptr.vmem [resolvable:$true] %s807_s23  ;;  %s830_s13 = int_to_ptr.vmem [resolvable:$true] %s829_s13 }
 0x1c5   : > { %s6753_s5 = scalar_lea.hbm %s7956_s14, 16 }
 0x1c6   : > { %p6754_p2 = scmp.ne.s32.totalorder %s7956_s14, %s6753_s5  ;;  %p6760_p4 = scmp.lt.u32.totalorder %s6753_s5, %s7956_s14 }
 0x1c8   : > { %p6756_p3 = pnand %p6754_p2, %p7153_p7 }
 0x1ca   : > { %p6757_p1 = pneg %p6756_p3 }
 0x1cc   : > { %p6762_p6 = pnand %p6760_p4, %p6757_p1 }
 0x1ce   : > { %6765 = shalt.err (!%p6762_p6)
}
 0x1cf   : > { %s6766_s8 = scalar_lea.vmem %s808_s23, 16  ;;  %s6773_s20 = scalar_lea.vmem %s808_s23, 32 }
 0x1d0   : > { %p6767_p8 = scmp.ne.s32.totalorder %s808_s23, %s6766_s8  ;;  %p6774_p11 = scmp.lt.s32.totalorder %s808_s23, %s808_s23 }
 0x1d1   : > { %p6775_p12 = scmp.lt.s32.totalorder %s6773_s20, %s6766_s8 }
 0x1d2   : > { %p6769_p9 = pnand %p6767_p8, %p7153_p7 }
 0x1d3   : > { %p6776_p13 = por %p6775_p12, %p6774_p11 }
 0x1d4   : > { %p6770_p10 = pneg %p6769_p9 }
 0x1d6   : > { %p6777_p0 = pnand %p6776_p13, %p6770_p10 }
 0x1d8   : > { %6780 = shalt.err (!%p6777_p0)
}
 0x1d9   : > { %6026 = dma.hbm_to_vmem [thread:$0]  (!%p7137_p5), %s7956_s14, 16, %s808_s23, [#allocation20]  }
 0x1da   : > { %s6781_s5 = scalar_lea.hbm %s7958_s16, 16 }
 0x1db   : > { %p6782_p2 = scmp.ne.s32.totalorder %s7958_s16, %s6781_s5  ;;  %p6788_p4 = scmp.lt.u32.totalorder %s6781_s5, %s7958_s16 }
 0x1dd   : > { %p6784_p3 = pnand %p6782_p2, %p7153_p7 }
 0x1df   : > { %p6785_p1 = pneg %p6784_p3 }
 0x1e1   : > { %p6790_p6 = pnand %p6788_p4, %p6785_p1 }
 0x1e3   : > { %6793 = shalt.err (!%p6790_p6)
}
 0x1e4   : > { %s6794_s8 = scalar_lea.vmem %s830_s13, 16  ;;  %s6801_s23 = scalar_lea.vmem %s830_s13, 32 }
 0x1e5   : > { %p6795_p8 = scmp.ne.s32.totalorder %s830_s13, %s6794_s8  ;;  %p6802_p11 = scmp.lt.s32.totalorder %s830_s13, %s830_s13 }
 0x1e6   : > { %p6803_p12 = scmp.lt.s32.totalorder %s6801_s23, %s6794_s8 }
 0x1e7   : > { %p6797_p9 = pnand %p6795_p8, %p7153_p7 }
 0x1e8   : > { %p6804_p13 = por %p6803_p12, %p6802_p11 }
 0x1e9   : > { %p6798_p10 = pneg %p6797_p9 }
 0x1eb   : > { %p6805_p0 = pnand %p6804_p13, %p6798_p10 }
 0x1ed   : > { %6808 = shalt.err (!%p6805_p0)
}
 0x1ee   : > { %6032 = dma.hbm_to_vmem [thread:$0]  (!%p7137_p5), %s7958_s16, 16, %s830_s13, [#allocation23]  }
 0x1ef   : > { %s6967_s24 = smov [#allocation27]   ;;  %s6968_s27 = smov [#allocation30]  }
 0x1f0   : > { %s851_s15 = sshll.u32 %s6967_s24, 4  ;;  %s877_s5 = sshll.u32 %s6968_s27, 4  ;;  %s852_s15 = int_to_ptr.vmem [resolvable:$true] %s851_s15  ;;  %s878_s5 = int_to_ptr.vmem [resolvable:$true] %s877_s5 }
 0x1f1   : > { %s6809_s19 = scalar_lea.hbm %s7960_s18, 16 }
 0x1f2   : > { %p6810_p2 = scmp.ne.s32.totalorder %s7960_s18, %s6809_s19  ;;  %p6816_p4 = scmp.lt.u32.totalorder %s6809_s19, %s7960_s18 }
 0x1f4   : > { %p6812_p3 = pnand %p6810_p2, %p7153_p7 }
 0x1f6   : > { %p6813_p1 = pneg %p6812_p3 }
 0x1f8   : > { %p6818_p6 = pnand %p6816_p4, %p6813_p1 }
 0x1fa   : > { %6821 = shalt.err (!%p6818_p6)
}
 0x1fb   : > { %s6822_s13 = scalar_lea.vmem %s852_s15, 16  ;;  %s6829_s4 = scalar_lea.vmem %s852_s15, 32 }
 0x1fc   : > { %p6823_p8 = scmp.ne.s32.totalorder %s852_s15, %s6822_s13  ;;  %p6830_p11 = scmp.lt.s32.totalorder %s852_s15, %s852_s15 }
 0x1fd   : > { %p6831_p12 = scmp.lt.s32.totalorder %s6829_s4, %s6822_s13 }
 0x1fe   : > { %p6825_p9 = pnand %p6823_p8, %p7153_p7 }
 0x1ff   : > { %p6832_p13 = por %p6831_p12, %p6830_p11 }
 0x200   : > { %p6826_p10 = pneg %p6825_p9 }
 0x202   : > { %p6833_p0 = pnand %p6832_p13, %p6826_p10 }
 0x204   : > { %6836 = shalt.err (!%p6833_p0)
}
 0x205   : > { %6038 = dma.hbm_to_vmem [thread:$0]  (!%p7137_p5), %s7960_s18, 16, %s852_s15, [#allocation26]  }
 0x206   : > { %s6837_s19 = scalar_lea.hbm %s7963_s21, 16384 }
 0x207   : > { %p6838_p2 = scmp.ne.s32.totalorder %s7963_s21, %s6837_s19  ;;  %p6844_p4 = scmp.lt.u32.totalorder %s6837_s19, %s7963_s21 }
 0x209   : > { %p6840_p3 = pnand %p6838_p2, %p7153_p7 }
 0x20b   : > { %p6841_p1 = pneg %p6840_p3 }
 0x20d   : > { %p6846_p6 = pnand %p6844_p4, %p6841_p1 }
 0x20f   : > { %6849 = shalt.err (!%p6846_p6)
}
 0x210   : > { %s6850_s13 = scalar_lea.vmem %s878_s5, 16384  ;;  %p6858_p11 = scmp.lt.s32.totalorder %s878_s5, %s878_s5 }
 0x211   : > { %p6851_p8 = scmp.ne.s32.totalorder %s878_s5, %s6850_s13  ;;  %p6859_p12 = scmp.lt.s32.totalorder %s6850_s13, %s6850_s13 }
 0x213   : > { %p6853_p9 = pnand %p6851_p8, %p7153_p7  ;;  %p6860_p13 = por %p6859_p12, %p6858_p11 }
 0x215   : > { %p6854_p10 = pneg %p6853_p9 }
 0x217   : > { %p6861_p0 = pnand %p6860_p13, %p6854_p10 }
 0x219   : > { %6864 = shalt.err (!%p6861_p0)
}
 0x21a   : > { %6044 = dma.hbm_to_vmem [thread:$0]  (!%p7137_p5), %s7963_s21, 16384, %s878_s5, [#allocation29], %s8030_s7, %s8030_s7, %s8034_s17  }
 0x21b   : > { %s6969_s24 = smov [#allocation31]   ;;  %s6865_s19 = scalar_lea.hbm %s7964_s22, 16 }
 0x21c   : > { %s891_s27 = sshll.u32 %s6969_s24, 4  ;;  %p6866_p2 = scmp.ne.s32.totalorder %s7964_s22, %s6865_s19  ;;  %s892_s27 = int_to_ptr.vmem [resolvable:$true] %s891_s27 }
 0x21d   : > { %p6872_p4 = scmp.lt.u32.totalorder %s6865_s19, %s7964_s22 }
 0x21e   : > { %p6868_p3 = pnand %p6866_p2, %p7153_p7 }
 0x220   : > { %p6869_p1 = pneg %p6868_p3 }
 0x222   : > { %p6874_p6 = pnand %p6872_p4, %p6869_p1 }
 0x224   : > { %6877 = shalt.err (!%p6874_p6)
}
 0x225   : > { %s6878_s7 = scalar_lea.vmem %s892_s27, 16  ;;  %s6885_s17 = scalar_lea.vmem %s892_s27, 32 }
 0x226   : > { %p6879_p8 = scmp.ne.s32.totalorder %s892_s27, %s6878_s7  ;;  %p6886_p11 = scmp.lt.s32.totalorder %s892_s27, %s892_s27 }
 0x227   : > { %p6887_p12 = scmp.lt.s32.totalorder %s6885_s17, %s6878_s7 }
 0x228   : > { %p6881_p9 = pnand %p6879_p8, %p7153_p7 }
 0x229   : > { %p6888_p13 = por %p6887_p12, %p6886_p11 }
 0x22a   : > { %p6882_p10 = pneg %p6881_p9 }
 0x22c   : > { %p6889_p0 = pnand %p6888_p13, %p6882_p10 }
 0x22e   : > { %6892 = shalt.err (!%p6889_p0)
}
 0x22f   : > { %6047 = dma.hbm_to_vmem [thread:$0]  (!%p7137_p5), %s7964_s22, 16, %s892_s27, [#allocation32]  }
 0x230   : > { %p8037_p2 = scmp.ne.s32.totalorder %s8017_s9, 0 }
 0x231   : > { %p8038_p3 = scmp.eq.s32.totalorder (!%p8037_p2), %s7120_s30, 0 }
 0x232   : > { %925 = sbr.rel (%p8037_p2) target bundleno = 3527 (0xdc7), region = 128 }
 0x239   : > { %6898 = dma.done.wait (%p8038_p3), [#allocation3], 32   ;;  %p8039_p7 = pmov %p8038_p3 }
 0x23a   : > { %p8040_p1 = pmov %p8038_p3 }
 0x23b   : > { %6900 = vsyncadd (%p8039_p7), [#allocation3], 4294967264 }
 0x23c   : > { %6902 = dma.done.wait (%p8040_p1), [#allocation5], 1040   ;;  %p8041_p4 = pmov %p8040_p1 }
 0x23d   : > { %p8042_p6 = pmov %p8040_p1 }
 0x23e   : > { %6904 = vsyncadd (%p8041_p4), [#allocation5], 4294966256 }
 0x23f   : > { %6906 = dma.done.wait (%p8042_p6), [#allocation8], 1040   ;;  %p8043_p5 = pmov %p8040_p1 }
 0x240   : > { %p8044_p8 = pmov %p8040_p1 }
 0x241   : > { %6908 = vsyncadd (%p8043_p5), [#allocation8], 4294966256 }
 0x242   : > { %6910 = dma.done.wait (%p8044_p8), [#allocation11], 1040   ;;  %p8045_p9 = pmov %p8040_p1 }
 0x243   : > { %p8046_p10 = pmov %p8040_p1 }
 0x244   : > { %6912 = vsyncadd (%p8045_p9), [#allocation11], 4294966256 }
 0x245   : > { %6914 = dma.done.wait (%p8046_p10), [#allocation14], 48   ;;  %p8047_p11 = pmov %p8040_p1 }
 0x246   : > { %p8048_p12 = pmov %p8040_p1 }
 0x247   : > { %6916 = vsyncadd (%p8047_p11), [#allocation14], 4294967248 }
 0x248   : > { %6918 = dma.done.wait (%p8048_p12), [#allocation17], 1040   ;;  %p8049_p13 = pmov %p8040_p1 }
 0x249   : > { %p8050_p0 = pmov %p8040_p1 }
 0x24a   : > { %6920 = vsyncadd (%p8049_p13), [#allocation17], 4294966256 }
 0x24b   : > { %6922 = dma.done.wait (%p8050_p0), [#allocation20], 32   ;;  %p8051_p2 = pmov %p8050_p0 }
 0x24c   : > { %p8052_p3 = pmov %p8050_p0 }
 0x24d   : > { %6924 = vsyncadd (%p8051_p2), [#allocation20], 4294967264 }
 0x24e   : > { %6926 = dma.done.wait (%p8052_p3), [#allocation23], 32   ;;  %p8053_p7 = pmov %p8050_p0 }
 0x24f   : > { %p8054_p1 = pmov %p8050_p0 }
 0x250   : > { %6928 = vsyncadd (%p8053_p7), [#allocation23], 4294967264 }
 0x251   : > { %6930 = dma.done.wait (%p8054_p1), [#allocation26], 32   ;;  %p8055_p4 = pmov %p8050_p0 }
 0x252   : > { %p8056_p6 = pmov %p8050_p0 }
 0x253   : > { %6932 = vsyncadd (%p8055_p4), [#allocation26], 4294967264 }
 0x254   : > { %6934 = dma.done.wait (%p8056_p6), [#allocation29], 32768   ;;  %p8057_p5 = pmov %p8050_p0 }
 0x255   : > { %p8058_p8 = pmov %p8050_p0 }
 0x256   : > { %6936 = vsyncadd (%p8057_p5), [#allocation29], 4294934528 }
 0x257   : > { %6938 = dma.done.wait (%p8058_p8), [#allocation32], 16   ;;  %p8059_p9 = pmov %p8050_p0 }
 0x258   : > { %v6970_v0 = vmov 0.0   ;;  %vm6971_vm0 = vmmov 0   ;;  %v6125_v1 = vld [vmem:[#allocation9] sm:$0xff]   ;;  %v6126_v2 = vld [vmem:[#allocation9 + $0x8] sm:$0xff]   ;;  %v6127_v3 = vld [vmem:[#allocation9 + $0x10] sm:$0xff]   ;;  %vm1350_vm1 = vcmask 1041408  }
 0x259   : > { %6940 = vsyncadd (%p8059_p9), [#allocation32], 4294967280  ;;  %5678 = vmatprep.subr.bf16.mxu0 %v6970_v0  ;;  %5694 = vmatprep.mubr.msk.bf16.mxu0 %vm6971_vm0, %v6970_v0  ;;  %v6128_v4 = vld [vmem:[#allocation9 + $0x18] sm:$0xff]   ;;  %v6129_v5 = vld [vmem:[#allocation9 + $0x20] sm:$0xff]   ;;  %s5096_s9 = sshll.u32 %s7120_s30, 3  ;;  %s8060_s4 = sld [smem:[#allocation45_spill]] }
 0x25a   : > { %5698 = vmatprep.subr.bf16.mxu1 %v6970_v0  ;;  %5714 = vmatprep.mubr.msk.bf16.mxu1 %vm6971_vm0, %v6970_v0  ;;  %v6130_v6 = vld [vmem:[#allocation9 + $0x28] sm:$0xff]   ;;  %v6131_v7 = vld [vmem:[#allocation9 + $0x30] sm:$0xff]   ;;  %v6132_v8 = vld [vmem:[#allocation9 + $0x38] sm:$0xff]   ;;  %p1073_p10 = scmp.lt.s32.totalorder %s5096_s9, 15  ;;  %vm1337_vm2 = vcmask 31744   ;;  %vm1194_vm3 = vcmask 1040384  }
 0x25b   : > { %5679 = vmatpush3.bf16.msra.mxu0 %v6125_v1  ;;  %v1083_v9 = vld [vmem:[#allocation7] sm:$0x1]  ;;  %v1329_v11 = vld [vmem:[#allocation2] sm:$0x3]  ;;  %v1190_v26 = vld [vmem:[#allocation10] sm:$0x1] }
 0x25c   : > { %5680 = vmatprep.subr.bf16.mxu0 %v6970_v0  ;;  %v1084_v10 = vpack.c.bf16 %v1083_v9, %v1083_v9  ;;  %v1352_v12 = vsel %vm1350_vm1, %v1329_v11, 0  ;;  %s8068_s9 = smov (!%p1073_p10, %s5096_s9), 15  ;;  %v6133_v33 = vld [vmem:[#allocation12] sm:$0xff]   ;;  %v6134_v34 = vld [vmem:[#allocation12 + $0x8] sm:$0xff]   ;;  %v6135_v35 = vld [vmem:[#allocation12 + $0x10] sm:$0xff]   ;;  %s8061_s28 = sld [smem:[#allocation54_spill]] }
 0x25d   : > { %s5097_s29 = sshll.u32 %s8068_s9, 3  ;;  %5699 = vmatpush3.bf16.msra.mxu1 %v6133_v33  ;;  %v6136_v41 = vld [vmem:[#allocation12 + $0x18] sm:$0xff]   ;;  %v6137_v42 = vld [vmem:[#allocation12 + $0x20] sm:$0xff]   ;;  %v6138_v43 = vld [vmem:[#allocation12 + $0x28] sm:$0xff]   ;;  %vm1799_vm4 = vcmask 523264   ;;  %s8062_s27 = sld [smem:[#allocation61_spill]] }
 0x25e   : > { %5700 = vmatprep.subr.bf16.mxu1 %v6970_v0  ;;  %v6139_v44 = vld [vmem:[#allocation12 + $0x30] sm:$0xff]   ;;  %v6140_v45 = vld [vmem:[#allocation12 + $0x38] sm:$0xff]   ;;  %v1420_v58 = vld [vmem:[#allocation6 + $0x8] sm:$0xff]  ;;  %s8063_s23 = sld [smem:[#allocation62_spill]]  ;;  %p1078_p11 = scmp.lt.s32.totalorder %s7120_s30, 1  ;;  %vm4803_vm5 = vcmask 15360  }
 0x25f   : > { %5681 = vmatpush3.bf16.msra.mxu0 %v6126_v2  ;;  %s1076_s24 = scalar_lea.vmem %s8060_s4, %s5097_s29  ;;  %v5115_v48 = vld [vmem:[#allocation4] ss:$0 sm:$0xff]  ;;  %v1419_v52 = vld [vmem:[#allocation6] sm:$0xff]  ;;  %v1421_v54 = vld [vmem:[#allocation6 + $0x10] sm:$0xff]  ;;  %s8064_s17 = sld [smem:[#allocation63_spill]] }
 0x260   : > { %5682 = vmatprep.subr.bf16.mxu0 %v6970_v0  ;;  %v1317_v13 = vld [vmem:[%s1076_s24] sm:$0xff]  ;;  %v1318_v14 = vld [vmem:[%s1076_s24 + $0x8] sm:$0xff]  ;;  %v1319_v15 = vld [vmem:[%s1076_s24 + $0x10] sm:$0xff]  ;;  %s8070_s30 = smov (!%p1078_p11, %s7120_s30), 1  ;;  %s8065_s9 = sld [smem:[#allocation64_spill]] }
 0x261   : > { %v1325_v16 = vpack.c.bf16 %v1318_v14, %v1317_v13  ;;  %v1320_v17 = vld [vmem:[%s1076_s24 + $0x18] sm:$0xff]  ;;  %v1321_v18 = vld [vmem:[%s1076_s24 + $0x20] sm:$0xff]  ;;  %v1322_v19 = vld [vmem:[%s1076_s24 + $0x28] sm:$0xff]  ;;  %5701 = vmatpush3.bf16.msra.mxu1 %v6134_v34  ;;  %v6972_v34 = vmov 0   ;;  %s5098_s8 = sshll.u32 %s8070_s30, 3 }
 0x262   : > { %v1326_v20 = vpack.c.bf16 %v1320_v17, %v1319_v15  ;;  %v1327_v21 = vpack.c.bf16 %v1322_v19, %v1321_v18  ;;  %v1323_v22 = vld [vmem:[%s1076_s24 + $0x30] sm:$0xff]  ;;  %v1324_v23 = vld [vmem:[%s1076_s24 + $0x38] sm:$0xff]  ;;  %5702 = vmatprep.subr.bf16.mxu1 %v6970_v0  ;;  %v6143_v46 = vld [vmem:[%s8061_s28 + $0x4] ss:$8 sps:$4 sm:$0xff]  }
 0x263   : > { %5683 = vmatpush3.bf16.msra.mxu0 %v6127_v3  ;;  %v1328_v24 = vpack.c.bf16 %v1324_v23, %v1323_v22  ;;  %v1422_v56 = vld [vmem:[#allocation6 + $0x18] sm:$0xff]  ;;  %v6144_v33 = vld [vmem:[%s8061_s28 + $0x10] ss:$8 sps:$4 sm:$0xff]  }
 0x264   : > { %5684 = vmatprep.subr.bf16.mxu0 %v6970_v0  ;;  %v1426_v13 = vld [vmem:[#allocation6 + $0x38] sm:$0xff] }
 0x265   : > { %5703 = vmatpush3.bf16.msra.mxu1 %v6135_v35  ;;  %v6149_v35 = vld [vmem:[%s8061_s28 + $0x24] ss:$8 sps:$4 sm:$0xff]  }
 0x266   : > { %5704 = vmatprep.subr.bf16.mxu1 %v6970_v0  ;;  %s1081_s29 = scalar_lea.vmem %s8065_s9, %s5098_s8 }
 0x267   : > { %5685 = vmatpush3.bf16.msra.mxu0 %v6128_v4 }
 0x268   : > { %5686 = vmatprep.subr.bf16.mxu0 %v6970_v0 }
 0x269   : > { %5705 = vmatpush3.bf16.msra.mxu1 %v6136_v41  ;;  %v6158_v41 = vld [vmem:[%s8061_s28 + $0x54] ss:$8 sps:$4 sm:$0xff]  }
 0x26a   : > { %5706 = vmatprep.subr.bf16.mxu1 %v6970_v0 }
 0x26b   : > { %5687 = vmatpush3.bf16.msra.mxu0 %v6129_v5 }
 0x26c   : > { %5688 = vmatprep.subr.bf16.mxu0 %v6970_v0 }
 0x26d   : > { %5707 = vmatpush3.bf16.msra.mxu1 %v6137_v42  ;;  %v6156_v42 = vld [vmem:[%s8061_s28 + $0x50] ss:$8 sps:$4 sm:$0xff]  }
 0x26e   : > { %5708 = vmatprep.subr.bf16.mxu1 %v6970_v0 }
 0x26f   : > { %5689 = vmatpush3.bf16.msra.mxu0 %v6130_v6  ;;  %v1423_v6 = vld [vmem:[#allocation6 + $0x20] sm:$0xff] }
 0x270   : > { %5690 = vmatprep.subr.bf16.mxu0 %v6970_v0 }
 0x271   : > { %5709 = vmatpush3.bf16.msra.mxu1 %v6138_v43  ;;  %v6161_v43 = vld [vmem:[%s8061_s28 + $0x64] ss:$8 sps:$4 sm:$0xff]  }
 0x272   : > { %5710 = vmatprep.subr.bf16.mxu1 %v6970_v0 }
 0x273   : > { %5691 = vmatpush3.bf16.msra.mxu0 %v6131_v7 }
 0x274   : > { %5692 = vmatprep.subr.bf16.mxu0 %v6970_v0 }
 0x275   : > { %5711 = vmatpush3.bf16.msra.mxu1 %v6139_v44  ;;  %v6159_v44 = vld [vmem:[%s8061_s28 + $0x60] ss:$8 sps:$4 sm:$0xff]  }
 0x276   : > { %5712 = vmatprep.subr.bf16.mxu1 %v6970_v0 }
 0x277   : > { %5693 = vmatpush3.bf16.msra.mxu0 %v6132_v8 }
 0x278   : > { %5906 = vmatprep.subr.msk.bf16.mxu0 %vm1350_vm1, %v1329_v11  ;;  %v1424_v11 = vld [vmem:[#allocation6 + $0x28] sm:$0xff] }
 0x279   : > { %5713 = vmatpush3.bf16.msra.mxu1 %v6140_v45  ;;  %v6164_v45 = vld [vmem:[%s8061_s28 + $0x74] ss:$8 sps:$4 sm:$0xff]  }
 0x27a   : > { %5695 = vmatmul.mubr.bf16.vlgmr.msra.gmra.mrb[0].mxu0 %v1084_v10  ;;  %1547 = vmatprep.subr.bf16.mxu1 %v6143_v46  ;;  %v6162_v46 = vld [vmem:[%s8061_s28 + $0x70] ss:$8 sps:$4 sm:$0xff]  }
 0x27b   : > { %5719 = vmatpush3.bf16.msra.mxu0 %v1352_v12  ;;  %5720 = vmatprep.mubr.msk.bf16.mxu0 %vm1337_vm2, %v1325_v16  ;;  %v1425_v12 = vld [vmem:[#allocation6 + $0x30] sm:$0xff] }
 0x282   : > { %5721 = vmatmul.mubr.msk.bf16.vlgmr.msra.gmra.mrb[4].mxu0 %vm1337_vm2, %v1326_v20 }
 0x283   : > { %5724 = vmatprep.mubr.msk.bf16.mxu0 %vm1337_vm2, %v1327_v21 }
 0x28a   : > { %5725 = vmatmul.mubr.msk.bf16.gmra.mrb[8].mxu0 %vm1337_vm2, %v1328_v24 }
 0x34d   : > { %v1183_v25 = vpop.f32.mrb[0].mxu0 }
 0x34e   : > { %v1189_v27 = vadd.f32 %v1183_v25, %v1083_v9  ;;  %v5696_v28 = vpop.f32.mrb[1].mxu0  ;;  %v1192_v25 = vld [vmem:[#allocation19] sm:$0x1] }
 0x34f   : > { %v1186_v29 = vpop.f32.mrb[2].mxu0 }
 0x350   : > { %v5697_v30 = vpop.f32.mrb[3].mxu0  ;;  %v1191_v31 = vadd.f32 %v1190_v26, %v1189_v27  ;;  %v1193_v27 = vld [vmem:[#allocation21] sm:$0x1] }
 0x351   : > { %v6141_v30 = vld [vmem:[%s8061_s28] ss:$8 sps:$4 sm:$0xff]  }
 0x352   : > { %v1195_v32 = vsel %vm1194_vm3, %v1191_v31, 0.0 }
 0x353   : > { %1196 = vadd.xlane.f32.xlu0 %v1195_v32  ;;  %v6146_v32 = vld [vmem:[%s8061_s28 + $0x14] ss:$8 sps:$4 sm:$0xff]  }
 0x355   : > { %v5722_v47 = vpop.f32.mrb[4].mxu0 }
 0x356   : > { %v1388_v49 = vpop.f32.mrb[5].mxu0  ;;  %v1397_v50 = vadd.f32 %v5722_v47, %v5115_v48  ;;  %v1632_v47 = vld [vmem:[%s7967_s25] sm:$0xff] }
 0x357   : > { %v1389_v51 = vadd.f32 %v5115_v48, %v1388_v49  ;;  %v5723_v53 = vpop.f32.mrb[6].mxu0  ;;  %v1634_v49 = vld [vmem:[%s7967_s25 + $0x10] sm:$0xff] }
 0x358   : > { %v1400_v55 = vadd.f32 %v5723_v53, %v5115_v48  ;;  %v1391_v57 = vpop.f32.mrb[7].mxu0  ;;  %v7629_v61 = vadd.f32 %v1421_v54, %v1397_v50  ;;  %v1636_v53 = vld [vmem:[%s7967_s25 + $0x20] sm:$0xff]  ;;  %v1637_v54 = vld [vmem:[%s7967_s25 + $0x28] sm:$0xff] }
 0x359   : > { %v7627_v59 = vadd.f32 %v1419_v52, %v1389_v51  ;;  %v1392_v60 = vadd.f32 %v5115_v48, %v1391_v57  ;;  %v1635_v51 = vld [vmem:[%s7967_s25 + $0x18] sm:$0xff] }
 0x35a   : > { %v7631_v62 = vadd.f32 %v1422_v56, %v1400_v55  ;;  %v5854_v52 = vpack.c.bf16 %v1635_v51, %v1634_v49  ;;  %v5858_v55 = vpack.c.bf16 %v1637_v54, %v1636_v53  ;;  %v1638_v56 = vld [vmem:[%s7967_s25 + $0x30] sm:$0xff]  ;;  %v1639_v57 = vld [vmem:[%s7967_s25 + $0x38] sm:$0xff] }
 0x35b   : > { %v7633_v63 = vadd.f32 %v1420_v58, %v1392_v60  ;;  %v5862_v58 = vpack.c.bf16 %v1639_v57, %v1638_v56  ;;  %v1641_v60 = vld [vmem:[%s7967_s25 + $0x48] sm:$0xff] }
 0x35c   : > { %v1436_v2 = vpack.c.bf16 %v7631_v62, %v7629_v61  ;;  %v1642_v62 = vld [vmem:[%s7967_s25 + $0x50] sm:$0xff] }
 0x35d   : > { %v1435_v1 = vpack.c.bf16 %v7633_v63, %v7627_v59  ;;  %v5726_v3 = vpop.f32.mrb[8].mxu0  ;;  %v1640_v59 = vld [vmem:[%s7967_s25 + $0x40] sm:$0xff]  ;;  %v1643_v63 = vld [vmem:[%s7967_s25 + $0x58] sm:$0xff] }
 0x35e   : > { %v1404_v4 = vpop.f32.mrb[9].mxu0  ;;  %v1413_v8 = vadd.f32 %v5726_v3, %v5115_v48  ;;  %v5866_v61 = vpack.c.bf16 %v1641_v60, %v1640_v59  ;;  %v1645_v3 = vld [vmem:[%s7967_s25 + $0x68] sm:$0xff] }
 0x35f   : > { %v1405_v5 = vadd.f32 %v5115_v48, %v1404_v4  ;;  %v5727_v7 = vpop.f32.mrb[10].mxu0 }
 0x360   : > { %v1416_v9 = vadd.f32 %v5727_v7, %v5115_v48  ;;  %v1407_v10 = vpop.f32.mrb[11].mxu0  ;;  %v1433_v17 = vadd.f32 %v1425_v12, %v1413_v8  ;;  %v1457_v12 = vlaneseq }
 0x361   : > { %v1408_v14 = vadd.f32 %v5115_v48, %v1407_v10  ;;  %v1431_v15 = vadd.f32 %v1423_v6, %v1405_v5  ;;  %v1633_v48 = vld [vmem:[%s7967_s25 + $0x8] sm:$0xff]  ;;  %v1646_v5 = vld [vmem:[%s7967_s25 + $0x70] sm:$0xff]  ;;  %v1647_v6 = vld [vmem:[%s7967_s25 + $0x78] sm:$0xff] }
 0x362   : > { %v1434_v18 = vadd.f32 %v1426_v13, %v1416_v9  ;;  %v5850_v50 = vpack.c.bf16 %v1633_v48, %v1632_v47  ;;  %v5878_v7 = vpack.c.bf16 %v1647_v6, %v1646_v5  ;;  %v7749_v13 = vshrl.u32 %v1457_v12, 7 }
 0x363   : > { %v1432_v16 = vadd.f32 %v1424_v11, %v1408_v14  ;;  %v1228_v14 = vld [vmem:[#allocation13] sm:$0x1] }
 0x364   : > { %v1438_v20 = vpack.c.bf16 %v1434_v18, %v1433_v17  ;;  %5851 = vmatprep.subr.bf16.mxu0 %v5850_v50  ;;  %v7755_v17 = vsub.s32 0, %v7749_v13 }
 0x365   : > { %v1437_v19 = vpack.c.bf16 %v1432_v16, %v1431_v15  ;;  %5853 = vmatpush3.bf16.msra.mxu0 %v5850_v50  ;;  %v1455_v15 = vld [vmem:[#allocation15] sm:$0x3]  ;;  %v7752_v16 = vsub.s32 1, %v7749_v13 }
 0x366   : > { %5855 = vmatprep.subr.bf16.mxu0 %v5854_v52 }
 0x369   : > { %5857 = vmatpush3.bf16.msra.mxu0 %v5854_v52 }
 0x36a   : > { %5859 = vmatprep.subr.bf16.mxu0 %v5858_v55 }
 0x36d   : > { %5861 = vmatpush3.bf16.msra.mxu0 %v5858_v55 }
 0x36e   : > { %5863 = vmatprep.subr.bf16.mxu0 %v5862_v58 }
 0x371   : > { %5865 = vmatpush3.bf16.msra.mxu0 %v5862_v58 }
 0x372   : > { %5867 = vmatprep.subr.bf16.mxu0 %v5866_v61 }
 0x375   : > { %5869 = vmatpush3.bf16.msra.mxu0 %v5866_v61 }
 0x3e0   : > { %v1197_v36 = vpop.xlane.xlu0 %1196 }
 0x3e1   : > { %v1199_v37 = vmul.f32 0.0078125, %v1197_v36  ;;  %v6147_v36 = vld [vmem:[%s8061_s28 + $0x20] ss:$8 sps:$4 sm:$0xff]  }
 0x3e3   : > { %v7615_v38 = vsub.f32 %v1191_v31, %v1199_v37  ;;  %v6152_v37 = vld [vmem:[%s8061_s28 + $0x34] ss:$8 sps:$4 sm:$0xff]  }
 0x3e5   : > { %v1201_v39 = vmul.f32 %v7615_v38, %v7615_v38 }
 0x3e7   : > { %v1202_v40 = vsel %vm1194_vm3, %v1201_v39, 0.0  ;;  %v6155_v39 = vld [vmem:[%s8061_s28 + $0x44] ss:$8 sps:$4 sm:$0xff]  }
 0x3e8   : > { %1203 = vadd.xlane.f32.xlu0 %v1202_v40  ;;  %v6153_v40 = vld [vmem:[%s8061_s28 + $0x40] ss:$8 sps:$4 sm:$0xff]  }
 0x475   : > { %v1204_v21 = vpop.xlane.xlu0 %1203 }
 0x476   : > { %v1205_v22 = vmul.f32 0.0078125, %v1204_v21 }
 0x478   : > { %v1206_v23 = vadd.f32 1e-05, %v1205_v22 }
 0x47a   : > { %6309 = vrsqrt.f32 %v1206_v23 }
 0x484   : > { %v6310_v24 = vpop.eup %6309 }
 0x485   : > { %v1208_v26 = vmul.f32 %v6310_v24, %v7615_v38  ;;  %v6150_v38 = vld [vmem:[%s8061_s28 + $0x30] ss:$8 sps:$4 sm:$0xff]  }
 0x487   : > { %v1209_v28 = vmul.f32 %v1208_v26, %v1192_v25 }
 0x489   : > { %v7640_v29 = vadd.f32 %v1209_v28, %v1193_v27 }
 0x48b   : > { %v1211_v31 = vpack.c.bf16 %v7640_v29, %v7640_v29 }
 0x48d   : > { %5715 = vmatmul.mubr.bf16.vlgmr.msra.gmra.mrb[0].mxu1 %v1211_v31 }
 0x48e   : > { %1548 = vmatpush1.bf16.msra.mxu1 %v6141_v30  ;;  %1579 = vmatprep.mubr.bf16.mxu1 %v6972_v34 }
 0x48f   : > { %1549 = vmatprep.subr.bf16.mxu1 %v6146_v32 }
 0x492   : > { %1550 = vmatpush1.bf16.msra.mxu1 %v6144_v33 }
 0x493   : > { %1551 = vmatprep.subr.bf16.mxu1 %v6149_v35 }
 0x496   : > { %1552 = vmatpush1.bf16.msra.mxu1 %v6147_v36 }
 0x497   : > { %1553 = vmatprep.subr.bf16.mxu1 %v6152_v37 }
 0x49a   : > { %1554 = vmatpush1.bf16.msra.mxu1 %v6150_v38 }
 0x49b   : > { %1555 = vmatprep.subr.bf16.mxu1 %v6155_v39 }
 0x49e   : > { %1556 = vmatpush1.bf16.msra.mxu1 %v6153_v40 }
 0x49f   : > { %1557 = vmatprep.subr.bf16.mxu1 %v6158_v41 }
 0x4a2   : > { %1558 = vmatpush1.bf16.msra.mxu1 %v6156_v42 }
 0x4a3   : > { %1559 = vmatprep.subr.bf16.mxu1 %v6161_v43 }
 0x4a6   : > { %1560 = vmatpush1.bf16.msra.mxu1 %v6159_v44 }
 0x4a7   : > { %1561 = vmatprep.subr.bf16.mxu1 %v6164_v45 }
 0x4aa   : > { %1562 = vmatpush1.bf16.msra.mxu1 %v6162_v46 }
 0x4ad   : > { %1580 = vmatmul.mubr.bf16.vlgmr.msra.gmra.mrb[4].mxu1 %v1435_v1  ;;  %v5870_v1 = vpack.c.bf16 %v1643_v63, %v1642_v62 }
 0x4ae   : > { %1589 = vmatprep.mubr.bf16.mxu1 %v6972_v34 }
 0x4af   : > { %5871 = vmatprep.subr.bf16.mxu0 %v5870_v1 }
 0x4b0   : > { %5873 = vmatpush3.bf16.msra.mxu0 %v5870_v1  ;;  %v6973_v1 = vmov 0.0|0.0  }
 0x4b1   : > { %5894 = vmatprep.subr.bf16.mxu1 %v6973_v1 }
 0x4b5   : > { %1590 = vmatmul.mubr.bf16.gmra.mrb[8].mxu1 %v1436_v2  ;;  %v1644_v2 = vld [vmem:[%s7967_s25 + $0x60] sm:$0xff] }
 0x4b6   : > { %1599 = vmatprep.mubr.bf16.mxu1 %v6972_v34  ;;  %v5874_v4 = vpack.c.bf16 %v1645_v3, %v1644_v2 }
 0x4b8   : > { %5875 = vmatprep.subr.bf16.mxu0 %v5874_v4 }
 0x4b9   : > { %5877 = vmatpush3.bf16.msra.mxu0 %v5874_v4 }
 0x4ba   : > { %5879 = vmatprep.subr.bf16.mxu0 %v5878_v7 }
 0x4bd   : > { %1600 = vmatmul.mubr.bf16.gmra.mrb[12].mxu1 %v1437_v19  ;;  %5881 = vmatpush3.bf16.msra.mxu0 %v5878_v7  ;;  %v1460_v19 = vrot.slane %v1455_v15, %v7755_v17 }
 0x4be   : > { %1609 = vmatprep.mubr.bf16.mxu1 %v6972_v34  ;;  %5882 = vmatprep.subr.bf16.mxu0 %v6973_v1 }
 0x4c5   : > { %1610 = vmatmul.mubr.bf16.gmra.mrb[16].mxu1 %v1438_v20  ;;  %v1464_v20 = vrot.slane %v1455_v15, %v7752_v16 }
 0x4c6   : > { %5807 = vmatprep.mubr.msk.f32.mxu1 %vm6971_vm0, %v6970_v0 }
 0x560   : > { %v1311_v8 = vpop.f32.mrb[0].mxu1 }
 0x561   : > { %v5716_v9 = vpop.f32.mrb[1].mxu1  ;;  %v1312_v18 = vadd.f32 %v1311_v8, %v1228_v14 }
 0x562   : > { %v1314_v10 = vpop.f32.mrb[2].mxu1 }
 0x563   : > { %v5717_v11 = vpop.f32.mrb[3].mxu1  ;;  %v1623_v22 = vrot.slane %v1312_v18, %v7755_v17 }
 0x580   : > { %v1581_v21 = vpop.f32.mrb[4].mxu1 }
 0x581   : > { %v1582_v23 = vadd.f32 %v1581_v21, %v1460_v19  ;;  %v1583_v24 = vpop.f32.mrb[5].mxu1 }
 0x582   : > { %v7760_v25 = vadd.f32 %v1583_v24, %v1464_v20  ;;  %v1585_v26 = vpop.f32.mrb[6].mxu1 }
 0x583   : > { %v1624_v27 = vmul.f32 %v1623_v22, %v1582_v23  ;;  %v1586_v28 = vadd.f32 %v1585_v26, %v1460_v19  ;;  %v1587_v30 = vpop.f32.mrb[7].mxu1 }
 0x584   : > { %v7762_v31 = vadd.f32 %v1587_v30, %v1464_v20 }
 0x585   : > { %v1625_v32 = vmul.f32 %v1623_v22, %v1586_v28  ;;  %5760 = vmatprep.mubr.f32.mxu0 %v1624_v27 }
 0x587   : > { %5761 = vmatmul.mubr.f32.vlgmr.msra.gmra.mrb[12].mxu0 %v1625_v32 }
 0x588   : > { %v1591_v33 = vpop.f32.mrb[8].mxu1 }
 0x589   : > { %v1592_v35 = vadd.f32 %v1591_v33, %v1460_v19  ;;  %v1593_v36 = vpop.f32.mrb[9].mxu1 }
 0x58a   : > { %v7764_v37 = vadd.f32 %v1593_v36, %v1464_v20  ;;  %v1595_v38 = vpop.f32.mrb[10].mxu1 }
 0x58b   : > { %v1626_v39 = vmul.f32 %v1623_v22, %v1592_v35  ;;  %v1596_v40 = vadd.f32 %v1595_v38, %v1460_v19  ;;  %v1597_v41 = vpop.f32.mrb[11].mxu1 }
 0x58c   : > { %v7766_v42 = vadd.f32 %v1597_v41, %v1464_v20 }
 0x58d   : > { %v1627_v43 = vmul.f32 %v1623_v22, %v1596_v40  ;;  %5763 = vmatprep.mubr.f32.mxu0 %v1626_v39 }
 0x58f   : > { %5764 = vmatmul.mubr.f32.gmra.mrb[14].mxu0 %v1627_v43 }
 0x590   : > { %v1601_v44 = vpop.f32.mrb[12].mxu1 }
 0x591   : > { %v1602_v45 = vadd.f32 %v1601_v44, %v1460_v19  ;;  %v1603_v46 = vpop.f32.mrb[13].mxu1 }
 0x592   : > { %v7768_v47 = vadd.f32 %v1603_v46, %v1464_v20  ;;  %v1605_v48 = vpop.f32.mrb[14].mxu1 }
 0x593   : > { %v1628_v49 = vmul.f32 %v1623_v22, %v1602_v45  ;;  %v1606_v50 = vadd.f32 %v1605_v48, %v1460_v19  ;;  %v1607_v51 = vpop.f32.mrb[15].mxu1 }
 0x594   : > { %v7770_v52 = vadd.f32 %v1607_v51, %v1464_v20 }
 0x595   : > { %v1629_v53 = vmul.f32 %v1623_v22, %v1606_v50  ;;  %5766 = vmatprep.mubr.f32.mxu0 %v1628_v49 }
 0x597   : > { %5767 = vmatmul.mubr.f32.gmra.mrb[16].mxu0 %v1629_v53 }
 0x598   : > { %v1611_v54 = vpop.f32.mrb[16].mxu1 }
 0x599   : > { %v1612_v55 = vadd.f32 %v1611_v54, %v1460_v19  ;;  %v1613_v56 = vpop.f32.mrb[17].mxu1 }
 0x59a   : > { %v7772_v57 = vadd.f32 %v1613_v56, %v1464_v20  ;;  %v1615_v58 = vpop.f32.mrb[18].mxu1 }
 0x59b   : > { %v1630_v59 = vmul.f32 %v1623_v22, %v1612_v55  ;;  %v1616_v60 = vadd.f32 %v1615_v58, %v1460_v19  ;;  %v1617_v61 = vpop.f32.mrb[19].mxu1 }
 0x59c   : > { %v7774_v62 = vadd.f32 %v1617_v61, %v1464_v20 }
 0x59d   : > { %v1631_v63 = vmul.f32 %v1623_v22, %v1616_v60  ;;  %5769 = vmatprep.mubr.f32.mxu0 %v1630_v59 }
 0x59f   : > { %5770 = vmatmul.mubr.f32.gmra.mrb[18].mxu0 %v1631_v63 }
 0x5a0   : > { %5788 = vmatprep.mubr.msk.f32.mxu0 %vm6971_vm0, %v6970_v0 }
 0x65a   : > { %v5762_v2 = vpop.f32.mrb[12].mxu0 }
 0x65b   : > { %v1714_v3 = vpop.f32.mrb[13].mxu0  ;;  %v1754_v7 = vmul.f32 0.17677669, %v5762_v2 }
 0x65c   : > { %v1753_v10 = vmul.f32 0.17677669, %v1714_v3 }
 0x662   : > { %v5765_v4 = vpop.f32.mrb[14].mxu0 }
 0x663   : > { %v1724_v5 = vpop.f32.mrb[15].mxu0  ;;  %v1756_v19 = vmul.f32 0.17677669, %v5765_v4 }
 0x664   : > { %v1755_v22 = vmul.f32 0.17677669, %v1724_v5 }
 0x66a   : > { %v5768_v6 = vpop.f32.mrb[16].mxu0 }
 0x66b   : > { %v1758_v8 = vmul.f32 0.17677669, %v5768_v6  ;;  %v1734_v9 = vpop.f32.mrb[17].mxu0 }
 0x66c   : > { %v1757_v11 = vmul.f32 0.17677669, %v1734_v9 }
 0x66d   : > { %v1762_v12 = vmax.f32 %v1754_v7, %v1758_v8 }
 0x66e   : > { %v1761_v14 = vmax.f32 %v1753_v10, %v1757_v11 }
 0x670   : > { %v1765_v15 = vmax.f32 %v1761_v14, %v1762_v12 }
 0x672   : > { %v5771_v18 = vpop.f32.mrb[18].mxu0 }
 0x673   : > { %v1760_v20 = vmul.f32 0.17677669, %v5771_v18  ;;  %v1744_v21 = vpop.f32.mrb[19].mxu0 }
 0x674   : > { %v1759_v23 = vmul.f32 0.17677669, %v1744_v21  ;;  %v6169_v21 = vld [vmem:[#allocation16 + $0x20] sm:$0xff]  }
 0x675   : > { %v1764_v24 = vmax.f32 %v1756_v19, %v1760_v20 }
 0x676   : > { %v1763_v26 = vmax.f32 %v1755_v22, %v1759_v23 }
 0x678   : > { %v1766_v27 = vmax.f32 %v1763_v26, %v1764_v24  ;;  %v6172_v24 = vld [vmem:[#allocation16 + $0x38] sm:$0xff]  }
 0x67a   : > { %v1767_v28 = vmax.f32 %v1765_v15, %v1766_v27 }
 0x67c   : > { %v1768_v30 = vrot.slane %v1767_v28, 4 }
 0x67e   : > { %v1769_v32 = vmax.f32 %v1767_v28, %v1768_v30 }
 0x680   : > { %v1770_v33 = vrot.slane %v1769_v32, 2 }
 0x682   : > { %v1771_v35 = vmax.f32 %v1769_v32, %v1770_v33 }
 0x684   : > { %v1772_v36 = vrot.slane %v1771_v35, 1 }
 0x686   : > { %v1773_v38 = vmax.f32 %v1771_v35, %v1772_v36  ;;  %v5138_v36 = vld [vmem:[#allocation18] ss:$0 sm:$0xff] }
 0x688   : > { %v1780_v39 = vsub.f32 %v1759_v23, %v1773_v38  ;;  %v1774_v40 = vsub.f32 %v1753_v10, %v1773_v38  ;;  %v1775_v41 = vsub.f32 %v1754_v7, %v1773_v38  ;;  %v1776_v43 = vsub.f32 %v1755_v22, %v1773_v38  ;;  %v6170_v22 = vld [vmem:[#allocation16 + $0x28] sm:$0xff]   ;;  %v6171_v23 = vld [vmem:[#allocation16 + $0x30] sm:$0xff]  }
 0x689   : > { %v1777_v44 = vsub.f32 %v1756_v19, %v1773_v38  ;;  %v1778_v45 = vsub.f32 %v1757_v11, %v1773_v38  ;;  %v1779_v46 = vsub.f32 %v1758_v8, %v1773_v38  ;;  %v1781_v48 = vsub.f32 %v1760_v20, %v1773_v38  ;;  %v6168_v20 = vld [vmem:[#allocation16 + $0x18] sm:$0xff]  }
 0x68a   : > { %v1794_v49 = vmul.f32 1.442695, %v1780_v39  ;;  %v1782_v50 = vmul.f32 1.442695, %v1774_v40  ;;  %v1784_v51 = vmul.f32 1.442695, %v1775_v41  ;;  %v2069_v40 = vrot.slane %v7640_v29, %v7755_v17 }
 0x68b   : > { %v1786_v53 = vmul.f32 1.442695, %v1776_v43  ;;  %v1788_v54 = vmul.f32 1.442695, %v1777_v44  ;;  %v1790_v55 = vmul.f32 1.442695, %v1778_v45 }
 0x68c   : > { %6311 = vpow2.f32 %v1794_v49  ;;  %v1792_v56 = vmul.f32 1.442695, %v1779_v46  ;;  %v1796_v58 = vmul.f32 1.442695, %v1781_v48  ;;  %v2100_v46 = vld [vmem:[#allocation28] sm:$0xff]  ;;  %v2101_v49 = vld [vmem:[#allocation28 + $0x8] sm:$0xff] }
 0x68d   : > { %6313 = vpow2.f32 %v1782_v50  ;;  %v2108_v48 = vld [vmem:[#allocation28 + $0x40] sm:$0xff] }
 0x68e   : > { %6315 = vpow2.f32 %v1784_v51  ;;  %v5149_v50 = vcombine.low %v2100_v46, %v2108_v48  ;;  %v5150_v51 = vcombine.high %v2100_v46, %v2108_v48  ;;  %v2212_v48 = vld [vmem:[#allocation28 + $0x380] sm:$0xff] }
 0x68f   : > { %6317 = vpow2.f32 %v1786_v53  ;;  %v2109_v53 = vld [vmem:[#allocation28 + $0x48] sm:$0xff] }
 0x690   : > { %6319 = vpow2.f32 %v1788_v54  ;;  %v2116_v54 = vld [vmem:[#allocation28 + $0x80] sm:$0xff] }
 0x691   : > { %6321 = vpow2.f32 %v1790_v55  ;;  %v2124_v55 = vld [vmem:[#allocation28 + $0xc0] sm:$0xff] }
 0x692   : > { %6323 = vpow2.f32 %v1792_v56  ;;  %v5151_v56 = vcombine.low %v2101_v49, %v2109_v53 }
 0x693   : > { %6325 = vpow2.f32 %v1796_v58  ;;  %v5152_v58 = vcombine.high %v2101_v49, %v2109_v53  ;;  %v2220_v49 = vld [vmem:[#allocation28 + $0x3c0] sm:$0xff] }
 0x694   : > { %v5262_v53 = vcombine.high %v2212_v48, %v2220_v49 }
 0x696   : > { %v6312_v59 = vpop.eup %6311 }
 0x697   : > { %v6314_v60 = vpop.eup %6313  ;;  %v1879_v61 = vmul.f32 %v6312_v59, %v7772_v57 }
 0x698   : > { %v6316_v63 = vpop.eup %6315  ;;  %v1873_v2 = vmul.f32 %v6314_v60, %v7760_v25 }
 0x699   : > { %v6318_v3 = vpop.eup %6317  ;;  %v5883_v4 = vpack.c.bf16 %v6316_v63, %v6314_v60  ;;  %v1874_v5 = vmul.f32 %v6316_v63, %v7762_v31  ;;  %v2117_v60 = vld [vmem:[#allocation28 + $0x88] sm:$0xff]  ;;  %v2132_v63 = vld [vmem:[#allocation28 + $0x100] sm:$0xff] }
 0x69a   : > { %v6320_v6 = vpop.eup %6319  ;;  %v1875_v7 = vmul.f32 %v6318_v3, %v7764_v37 }
 0x69b   : > { %v6322_v8 = vpop.eup %6321  ;;  %5884 = vmatpush3.bf16.msra.mxu0 %v5883_v4  ;;  %v5895_v9 = vpack.c.bf16 %v1874_v5, %v1873_v2  ;;  %v5886_v10 = vpack.c.bf16 %v6320_v6, %v6318_v3  ;;  %v1876_v11 = vmul.f32 %v6320_v6, %v7766_v42  ;;  %v2140_v2 = vld [vmem:[#allocation28 + $0x140] sm:$0xff]  ;;  %v2133_v3 = vld [vmem:[#allocation28 + $0x108] sm:$0xff]  ;;  %v5165_v5 = vcombine.low %v2116_v54, %v2124_v55 }
 0x69c   : > { %v6324_v12 = vpop.eup %6323  ;;  %5885 = vmatprep.subr.bf16.mxu0 %v6973_v1  ;;  %v1877_v57 = vmul.f32 %v6322_v8, %v7768_v47  ;;  %v1798_v47 = vld [vmem:[%s7968_s26] sm:$0xff] }
 0x69d   : > { %v6326_v14 = vpop.eup %6325  ;;  %5896 = vmatpush3.bf16.msra.mxu1 %v5895_v9  ;;  %v5898_v25 = vpack.c.bf16 %v1876_v11, %v1875_v7  ;;  %v5889_v15 = vpack.c.bf16 %v6324_v12, %v6322_v8  ;;  %v1878_v31 = vmul.f32 %v6324_v12, %v7770_v52  ;;  %v6165_v52 = vld [vmem:[#allocation16] sm:$0xff]   ;;  %v2141_v4 = vld [vmem:[#allocation28 + $0x148] sm:$0xff]  ;;  %v5182_v7 = vcombine.high %v2132_v63, %v2140_v2 }
 0x69e   : > { %5897 = vmatprep.subr.bf16.mxu1 %v6973_v1  ;;  %v5892_v37 = vpack.c.bf16 %v6326_v14, %v6312_v59  ;;  %v1880_v18 = vmul.f32 %v6326_v14, %v7774_v62  ;;  %v6166_v62 = vld [vmem:[#allocation16 + $0x8] sm:$0xff]   ;;  %v5166_v59 = vcombine.high %v2116_v54, %v2124_v55  ;;  %v5184_v8 = vcombine.high %v2133_v3, %v2141_v4  ;;  %v2221_v54 = vld [vmem:[#allocation28 + $0x3c8] sm:$0xff]  ;;  %v2102_v55 = vld [vmem:[#allocation28 + $0x10] sm:$0xff] }
 0x69f   : > { %5887 = vmatpush3.bf16.msra.mxu0 %v5886_v10  ;;  %v5901_v19 = vpack.c.bf16 %v1878_v31, %v1877_v57  ;;  %v5181_v9 = vcombine.low %v2132_v63, %v2140_v2  ;;  %v5183_v10 = vcombine.low %v2133_v3, %v2141_v4  ;;  %v2149_v31 = vld [vmem:[#allocation28 + $0x188] sm:$0xff]  ;;  %v2103_v63 = vld [vmem:[#allocation28 + $0x18] sm:$0xff] }
 0x6a0   : > { %5888 = vmatprep.subr.bf16.mxu0 %v6973_v1  ;;  %v5904_v42 = vpack.c.bf16 %v1880_v18, %v1879_v61  ;;  %v2125_v61 = vld [vmem:[#allocation28 + $0xc8] sm:$0xff] }
 0x6a1   : > { %5899 = vmatpush3.bf16.msra.mxu1 %v5898_v25  ;;  %v5168_v29 = vcombine.high %v2117_v60, %v2125_v61  ;;  %v5167_v6 = vcombine.low %v2117_v60, %v2125_v61  ;;  %v2148_v25 = vld [vmem:[#allocation28 + $0x180] sm:$0xff]  ;;  %v2157_v18 = vld [vmem:[#allocation28 + $0x1c8] sm:$0xff] }
 0x6a2   : > { %5900 = vmatprep.subr.bf16.mxu1 %v6973_v1 }
 0x6a3   : > { %5890 = vmatpush3.bf16.msra.mxu0 %v5889_v15  ;;  %v2156_v15 = vld [vmem:[#allocation28 + $0x1c0] sm:$0xff] }
 0x6a4   : > { %5891 = vmatprep.subr.bf16.mxu0 %v6973_v1 }
 0x6a5   : > { %5902 = vmatpush3.bf16.msra.mxu1 %v5901_v19  ;;  %v5197_v19 = vcombine.low %v2148_v25, %v2156_v15 }
 0x6a6   : > { %5903 = vmatprep.subr.bf16.mxu1 %v6973_v1  ;;  %v6167_v1 = vld [vmem:[#allocation16 + $0x10] sm:$0xff]  }
 0x6a7   : > { %5893 = vmatpush3.bf16.msra.mxu0 %v5892_v37  ;;  %v5198_v37 = vcombine.high %v2148_v25, %v2156_v15  ;;  %v2119_v25 = vld [vmem:[#allocation28 + $0x98] sm:$0xff] }
 0x6a8   : > { %5810 = vmatprep.subr.bf16.mxu0 %v6970_v0  ;;  %v2127_v15 = vld [vmem:[#allocation28 + $0xd8] sm:$0xff] }
 0x6a9   : > { %5905 = vmatpush3.bf16.msra.mxu1 %v5904_v42  ;;  %v5199_v42 = vcombine.low %v2149_v31, %v2157_v18 }
 0x6aa   : > { %5789 = vmatmul.mubr.msk.f32.vlgmr.msra.gmra.mrb[20].mxu0 %vm1799_vm4, %v1798_v47  ;;  %2952 = vmatprep.subr.bf16.mxu1 %v5150_v51  ;;  %v5261_v51 = vcombine.low %v2212_v48, %v2220_v49  ;;  %v2191_v48 = vld [vmem:[#allocation28 + $0x2d8] sm:$0xff] }
 0x6ab   : > { %5811 = vmatpush3.bf16.msra.mxu0 %v6165_v52  ;;  %5826 = vmatprep.mubr.msk.bf16.mxu0 %vm6971_vm0, %v6970_v0  ;;  %v2164_v52 = vld [vmem:[#allocation28 + $0x200] sm:$0xff] }
 0x6ac   : > { %5808 = vmatmul.mubr.msk.f32.vlgmr.msra.gmra.mrb[20].mxu1 %vm1799_vm4, %v1798_v47  ;;  %5812 = vmatprep.subr.bf16.mxu0 %v6970_v0  ;;  %v5200_v47 = vcombine.high %v2149_v31, %v2157_v18 }
 0x6ad   : > { %2984 = vmatprep.mubr.bf16.mxu1 %v6972_v34  ;;  %2953 = vmatpush1.bf16.msra.mxu1 %v5149_v50  ;;  %v2213_v50 = vld [vmem:[#allocation28 + $0x388] sm:$0xff] }
 0x6ae   : > { %2954 = vmatprep.subr.bf16.mxu1 %v5166_v59  ;;  %v5264_v59 = vcombine.high %v2213_v50, %v2221_v54 }
 0x6af   : > { %5813 = vmatpush3.bf16.msra.mxu0 %v6166_v62  ;;  %v2172_v62 = vld [vmem:[#allocation28 + $0x240] sm:$0xff] }
 0x6b0   : > { %5814 = vmatprep.subr.bf16.mxu0 %v6970_v0 }
 0x6b1   : > { %2955 = vmatpush1.bf16.msra.mxu1 %v5165_v5 }
 0x6b2   : > { %2956 = vmatprep.subr.bf16.mxu1 %v5182_v7 }
 0x6b3   : > { %5815 = vmatpush3.bf16.msra.mxu0 %v6167_v1  ;;  %v2165_v1 = vld [vmem:[#allocation28 + $0x208] sm:$0xff] }
 0x6b4   : > { %5816 = vmatprep.subr.bf16.mxu0 %v6970_v0 }
 0x6b5   : > { %2957 = vmatpush1.bf16.msra.mxu1 %v5181_v9 }
 0x6b6   : > { %2958 = vmatprep.subr.bf16.mxu1 %v5198_v37 }
 0x6b7   : > { %5817 = vmatpush3.bf16.msra.mxu0 %v6168_v20  ;;  %v5214_v20 = vcombine.high %v2164_v52, %v2172_v62 }
 0x6b8   : > { %5818 = vmatprep.subr.bf16.mxu0 %v6970_v0 }
 0x6b9   : > { %2959 = vmatpush1.bf16.msra.mxu1 %v5197_v19  ;;  %v5172_v19 = vcombine.high %v2119_v25, %v2127_v15 }
 0x6ba   : > { %2960 = vmatprep.subr.bf16.mxu1 %v5214_v20 }
 0x6bb   : > { %5819 = vmatpush3.bf16.msra.mxu0 %v6169_v21  ;;  %v2173_v21 = vld [vmem:[#allocation28 + $0x248] sm:$0xff] }
 0x6bc   : > { %5820 = vmatprep.subr.bf16.mxu0 %v6970_v0 }
 0x6bf   : > { %5821 = vmatpush3.bf16.msra.mxu0 %v6170_v22  ;;  %v5213_v22 = vcombine.low %v2164_v52, %v2172_v62  ;;  %v2135_v52 = vld [vmem:[#allocation28 + $0x118] sm:$0xff] }
 0x6c0   : > { %5822 = vmatprep.subr.bf16.mxu0 %v6970_v0  ;;  %v2143_v62 = vld [vmem:[#allocation28 + $0x158] sm:$0xff] }
 0x6c1   : > { %2961 = vmatpush1.bf16.msra.mxu1 %v5213_v22  ;;  %v2150_v22 = vld [vmem:[#allocation28 + $0x190] sm:$0xff] }
 0x6c3   : > { %5823 = vmatpush3.bf16.msra.mxu0 %v6171_v23  ;;  %v5215_v23 = vcombine.low %v2165_v1, %v2173_v21 }
 0x6c4   : > { %5824 = vmatprep.subr.bf16.mxu0 %v6970_v0 }
 0x6c7   : > { %5825 = vmatpush3.bf16.msra.mxu0 %v6172_v24  ;;  %v5216_v24 = vcombine.high %v2165_v1, %v2173_v21  ;;  %v5171_v1 = vcombine.low %v2119_v25, %v2127_v15  ;;  %v5188_v21 = vcombine.high %v2135_v52, %v2143_v62 }
 0x6c8   : > { %2993 = vmatprep.subr.bf16.mxu0 %v5152_v58  ;;  %v5263_v58 = vcombine.low %v2213_v50, %v2221_v54  ;;  %v2198_v54 = vld [vmem:[#allocation28 + $0x310] sm:$0xff] }
 0x77d   : > { %v1869_v26 = vpop.f32.mrb[20].mxu0 }
 0x77e   : > { %6327 = vrcp.f32 %v1869_v26  ;;  %v5790_v27 = vpop.f32.mrb[21].mxu0  ;;  %v2180_v26 = vld [vmem:[#allocation28 + $0x280] sm:$0xff] }
 0x77f   : > { %v1947_v28 = vpop.f32.mrb[20].mxu1  ;;  %v2188_v27 = vld [vmem:[#allocation28 + $0x2c0] sm:$0xff] }
 0x780   : > { %v5809_v30 = vpop.f32.mrb[21].mxu1 }
 0x781   : > { %v5230_v30 = vcombine.high %v2180_v26, %v2188_v27 }
 0x783   : > { %2962 = vmatprep.subr.bf16.mxu1 %v5230_v30 }
 0x788   : > { %v6328_v32 = vpop.eup %6327 }
 0x789   : > { %v1952_v33 = vmul.f32 %v6328_v32, %v1947_v28  ;;  %v2181_v28 = vld [vmem:[#allocation28 + $0x288] sm:$0xff] }
 0x78a   : > { %v2189_v32 = vld [vmem:[#allocation28 + $0x2c8] sm:$0xff] }
 0x78b   : > { %v1953_v35 = vpack.c.bf16 %v1952_v33, %v1952_v33  ;;  %v5229_v33 = vcombine.low %v2180_v26, %v2188_v27  ;;  %v2159_v26 = vld [vmem:[#allocation28 + $0x1d8] sm:$0xff] }
 0x78d   : > { %5827 = vmatmul.mubr.bf16.vlgmr.msra.gmra.mrb[24].mxu0 %v1953_v35  ;;  %v5231_v35 = vcombine.low %v2181_v28, %v2189_v32  ;;  %2963 = vmatpush1.bf16.msra.mxu1 %v5229_v33  ;;  %v2166_v33 = vld [vmem:[#allocation28 + $0x210] sm:$0xff] }
 0x78e   : > { %3025 = vmatprep.mubr.bf16.mxu0 %v6972_v34  ;;  %2994 = vmatpush1.bf16.msra.mxu0 %v5151_v56  ;;  %v2110_v56 = vld [vmem:[#allocation28 + $0x50] sm:$0xff] }
 0x78f   : > { %2995 = vmatprep.subr.bf16.mxu0 %v5168_v29  ;;  %v5153_v60 = vcombine.low %v2102_v55, %v2110_v56  ;;  %v5154_v61 = vcombine.high %v2102_v55, %v2110_v56  ;;  %v2111_v29 = vld [vmem:[#allocation28 + $0x58] sm:$0xff]  ;;  %v2206_v55 = vld [vmem:[#allocation28 + $0x350] sm:$0xff] }
 0x790   : > { %v5155_v2 = vcombine.low %v2103_v63, %v2111_v29  ;;  %v5156_v3 = vcombine.high %v2103_v63, %v2111_v29  ;;  %v2199_v56 = vld [vmem:[#allocation28 + $0x318] sm:$0xff]  ;;  %v2214_v29 = vld [vmem:[#allocation28 + $0x390] sm:$0xff] }
 0x792   : > { %2996 = vmatpush1.bf16.msra.mxu0 %v5167_v6 }
 0x793   : > { %2997 = vmatprep.subr.bf16.mxu0 %v5184_v8  ;;  %v5147_v8 = vld [vmem:[#allocation22] ss:$0 sm:$0xff] }
 0x796   : > { %2998 = vmatpush1.bf16.msra.mxu0 %v5183_v10  ;;  %v5148_v10 = vld [vmem:[#allocation24] ss:$0 sm:$0xff] }
 0x797   : > { %2999 = vmatprep.subr.bf16.mxu0 %v5200_v47  ;;  %v2142_v47 = vld [vmem:[#allocation28 + $0x150] sm:$0xff] }
 0x79a   : > { %3000 = vmatpush1.bf16.msra.mxu0 %v5199_v42  ;;  %v2134_v42 = vld [vmem:[#allocation28 + $0x110] sm:$0xff] }
 0x79b   : > { %3001 = vmatprep.subr.bf16.mxu0 %v5216_v24  ;;  %v5186_v20 = vcombine.high %v2134_v42, %v2142_v47  ;;  %v2151_v24 = vld [vmem:[#allocation28 + $0x198] sm:$0xff]  ;;  %v5185_v27 = vcombine.low %v2134_v42, %v2142_v47  ;;  %v2128_v42 = vld [vmem:[#allocation28 + $0xe0] sm:$0xff]  ;;  %v2121_v47 = vld [vmem:[#allocation28 + $0xa8] sm:$0xff] }
 0x79e   : > { %3002 = vmatpush1.bf16.msra.mxu0 %v5215_v23  ;;  %v2158_v23 = vld [vmem:[#allocation28 + $0x1d0] sm:$0xff] }
 0x79f   : > { %v5202_v30 = vcombine.high %v2150_v22, %v2158_v23 }
 0x860   : > { %v2059_v38 = vpop.f32.mrb[24].mxu0 }
 0x861   : > { %v2060_v39 = vadd.f32 %v5138_v36, %v2059_v38  ;;  %v5828_v41 = vpop.f32.mrb[25].mxu0  ;;  %v5232_v36 = vcombine.high %v2181_v28, %v2189_v32  ;;  %v2196_v38 = vld [vmem:[#allocation28 + $0x300] sm:$0xff]  ;;  %v5187_v28 = vcombine.low %v2135_v52, %v2143_v62  ;;  %v5204_v32 = vcombine.high %v2151_v24, %v2159_v26  ;;  %v2129_v52 = vld [vmem:[#allocation28 + $0xe8] sm:$0xff] }
 0x862   : > { %v2062_v43 = vpop.f32.mrb[26].mxu0 }
 0x863   : > { %v2071_v44 = vadd.f32 %v2069_v40, %v2060_v39  ;;  %v5829_v45 = vpop.f32.mrb[27].mxu0  ;;  %3003 = vmatprep.subr.bf16.mxu0 %v5232_v36  ;;  %v2204_v39 = vld [vmem:[#allocation28 + $0x340] sm:$0xff]  ;;  %v2197_v40 = vld [vmem:[#allocation28 + $0x308] sm:$0xff]  ;;  %v2167_v36 = vld [vmem:[#allocation28 + $0x218] sm:$0xff] }
 0x864   : > { %3004 = vmatpush1.bf16.msra.mxu0 %v5231_v35  ;;  %v5246_v41 = vcombine.high %v2196_v38, %v2204_v39  ;;  %v2205_v43 = vld [vmem:[#allocation28 + $0x348] sm:$0xff]  ;;  %v2174_v35 = vld [vmem:[#allocation28 + $0x250] sm:$0xff] }
 0x865   : > { %2074 = vadd.xlane.f32.xlu1 %v2071_v44  ;;  %v5247_v45 = vcombine.low %v2197_v40, %v2205_v43  ;;  %v5248_v46 = vcombine.high %v2197_v40, %v2205_v43  ;;  %v5203_v40 = vcombine.low %v2151_v24, %v2159_v26  ;;  %v5217_v49 = vcombine.low %v2166_v33, %v2174_v35  ;;  %v2145_v24 = vld [vmem:[#allocation28 + $0x168] sm:$0xff] }
 0x866   : > { %2964 = vmatprep.subr.bf16.mxu1 %v5246_v41  ;;  %v5218_v41 = vcombine.high %v2166_v33, %v2174_v35  ;;  %v2160_v33 = vld [vmem:[#allocation28 + $0x1e0] sm:$0xff]  ;;  %v2153_v35 = vld [vmem:[#allocation28 + $0x1a8] sm:$0xff] }
 0x867   : > { %3005 = vmatprep.subr.bf16.mxu0 %v5248_v46  ;;  %v2183_v46 = vld [vmem:[#allocation28 + $0x298] sm:$0xff] }
 0x868   : > { %3006 = vmatpush1.bf16.msra.mxu0 %v5247_v45  ;;  %v2190_v45 = vld [vmem:[#allocation28 + $0x2d0] sm:$0xff] }
 0x869   : > { %3007 = vmatprep.subr.bf16.mxu0 %v5264_v59 }
 0x86c   : > { %3008 = vmatpush1.bf16.msra.mxu0 %v5263_v58  ;;  %v2207_v58 = vld [vmem:[#allocation28 + $0x358] sm:$0xff] }
 0x86d   : > { %3075 = vmatprep.subr.bf16.mxu0 %v5156_v3  ;;  %v5252_v63 = vcombine.high %v2199_v56, %v2207_v58  ;;  %v2215_v3 = vld [vmem:[#allocation28 + $0x398] sm:$0xff] }
 0x8f2   : > { %v2075_v11 = vpop.xlane.xlu1 %2074 }
 0x8f3   : > { %v2076_v12 = vmul.f32 0.0078125, %v2075_v11 }
 0x8f5   : > { %v7811_v57 = vsub.f32 %v2071_v44, %v2076_v12  ;;  %v5245_v44 = vcombine.low %v2196_v38, %v2204_v39  ;;  %v2118_v12 = vld [vmem:[#allocation28 + $0x90] sm:$0xff]  ;;  %v2175_v38 = vld [vmem:[#allocation28 + $0x258] sm:$0xff]  ;;  %v5201_v39 = vcombine.low %v2150_v22, %v2158_v23  ;;  %v2144_v22 = vld [vmem:[#allocation28 + $0x160] sm:$0xff] }
 0x8f6   : > { %v5220_v43 = vcombine.high %v2167_v36, %v2175_v38  ;;  %v5219_v50 = vcombine.low %v2167_v36, %v2175_v38  ;;  %v2137_v23 = vld [vmem:[#allocation28 + $0x128] sm:$0xff] }
 0x8f7   : > { %v2078_v14 = vmul.f32 %v7811_v57, %v7811_v57  ;;  %2965 = vmatpush1.bf16.msra.mxu1 %v5245_v44  ;;  %v2182_v44 = vld [vmem:[#allocation28 + $0x290] sm:$0xff]  ;;  %v2161_v36 = vld [vmem:[#allocation28 + $0x1e8] sm:$0xff] }
 0x8f8   : > { %2966 = vmatprep.subr.bf16.mxu1 %v5262_v53  ;;  %v5236_v53 = vcombine.high %v2183_v46, %v2191_v48  ;;  %v5233_v59 = vcombine.low %v2182_v44, %v2190_v45 }
 0x8f9   : > { %2079 = vadd.xlane.f32.xlu1 %v2078_v14  ;;  %v2126_v14 = vld [vmem:[#allocation28 + $0xd0] sm:$0xff] }
 0x8fa   : > { %v5170_v18 = vcombine.high %v2118_v12, %v2126_v14 }
 0x8fb   : > { %2967 = vmatpush1.bf16.msra.mxu1 %v5261_v51  ;;  %v5234_v51 = vcombine.high %v2182_v44, %v2190_v45  ;;  %v2176_v44 = vld [vmem:[#allocation28 + $0x260] sm:$0xff]  ;;  %v2169_v45 = vld [vmem:[#allocation28 + $0x228] sm:$0xff] }
 0x8fc   : > { %3034 = vmatprep.subr.bf16.mxu1 %v5154_v61  ;;  %v5250_v61 = vcombine.high %v2198_v54, %v2206_v55 }
 0x986   : > { %v2080_v4 = vpop.xlane.xlu1 %2079 }
 0x987   : > { %v2081_v5 = vmul.f32 0.0078125, %v2080_v4  ;;  %v2223_v4 = vld [vmem:[#allocation28 + $0x3d8] sm:$0xff] }
 0x988   : > { %v5267_v25 = vcombine.low %v2215_v3, %v2223_v4 }
 0x989   : > { %v2082_v6 = vadd.f32 1e-05, %v2081_v5  ;;  %v5249_v5 = vcombine.low %v2198_v54, %v2206_v55  ;;  %v2192_v54 = vld [vmem:[#allocation28 + $0x2e0] sm:$0xff]  ;;  %v2185_v55 = vld [vmem:[#allocation28 + $0x2a8] sm:$0xff] }
 0x98b   : > { %6329 = vrsqrt.f32 %v2082_v6  ;;  %v5251_v6 = vcombine.low %v2199_v56, %v2207_v58  ;;  %v2193_v56 = vld [vmem:[#allocation28 + $0x2e8] sm:$0xff] }
 0x995   : > { %v6330_v7 = vpop.eup %6329 }
 0x996   : > { %v2084_v9 = vmul.f32 %v6330_v7, %v7811_v57  ;;  %v5169_v57 = vcombine.low %v2118_v12, %v2126_v14  ;;  %v2113_v12 = vld [vmem:[#allocation28 + $0x68] sm:$0xff] }
 0x998   : > { %v2091_v11 = vmul.f32 %v5147_v8, %v2084_v9  ;;  %v5268_v8 = vcombine.high %v2215_v3, %v2223_v4  ;;  %v2104_v9 = vld [vmem:[#allocation28 + $0x20] sm:$0xff]  ;;  %v2209_v3 = vld [vmem:[#allocation28 + $0x368] sm:$0xff] }
 0x99a   : > { %v7816_v31 = vadd.f32 %v5148_v10, %v2091_v11  ;;  %v2112_v10 = vld [vmem:[#allocation28 + $0x60] sm:$0xff]  ;;  %v2105_v11 = vld [vmem:[#allocation28 + $0x28] sm:$0xff] }
 0x99b   : > { %v5158_v15 = vcombine.high %v2104_v9, %v2112_v10  ;;  %v5157_v62 = vcombine.low %v2104_v9, %v2112_v10  ;;  %v2224_v9 = vld [vmem:[#allocation28 + $0x3e0] sm:$0xff]  ;;  %v2217_v10 = vld [vmem:[#allocation28 + $0x3a8] sm:$0xff] }
 0x99c   : > { %v7820_v37 = vpack.c.bf16 %v7816_v31, %v7816_v31 }
 0x99e   : > { %2985 = vmatmul.mubr.bf16.vlgmr.msra.gmra.mrb[24].mxu1 %v7820_v37  ;;  %3026 = vmatmul.mubr.bf16.vlgmr.msra.gmra.mrb[28].mxu0 %v7820_v37 }
 0x99f   : > { %3035 = vmatpush1.bf16.msra.mxu1 %v5153_v60  ;;  %3076 = vmatpush1.bf16.msra.mxu0 %v5155_v2  ;;  %v5235_v60 = vcombine.low %v2183_v46, %v2191_v48  ;;  %v2222_v2 = vld [vmem:[#allocation28 + $0x3d0] sm:$0xff]  ;;  %v2177_v46 = vld [vmem:[#allocation28 + $0x268] sm:$0xff] }
 0x9a0   : > { %3036 = vmatprep.subr.bf16.mxu1 %v5170_v18  ;;  %3077 = vmatprep.subr.bf16.mxu0 %v5172_v19  ;;  %v5266_v7 = vcombine.high %v2214_v29, %v2222_v2  ;;  %v5265_v14 = vcombine.low %v2214_v29, %v2222_v2  ;;  %v5160_v18 = vcombine.high %v2105_v11, %v2113_v12  ;;  %v2120_v19 = vld [vmem:[#allocation28 + $0xa0] sm:$0xff]  ;;  %v2201_v2 = vld [vmem:[#allocation28 + $0x328] sm:$0xff] }
 0x9a1   : > { %3066 = vmatprep.mubr.bf16.mxu1 %v6972_v34  ;;  %3107 = vmatprep.mubr.bf16.mxu0 %v6972_v34  ;;  %v5173_v26 = vcombine.low %v2120_v19, %v2128_v42  ;;  %v2208_v29 = vld [vmem:[#allocation28 + $0x360] sm:$0xff] }
 0x9a3   : > { %3037 = vmatpush1.bf16.msra.mxu1 %v5169_v57  ;;  %3078 = vmatpush1.bf16.msra.mxu0 %v5171_v1  ;;  %v5159_v57 = vcombine.low %v2105_v11, %v2113_v12  ;;  %v5174_v1 = vcombine.high %v2120_v19, %v2128_v42  ;;  %v2225_v11 = vld [vmem:[#allocation28 + $0x3e8] sm:$0xff]  ;;  %v2114_v19 = vld [vmem:[#allocation28 + $0x70] sm:$0xff]  ;;  %v2107_v42 = vld [vmem:[#allocation28 + $0x38] sm:$0xff] }
 0x9a4   : > { %3038 = vmatprep.subr.bf16.mxu1 %v5186_v20  ;;  %3079 = vmatprep.subr.bf16.mxu0 %v5188_v21  ;;  %v5176_v20 = vcombine.high %v2121_v47, %v2129_v52  ;;  %v2136_v21 = vld [vmem:[#allocation28 + $0x120] sm:$0xff] }
 0x9a5   : > { %v5189_v38 = vcombine.low %v2136_v21, %v2144_v22 }
 0x9a7   : > { %3039 = vmatpush1.bf16.msra.mxu1 %v5185_v27  ;;  %3080 = vmatpush1.bf16.msra.mxu0 %v5187_v28  ;;  %v5175_v27 = vcombine.low %v2121_v47, %v2129_v52  ;;  %v5190_v28 = vcombine.high %v2136_v21, %v2144_v22  ;;  %v2115_v47 = vld [vmem:[#allocation28 + $0x78] sm:$0xff]  ;;  %v2130_v21 = vld [vmem:[#allocation28 + $0xf0] sm:$0xff] }
 0x9a8   : > { %3040 = vmatprep.subr.bf16.mxu1 %v5202_v30  ;;  %3081 = vmatprep.subr.bf16.mxu0 %v5204_v32  ;;  %v5192_v30 = vcombine.high %v2137_v23, %v2145_v24  ;;  %v2152_v32 = vld [vmem:[#allocation28 + $0x1a0] sm:$0xff]  ;;  %v2123_v22 = vld [vmem:[#allocation28 + $0xb8] sm:$0xff] }
 0x9a9   : > { %v5205_v48 = vcombine.low %v2152_v32, %v2160_v33 }
 0x9ab   : > { %3041 = vmatpush1.bf16.msra.mxu1 %v5201_v39  ;;  %3082 = vmatpush1.bf16.msra.mxu0 %v5203_v40  ;;  %v5191_v39 = vcombine.low %v2137_v23, %v2145_v24  ;;  %v5206_v40 = vcombine.high %v2152_v32, %v2160_v33  ;;  %v2131_v23 = vld [vmem:[#allocation28 + $0xf8] sm:$0xff]  ;;  %v2146_v32 = vld [vmem:[#allocation28 + $0x170] sm:$0xff] }
 0x9ac   : > { %3042 = vmatprep.subr.bf16.mxu1 %v5218_v41  ;;  %3083 = vmatprep.subr.bf16.mxu0 %v5220_v43  ;;  %v5208_v41 = vcombine.high %v2153_v35, %v2161_v36  ;;  %v2168_v43 = vld [vmem:[#allocation28 + $0x220] sm:$0xff]  ;;  %v2139_v33 = vld [vmem:[#allocation28 + $0x138] sm:$0xff] }
 0x9ad   : > { %v5221_v58 = vcombine.low %v2168_v43, %v2176_v44 }
 0x9af   : > { %3043 = vmatpush1.bf16.msra.mxu1 %v5217_v49  ;;  %3084 = vmatpush1.bf16.msra.mxu0 %v5219_v50  ;;  %v5207_v49 = vcombine.low %v2153_v35, %v2161_v36  ;;  %v5222_v50 = vcombine.high %v2168_v43, %v2176_v44  ;;  %v2147_v35 = vld [vmem:[#allocation28 + $0x178] sm:$0xff]  ;;  %v2162_v43 = vld [vmem:[#allocation28 + $0x1f0] sm:$0xff] }
 0x9b0   : > { %3044 = vmatprep.subr.bf16.mxu1 %v5234_v51  ;;  %3085 = vmatprep.subr.bf16.mxu0 %v5236_v53  ;;  %v5224_v51 = vcombine.high %v2169_v45, %v2177_v46  ;;  %v2184_v53 = vld [vmem:[#allocation28 + $0x2a0] sm:$0xff]  ;;  %v2155_v44 = vld [vmem:[#allocation28 + $0x1b8] sm:$0xff] }
 0x9b1   : > { %v5237_v4 = vcombine.low %v2184_v53, %v2192_v54 }
 0x9b3   : > { %3045 = vmatpush1.bf16.msra.mxu1 %v5233_v59  ;;  %3086 = vmatpush1.bf16.msra.mxu0 %v5235_v60  ;;  %v5223_v59 = vcombine.low %v2169_v45, %v2177_v46  ;;  %v5238_v60 = vcombine.high %v2184_v53, %v2192_v54  ;;  %v2163_v45 = vld [vmem:[#allocation28 + $0x1f8] sm:$0xff]  ;;  %v2178_v53 = vld [vmem:[#allocation28 + $0x270] sm:$0xff] }
 0x9b4   : > { %3046 = vmatprep.subr.bf16.mxu1 %v5250_v61  ;;  %3087 = vmatprep.subr.bf16.mxu0 %v5252_v63  ;;  %v5240_v61 = vcombine.high %v2185_v55, %v2193_v56  ;;  %v2200_v63 = vld [vmem:[#allocation28 + $0x320] sm:$0xff]  ;;  %v2171_v54 = vld [vmem:[#allocation28 + $0x238] sm:$0xff] }
 0x9b5   : > { %v5253_v12 = vcombine.low %v2200_v63, %v2208_v29 }
 0x9b7   : > { %3047 = vmatpush1.bf16.msra.mxu1 %v5249_v5  ;;  %3088 = vmatpush1.bf16.msra.mxu0 %v5251_v6  ;;  %v5239_v5 = vcombine.low %v2185_v55, %v2193_v56  ;;  %v5254_v6 = vcombine.high %v2200_v63, %v2208_v29  ;;  %v2179_v55 = vld [vmem:[#allocation28 + $0x278] sm:$0xff] }
 0x9b8   : > { %3048 = vmatprep.subr.bf16.mxu1 %v5266_v7  ;;  %3089 = vmatprep.subr.bf16.mxu0 %v5268_v8  ;;  %v5256_v7 = vcombine.high %v2201_v2, %v2209_v3  ;;  %v2216_v8 = vld [vmem:[#allocation28 + $0x3a0] sm:$0xff]  ;;  %v2187_v63 = vld [vmem:[#allocation28 + $0x2b8] sm:$0xff] }
 0x9b9   : > { %v5269_v52 = vcombine.low %v2216_v8, %v2224_v9  ;;  %v2195_v29 = vld [vmem:[#allocation28 + $0x2f8] sm:$0xff] }
 0x9bb   : > { %3049 = vmatpush1.bf16.msra.mxu1 %v5265_v14  ;;  %3090 = vmatpush1.bf16.msra.mxu0 %v5267_v25  ;;  %v5255_v14 = vcombine.low %v2201_v2, %v2209_v3  ;;  %v5270_v25 = vcombine.high %v2216_v8, %v2224_v9  ;;  %v5227_v3 = vcombine.low %v2171_v54, %v2179_v55  ;;  %v2203_v8 = vld [vmem:[#allocation28 + $0x338] sm:$0xff] }
 0x9bc   : > { %3116 = vmatprep.subr.bf16.mxu1 %v5158_v15  ;;  %3157 = vmatprep.subr.bf16.mxu0 %v5160_v18  ;;  %v5272_v15 = vcombine.high %v2217_v10, %v2225_v11  ;;  %v2106_v18 = vld [vmem:[#allocation28 + $0x30] sm:$0xff]  ;;  %v2211_v9 = vld [vmem:[#allocation28 + $0x378] sm:$0xff] }
 0x9bd   : > { %v5161_v24 = vcombine.low %v2106_v18, %v2114_v19 }
 0x9be   : > { %3067 = vmatmul.mubr.bf16.vlgmr.msra.gmra.mrb[28].mxu1 %v7820_v37  ;;  %3108 = vmatmul.mubr.bf16.vlgmr.msra.gmra.mrb[32].mxu0 %v7820_v37 }
 0x9bf   : > { %3117 = vmatpush1.bf16.msra.mxu1 %v5157_v62  ;;  %3158 = vmatpush1.bf16.msra.mxu0 %v5159_v57  ;;  %v5271_v62 = vcombine.low %v2217_v10, %v2225_v11  ;;  %v5162_v57 = vcombine.high %v2106_v18, %v2114_v19  ;;  %v5243_v11 = vcombine.low %v2187_v63, %v2195_v29  ;;  %v2219_v18 = vld [vmem:[#allocation28 + $0x3b8] sm:$0xff] }
 0x9c0   : > { %3118 = vmatprep.subr.bf16.mxu1 %v5174_v1  ;;  %3159 = vmatprep.subr.bf16.mxu0 %v5176_v20  ;;  %v5164_v1 = vcombine.high %v2107_v42, %v2115_v47  ;;  %v2122_v20 = vld [vmem:[#allocation28 + $0xb0] sm:$0xff]  ;;  %v2227_v19 = vld [vmem:[#allocation28 + $0x3f8] sm:$0xff] }
 0x9c1   : > { %3148 = vmatprep.mubr.bf16.mxu1 %v6972_v34  ;;  %3189 = vmatprep.mubr.bf16.mxu0 %v6972_v34  ;;  %v5177_v36 = vcombine.low %v2122_v20, %v2130_v21 }
 0x9c3   : > { %3119 = vmatpush1.bf16.msra.mxu1 %v5173_v26  ;;  %3160 = vmatpush1.bf16.msra.mxu0 %v5175_v27  ;;  %v5163_v26 = vcombine.low %v2107_v42, %v2115_v47  ;;  %v5178_v27 = vcombine.high %v2122_v20, %v2130_v21  ;;  %v5259_v47 = vcombine.low %v2203_v8, %v2211_v9  ;;  %v6173_v20 = vld [vmem:[#allocation30 + $0x40] sm:$0xff]  }
 0x9c4   : > { %3120 = vmatprep.subr.bf16.mxu1 %v5190_v28  ;;  %3161 = vmatprep.subr.bf16.mxu0 %v5192_v30  ;;  %v5180_v28 = vcombine.high %v2123_v22, %v2131_v23  ;;  %v2138_v30 = vld [vmem:[#allocation28 + $0x130] sm:$0xff]  ;;  %v6174_v21 = vld [vmem:[#allocation30 + $0xc0] sm:$0xff]  }
 0x9c5   : > { %v5193_v46 = vcombine.low %v2138_v30, %v2146_v32 }
 0x9c7   : > { %3121 = vmatpush1.bf16.msra.mxu1 %v5189_v38  ;;  %3162 = vmatpush1.bf16.msra.mxu0 %v5191_v39  ;;  %v5179_v38 = vcombine.low %v2123_v22, %v2131_v23  ;;  %v5194_v39 = vcombine.high %v2138_v30, %v2146_v32  ;;  %v6175_v22 = vld [vmem:[#allocation30] sm:$0xff]   ;;  %v6181_v30 = vld [vmem:[#allocation30 + $0x50] sm:$0xff]  }
 0x9c8   : > { %3122 = vmatprep.subr.bf16.mxu1 %v5206_v40  ;;  %3163 = vmatprep.subr.bf16.mxu0 %v5208_v41  ;;  %v5196_v40 = vcombine.high %v2139_v33, %v2147_v35  ;;  %v2154_v41 = vld [vmem:[#allocation28 + $0x1b0] sm:$0xff]  ;;  %v6176_v23 = vld [vmem:[#allocation30 + $0x80] sm:$0xff]  }
 0x9c9   : > { %v5209_v56 = vcombine.low %v2154_v41, %v2162_v43  ;;  %v6182_v32 = vld [vmem:[#allocation30 + $0xd0] sm:$0xff]  }
 0x9cb   : > { %3123 = vmatpush1.bf16.msra.mxu1 %v5205_v48  ;;  %3164 = vmatpush1.bf16.msra.mxu0 %v5207_v49  ;;  %v5195_v48 = vcombine.low %v2139_v33, %v2147_v35  ;;  %v5210_v49 = vcombine.high %v2154_v41, %v2162_v43  ;;  %v6183_v33 = vld [vmem:[#allocation30 + $0x10] sm:$0xff]   ;;  %v6190_v41 = vld [vmem:[#allocation30 + $0xe0] sm:$0xff]  }
 0x9cc   : > { %3124 = vmatprep.subr.bf16.mxu1 %v5222_v50  ;;  %3165 = vmatprep.subr.bf16.mxu0 %v5224_v51  ;;  %v5212_v50 = vcombine.high %v2155_v44, %v2163_v45  ;;  %v2170_v51 = vld [vmem:[#allocation28 + $0x230] sm:$0xff]  ;;  %v6191_v43 = vld [vmem:[#allocation30 + $0x20] sm:$0xff]  }
 0x9cd   : > { %v5225_v2 = vcombine.low %v2170_v51, %v2178_v53  ;;  %v6184_v35 = vld [vmem:[#allocation30 + $0x90] sm:$0xff]  }
 0x9cf   : > { %3125 = vmatpush1.bf16.msra.mxu1 %v5221_v58  ;;  %3166 = vmatpush1.bf16.msra.mxu0 %v5223_v59  ;;  %v5211_v58 = vcombine.low %v2155_v44, %v2163_v45  ;;  %v5226_v59 = vcombine.high %v2170_v51, %v2178_v53  ;;  %v6192_v44 = vld [vmem:[#allocation30 + $0xa0] sm:$0xff]   ;;  %v6193_v45 = vld [vmem:[#allocation30 + $0x68] sm:$0xff]   ;;  %v6198_v51 = vld [vmem:[#allocation30 + $0xf0] sm:$0xff]  }
 0x9d0   : > { %3126 = vmatprep.subr.bf16.mxu1 %v5238_v60  ;;  %3167 = vmatprep.subr.bf16.mxu0 %v5240_v61  ;;  %v2186_v60 = vld [vmem:[#allocation28 + $0x2b0] sm:$0xff] }
 0x9d1   : > { %v2194_v61 = vld [vmem:[#allocation28 + $0x2f0] sm:$0xff] }
 0x9d2   : > { %v5241_v10 = vcombine.low %v2186_v60, %v2194_v61  ;;  %v6199_v53 = vld [vmem:[#allocation30 + $0x30] sm:$0xff]  }
 0x9d3   : > { %3127 = vmatpush1.bf16.msra.mxu1 %v5237_v4  ;;  %3168 = vmatpush1.bf16.msra.mxu0 %v5239_v5  ;;  %v5242_v4 = vcombine.high %v2186_v60, %v2194_v61  ;;  %v5244_v5 = vcombine.high %v2187_v63, %v2195_v29  ;;  %v6206_v60 = vld [vmem:[#allocation30 + $0x1c0] sm:$0xff]   ;;  %v2242_v61 = vsub.s32 2, %v7749_v13  ;;  %v2246_v29 = vsub.s32 3, %v7749_v13 }
 0x9d4   : > { %3128 = vmatprep.subr.bf16.mxu1 %v5254_v6  ;;  %3169 = vmatprep.subr.bf16.mxu0 %v5256_v7  ;;  %v2202_v6 = vld [vmem:[#allocation28 + $0x330] sm:$0xff]  ;;  %v7840_v63 = vld [vmem:[%s8062_s27] sm:$0xff] }
 0x9d5   : > { %v2210_v7 = vld [vmem:[#allocation28 + $0x370] sm:$0xff] }
 0x9d6   : > { %v5257_v42 = vcombine.low %v2202_v6, %v2210_v7 }
 0x9d7   : > { %3129 = vmatpush1.bf16.msra.mxu1 %v5253_v12  ;;  %3170 = vmatpush1.bf16.msra.mxu0 %v5255_v14  ;;  %v5258_v12 = vcombine.high %v2202_v6, %v2210_v7  ;;  %v5260_v14 = vcombine.high %v2203_v8, %v2211_v9 }
 0x9d8   : > { %3130 = vmatprep.subr.bf16.mxu1 %v5270_v25  ;;  %3171 = vmatprep.subr.bf16.mxu0 %v5272_v15  ;;  %v2218_v25 = vld [vmem:[#allocation28 + $0x3b0] sm:$0xff] }
 0x9d9   : > { %v2226_v15 = vld [vmem:[#allocation28 + $0x3f0] sm:$0xff] }
 0x9db   : > { %3131 = vmatpush1.bf16.msra.mxu1 %v5269_v52  ;;  %3172 = vmatpush1.bf16.msra.mxu0 %v5271_v62  ;;  %v5274_v52 = vcombine.high %v2218_v25, %v2226_v15  ;;  %v5276_v62 = vcombine.high %v2219_v18, %v2227_v19 }
 0x9dc   : > { %3198 = vmatprep.subr.bf16.mxu1 %v5162_v57  ;;  %3239 = vmatprep.subr.bf16.mxu0 %v5164_v1  ;;  %v5273_v57 = vcombine.low %v2218_v25, %v2226_v15  ;;  %v5275_v1 = vcombine.low %v2219_v18, %v2227_v19 }
 0x9de   : > { %3149 = vmatmul.mubr.bf16.vlgmr.msra.gmra.mrb[32].mxu1 %v7820_v37  ;;  %3190 = vmatmul.mubr.bf16.vlgmr.msra.gmra.mrb[36].mxu0 %v7820_v37 }
 0x9df   : > { %3199 = vmatpush1.bf16.msra.mxu1 %v5161_v24  ;;  %3240 = vmatpush1.bf16.msra.mxu0 %v5163_v26  ;;  %v6177_v24 = vld [vmem:[#allocation30 + $0x48] sm:$0xff]  }
 0x9e0   : > { %3200 = vmatprep.subr.bf16.mxu1 %v5178_v27  ;;  %3241 = vmatprep.subr.bf16.mxu0 %v5180_v28  ;;  %v6178_v26 = vld [vmem:[#allocation30 + $0xc8] sm:$0xff]  }
 0x9e1   : > { %3230 = vmatprep.mubr.bf16.mxu1 %v6972_v34  ;;  %3271 = vmatprep.mubr.bf16.mxu0 %v6972_v34  ;;  %v5228_v34 = vcombine.high %v2171_v54, %v2179_v55  ;;  %v6179_v27 = vld [vmem:[#allocation30 + $0x8] sm:$0xff]   ;;  %v6200_v54 = vld [vmem:[#allocation30 + $0xb0] sm:$0xff]   ;;  %v6201_v55 = vld [vmem:[#allocation30 + $0x78] sm:$0xff]  }
 0x9e2   : > { %v6180_v28 = vld [vmem:[#allocation30 + $0x88] sm:$0xff]  }
 0x9e3   : > { %3201 = vmatpush1.bf16.msra.mxu1 %v5177_v36  ;;  %3242 = vmatpush1.bf16.msra.mxu0 %v5179_v38  ;;  %v6185_v36 = vld [vmem:[#allocation30 + $0x58] sm:$0xff]  }
 0x9e4   : > { %3202 = vmatprep.subr.bf16.mxu1 %v5194_v39  ;;  %3243 = vmatprep.subr.bf16.mxu0 %v5196_v40  ;;  %v6186_v38 = vld [vmem:[#allocation30 + $0xd8] sm:$0xff]   ;;  %v6189_v40 = vld [vmem:[#allocation30 + $0x60] sm:$0xff]  }
 0x9e5   : > { %v6187_v39 = vld [vmem:[#allocation30 + $0x18] sm:$0xff]  }
 0x9e7   : > { %3203 = vmatpush1.bf16.msra.mxu1 %v5193_v46  ;;  %3244 = vmatpush1.bf16.msra.mxu0 %v5195_v48  ;;  %v6194_v46 = vld [vmem:[#allocation30 + $0xe8] sm:$0xff]  }
 0x9e8   : > { %3204 = vmatprep.subr.bf16.mxu1 %v5210_v49  ;;  %3245 = vmatprep.subr.bf16.mxu0 %v5212_v50  ;;  %v6195_v48 = vld [vmem:[#allocation30 + $0x28] sm:$0xff]   ;;  %v6197_v50 = vld [vmem:[#allocation30 + $0x70] sm:$0xff]  }
 0x9e9   : > { %v6196_v49 = vld [vmem:[#allocation30 + $0xa8] sm:$0xff]  }
 0x9eb   : > { %3205 = vmatpush1.bf16.msra.mxu1 %v5209_v56  ;;  %3246 = vmatpush1.bf16.msra.mxu0 %v5211_v58  ;;  %v6202_v56 = vld [vmem:[#allocation30 + $0xf8] sm:$0xff]  }
 0x9ec   : > { %3206 = vmatprep.subr.bf16.mxu1 %v5226_v59  ;;  %3247 = vmatprep.subr.bf16.mxu0 %v5228_v34  ;;  %v6203_v58 = vld [vmem:[#allocation30 + $0x38] sm:$0xff]   ;;  %v6205_v34 = vld [vmem:[#allocation30 + $0x140] sm:$0xff]  }
 0x9ed   : > { %v6204_v59 = vld [vmem:[#allocation30 + $0xb8] sm:$0xff]  }
 0x9ef   : > { %3207 = vmatpush1.bf16.msra.mxu1 %v5225_v2  ;;  %3248 = vmatpush1.bf16.msra.mxu0 %v5227_v3  ;;  %v2235_v2 = vrot.slane %v7840_v63, %v7755_v17  ;;  %v2243_v3 = vrot.slane %v7840_v63, %v2242_v61 }
 0x9f0   : > { %3208 = vmatprep.subr.bf16.mxu1 %v5242_v4  ;;  %3249 = vmatprep.subr.bf16.mxu0 %v5244_v5  ;;  %v2239_v4 = vrot.slane %v7840_v63, %v7752_v16  ;;  %v2247_v5 = vrot.slane %v7840_v63, %v2246_v29 }
 0x9f3   : > { %3209 = vmatpush1.bf16.msra.mxu1 %v5241_v10  ;;  %3250 = vmatpush1.bf16.msra.mxu0 %v5243_v11 }
 0x9f4   : > { %3210 = vmatprep.subr.bf16.mxu1 %v5258_v12  ;;  %3251 = vmatprep.subr.bf16.mxu0 %v5260_v14 }
 0x9f7   : > { %3211 = vmatpush1.bf16.msra.mxu1 %v5257_v42  ;;  %3252 = vmatpush1.bf16.msra.mxu0 %v5259_v47 }
 0x9f8   : > { %3212 = vmatprep.subr.bf16.mxu1 %v5274_v52  ;;  %3253 = vmatprep.subr.bf16.mxu0 %v5276_v62 }
 0x9fb   : > { %3213 = vmatpush1.bf16.msra.mxu1 %v5273_v57  ;;  %3254 = vmatpush1.bf16.msra.mxu0 %v5275_v1 }
 0x9fc   : > { %5493 = vmatprep.subr.bf16.mxu1 %v6173_v20  ;;  %5515 = vmatprep.subr.bf16.mxu0 %v6174_v21  ;;  %v6207_v20 = vld [vmem:[#allocation30 + $0x100] sm:$0xff]  }
 0x9fd   : > { %v6208_v21 = vld [vmem:[#allocation30 + $0x180] sm:$0xff]  }
 0x9fe   : > { %3231 = vmatmul.mubr.bf16.vlgmr.msra.gmra.mrb[36].mxu1 %v7820_v37  ;;  %3272 = vmatmul.mubr.bf16.vlgmr.msra.gmra.mrb[40].mxu0 %v7820_v37  ;;  %v6188_v37 = vld [vmem:[#allocation30 + $0x98] sm:$0xff]  }
 0x9ff   : > { %5494 = vmatpush3.bf16.msra.mxu1 %v6175_v22  ;;  %5516 = vmatpush3.bf16.msra.mxu0 %v6176_v23 }
 0xa00   : > { %5495 = vmatprep.subr.bf16.mxu1 %v6177_v24  ;;  %5517 = vmatprep.subr.bf16.mxu0 %v6178_v26  ;;  %v6209_v24 = vld [vmem:[#allocation30 + $0x148] sm:$0xff]  }
 0xa01   : > { %v6210_v26 = vld [vmem:[#allocation30 + $0x1c8] sm:$0xff]  }
 0xa03   : > { %5496 = vmatpush3.bf16.msra.mxu1 %v6179_v27  ;;  %5518 = vmatpush3.bf16.msra.mxu0 %v6180_v28  ;;  %v6211_v27 = vld [vmem:[#allocation30 + $0x108] sm:$0xff]  }
 0xa04   : > { %5497 = vmatprep.subr.bf16.mxu1 %v6181_v30  ;;  %5519 = vmatprep.subr.bf16.mxu0 %v6182_v32  ;;  %v6212_v28 = vld [vmem:[#allocation30 + $0x188] sm:$0xff]   ;;  %v6213_v30 = vld [vmem:[#allocation30 + $0x150] sm:$0xff]  }
 0xa05   : > { %v6214_v32 = vld [vmem:[#allocation30 + $0x1d0] sm:$0xff]  }
 0xa07   : > { %5498 = vmatpush3.bf16.msra.mxu1 %v6183_v33  ;;  %5520 = vmatpush3.bf16.msra.mxu0 %v6184_v35  ;;  %v6215_v33 = vld [vmem:[#allocation30 + $0x110] sm:$0xff]  }
 0xa08   : > { %5499 = vmatprep.subr.bf16.mxu1 %v6185_v36  ;;  %5521 = vmatprep.subr.bf16.mxu0 %v6186_v38  ;;  %v6216_v35 = vld [vmem:[#allocation30 + $0x190] sm:$0xff]   ;;  %v6217_v36 = vld [vmem:[#allocation30 + $0x158] sm:$0xff]  }
 0xa09   : > { %v6218_v38 = vld [vmem:[#allocation30 + $0x1d8] sm:$0xff]  }
 0xa0b   : > { %5500 = vmatpush3.bf16.msra.mxu1 %v6187_v39  ;;  %5522 = vmatpush3.bf16.msra.mxu0 %v6188_v37  ;;  %v6219_v39 = vld [vmem:[#allocation30 + $0x118] sm:$0xff]  }
 0xa0c   : > { %5501 = vmatprep.subr.bf16.mxu1 %v6189_v40  ;;  %5523 = vmatprep.subr.bf16.mxu0 %v6190_v41  ;;  %v6220_v37 = vld [vmem:[#allocation30 + $0x198] sm:$0xff]   ;;  %v6221_v40 = vld [vmem:[#allocation30 + $0x160] sm:$0xff]  }
 0xa0d   : > { %v6222_v41 = vld [vmem:[#allocation30 + $0x1e0] sm:$0xff]  }
 0xa0f   : > { %5502 = vmatpush3.bf16.msra.mxu1 %v6191_v43  ;;  %5524 = vmatpush3.bf16.msra.mxu0 %v6192_v44  ;;  %v6223_v43 = vld [vmem:[#allocation30 + $0x120] sm:$0xff]  }
 0xa10   : > { %5503 = vmatprep.subr.bf16.mxu1 %v6193_v45  ;;  %5525 = vmatprep.subr.bf16.mxu0 %v6194_v46  ;;  %v6224_v44 = vld [vmem:[#allocation30 + $0x1a0] sm:$0xff]   ;;  %v6225_v45 = vld [vmem:[#allocation30 + $0x168] sm:$0xff]  }
 0xa11   : > { %v6226_v46 = vld [vmem:[#allocation30 + $0x1e8] sm:$0xff]  }
 0xa13   : > { %5504 = vmatpush3.bf16.msra.mxu1 %v6195_v48  ;;  %5526 = vmatpush3.bf16.msra.mxu0 %v6196_v49  ;;  %v2250_v48 = vsub.s32 4, %v7749_v13  ;;  %v2258_v49 = vsub.s32 6, %v7749_v13 }
 0xa14   : > { %5505 = vmatprep.subr.bf16.mxu1 %v6197_v50  ;;  %5527 = vmatprep.subr.bf16.mxu0 %v6198_v51  ;;  %v6227_v50 = vld [vmem:[#allocation30 + $0x128] sm:$0xff]  }
 0xa15   : > { %v6228_v51 = vld [vmem:[#allocation30 + $0x1a8] sm:$0xff]  }
 0xa17   : > { %5506 = vmatpush3.bf16.msra.mxu1 %v6199_v53  ;;  %5528 = vmatpush3.bf16.msra.mxu0 %v6200_v54  ;;  %v2254_v53 = vsub.s32 5, %v7749_v13  ;;  %v2262_v54 = vsub.s32 7, %v7749_v13  ;;  %v6299_v13 = vld [vmem:[#allocation30 + $0x338] sm:$0xff]  }
 0xa18   : > { %5507 = vmatprep.subr.bf16.mxu1 %v6201_v55  ;;  %5529 = vmatprep.subr.bf16.mxu0 %v6202_v56  ;;  %v6229_v55 = vld [vmem:[#allocation30 + $0x170] sm:$0xff]  }
 0xa19   : > { %v6230_v56 = vld [vmem:[#allocation30 + $0x1f0] sm:$0xff]  }
 0xa1b   : > { %5508 = vmatpush3.bf16.msra.mxu1 %v6203_v58  ;;  %5530 = vmatpush3.bf16.msra.mxu0 %v6204_v59  ;;  %v2251_v58 = vrot.slane %v7840_v63, %v2250_v48  ;;  %v2259_v59 = vrot.slane %v7840_v63, %v2258_v49 }
 0xa1c   : > { %5537 = vmatprep.subr.bf16.mxu1 %v6205_v34  ;;  %5559 = vmatprep.subr.bf16.mxu0 %v6206_v60  ;;  %v2255_v34 = vrot.slane %v7840_v63, %v2254_v53  ;;  %v2263_v60 = vrot.slane %v7840_v63, %v2262_v54  ;;  %v6236_v63 = vld [vmem:[#allocation30 + $0x1b8] sm:$0xff]  }
 0xa71   : > { %v2986_v6 = vpop.f32.mrb[24].mxu1  ;;  %v3027_v7 = vpop.f32.mrb[28].mxu0 }
 0xa72   : > { %v2987_v8 = vadd.f32 %v2986_v6, %v2235_v2  ;;  %v3028_v9 = vadd.f32 %v3027_v7, %v2243_v3  ;;  %v2988_v10 = vpop.f32.mrb[25].mxu1  ;;  %v3029_v11 = vpop.f32.mrb[29].mxu0  ;;  %v6231_v2 = vld [vmem:[#allocation30 + $0x130] sm:$0xff]  }
 0xa73   : > { %v2989_v12 = vadd.f32 %v2988_v10, %v2239_v4  ;;  %v3030_v14 = vadd.f32 %v3029_v11, %v2247_v5  ;;  %v2990_v25 = vpop.f32.mrb[26].mxu1  ;;  %v3031_v15 = vpop.f32.mrb[30].mxu0  ;;  %v6232_v3 = vld [vmem:[#allocation30 + $0x1b0] sm:$0xff]   ;;  %v6233_v4 = vld [vmem:[#allocation30 + $0x178] sm:$0xff]  }
 0xa74   : > { %v3280_v18 = vmax.f32 %v2987_v8, 0.0  ;;  %v3282_v19 = vmax.f32 %v3028_v9, 0.0  ;;  %v2991_v42 = vpop.f32.mrb[27].mxu1  ;;  %v3032_v47 = vpop.f32.mrb[31].mxu0  ;;  %v6234_v5 = vld [vmem:[#allocation30 + $0x1f8] sm:$0xff]  }
 0xa75   : > { %v3281_v52 = vmax.f32 %v2989_v12, 0.0  ;;  %v3283_v62 = vmax.f32 %v3030_v14, 0.0 }
 0xa76   : > { %v3296_v22 = vpack.c.bf16 %v3280_v18, %v3280_v18  ;;  %v3298_v23 = vpack.c.bf16 %v3282_v19, %v3282_v19  ;;  %v6235_v18 = vld [vmem:[#allocation30 + $0x138] sm:$0xff]  }
 0xa77   : > { %v3297_v57 = vpack.c.bf16 %v3281_v52, %v3281_v52  ;;  %v3299_v1 = vpack.c.bf16 %v3283_v62, %v3283_v62  ;;  %v6237_v62 = vld [vmem:[#allocation30 + $0x240] sm:$0xff]  }
 0xa79   : > { %4375 = vmatprep.mubr.bf16.mxu1 %v3297_v57  ;;  %4415 = vmatprep.mubr.bf16.mxu0 %v3299_v1  ;;  %v6238_v57 = vld [vmem:[#allocation30 + $0x2c0] sm:$0xff]  }
 0xa7a   : > { %4376 = vmatmul.mubr.bf16.vlgmr.msra.gmra.mrb[40].mxu1 %v3296_v22  ;;  %4416 = vmatmul.mubr.bf16.vlgmr.msra.gmra.mrb[44].mxu0 %v3298_v23  ;;  %v6239_v23 = vld [vmem:[#allocation30 + $0x200] sm:$0xff]  }
 0xa7b   : > { %5538 = vmatpush3.bf16.msra.mxu1 %v6207_v20  ;;  %5560 = vmatpush3.bf16.msra.mxu0 %v6208_v21 }
 0xa7c   : > { %5539 = vmatprep.subr.bf16.mxu1 %v6209_v24  ;;  %5561 = vmatprep.subr.bf16.mxu0 %v6210_v26  ;;  %v6240_v24 = vld [vmem:[#allocation30 + $0x280] sm:$0xff]  }
 0xa7f   : > { %5540 = vmatpush3.bf16.msra.mxu1 %v6211_v27  ;;  %5562 = vmatpush3.bf16.msra.mxu0 %v6212_v28  ;;  %v6241_v28 = vld [vmem:[#allocation30 + $0x248] sm:$0xff]  }
 0xa80   : > { %5541 = vmatprep.subr.bf16.mxu1 %v6213_v30  ;;  %5563 = vmatprep.subr.bf16.mxu0 %v6214_v32  ;;  %v6242_v30 = vld [vmem:[#allocation30 + $0x2c8] sm:$0xff]  }
 0xa81   : > { %v6243_v32 = vld [vmem:[#allocation30 + $0x208] sm:$0xff]  }
 0xa83   : > { %5542 = vmatpush3.bf16.msra.mxu1 %v6215_v33  ;;  %5564 = vmatpush3.bf16.msra.mxu0 %v6216_v35  ;;  %v6244_v33 = vld [vmem:[#allocation30 + $0x288] sm:$0xff]   ;;  %v6245_v35 = vld [vmem:[#allocation30 + $0x250] sm:$0xff]  }
 0xa84   : > { %5543 = vmatprep.subr.bf16.mxu1 %v6217_v36  ;;  %5565 = vmatprep.subr.bf16.mxu0 %v6218_v38  ;;  %v6246_v36 = vld [vmem:[#allocation30 + $0x2d0] sm:$0xff]  }
 0xa85   : > { %v6247_v38 = vld [vmem:[#allocation30 + $0x210] sm:$0xff]  }
 0xa87   : > { %5544 = vmatpush3.bf16.msra.mxu1 %v6219_v39  ;;  %5566 = vmatpush3.bf16.msra.mxu0 %v6220_v37  ;;  %v6248_v39 = vld [vmem:[#allocation30 + $0x290] sm:$0xff]   ;;  %v6249_v37 = vld [vmem:[#allocation30 + $0x258] sm:$0xff]  }
 0xa88   : > { %5545 = vmatprep.subr.bf16.mxu1 %v6221_v40  ;;  %5567 = vmatprep.subr.bf16.mxu0 %v6222_v41  ;;  %v6250_v40 = vld [vmem:[#allocation30 + $0x2d8] sm:$0xff]  }
 0xa89   : > { %v6251_v41 = vld [vmem:[#allocation30 + $0x218] sm:$0xff]  }
 0xa8b   : > { %5546 = vmatpush3.bf16.msra.mxu1 %v6223_v43  ;;  %5568 = vmatpush3.bf16.msra.mxu0 %v6224_v44  ;;  %v6252_v43 = vld [vmem:[#allocation30 + $0x298] sm:$0xff]   ;;  %v6253_v44 = vld [vmem:[#allocation30 + $0x260] sm:$0xff]  }
 0xa8c   : > { %5547 = vmatprep.subr.bf16.mxu1 %v6225_v45  ;;  %5569 = vmatprep.subr.bf16.mxu0 %v6226_v46  ;;  %v6254_v45 = vld [vmem:[#allocation30 + $0x2e0] sm:$0xff]  }
 0xa8d   : > { %v6255_v46 = vld [vmem:[#allocation30 + $0x220] sm:$0xff]  }
 0xa8f   : > { %5548 = vmatpush3.bf16.msra.mxu1 %v6227_v50  ;;  %5570 = vmatpush3.bf16.msra.mxu0 %v6228_v51  ;;  %v6256_v50 = vld [vmem:[#allocation30 + $0x2a0] sm:$0xff]   ;;  %v6257_v51 = vld [vmem:[#allocation30 + $0x268] sm:$0xff]  }
 0xa90   : > { %5549 = vmatprep.subr.bf16.mxu1 %v6229_v55  ;;  %5571 = vmatprep.subr.bf16.mxu0 %v6230_v56  ;;  %v6258_v55 = vld [vmem:[#allocation30 + $0x2e8] sm:$0xff]  }
 0xa91   : > { %v3068_v6 = vpop.f32.mrb[28].mxu1  ;;  %v3109_v7 = vpop.f32.mrb[32].mxu0  ;;  %v6259_v56 = vld [vmem:[#allocation30 + $0x228] sm:$0xff]  }
 0xa92   : > { %v3069_v8 = vadd.f32 %v3068_v6, %v2251_v58  ;;  %v3110_v9 = vadd.f32 %v3109_v7, %v2259_v59  ;;  %v3070_v10 = vpop.f32.mrb[29].mxu1  ;;  %v3111_v11 = vpop.f32.mrb[33].mxu0  ;;  %v6260_v58 = vld [vmem:[#allocation30 + $0x2a8] sm:$0xff]   ;;  %v6263_v6 = vld [vmem:[#allocation30 + $0x230] sm:$0xff]  }
 0xa93   : > { %v3071_v12 = vadd.f32 %v3070_v10, %v2255_v34  ;;  %v3112_v14 = vadd.f32 %v3111_v11, %v2263_v60  ;;  %v3072_v25 = vpop.f32.mrb[30].mxu1  ;;  %v3113_v15 = vpop.f32.mrb[34].mxu0  ;;  %5550 = vmatpush3.bf16.msra.mxu1 %v6231_v2  ;;  %5572 = vmatpush3.bf16.msra.mxu0 %v6232_v3  ;;  %v7872_v59 = vld [vmem:[%s8062_s27 + $0x8] sm:$0xff] }
 0xa94   : > { %v3284_v19 = vmax.f32 %v3069_v8, 0.0  ;;  %v3286_v42 = vmax.f32 %v3110_v9, 0.0  ;;  %v3073_v47 = vpop.f32.mrb[31].mxu1  ;;  %v3114_v52 = vpop.f32.mrb[35].mxu0  ;;  %5551 = vmatprep.subr.bf16.mxu1 %v6233_v4  ;;  %5573 = vmatprep.subr.bf16.mxu0 %v6234_v5  ;;  %v6261_v34 = vld [vmem:[#allocation30 + $0x270] sm:$0xff]   ;;  %v2267_v2 = vrot.slane %v7872_v59, %v7755_v17  ;;  %v2275_v3 = vrot.slane %v7872_v59, %v2242_v61  ;;  %v6265_v8 = vld [vmem:[#allocation30 + $0x278] sm:$0xff]  }
 0xa95   : > { %v3285_v1 = vmax.f32 %v3071_v12, 0.0  ;;  %v3287_v20 = vmax.f32 %v3112_v14, 0.0  ;;  %v6262_v60 = vld [vmem:[#allocation30 + $0x2f0] sm:$0xff]   ;;  %v2271_v4 = vrot.slane %v7872_v59, %v7752_v16  ;;  %v2279_v5 = vrot.slane %v7872_v59, %v2246_v29  ;;  %v6266_v9 = vld [vmem:[#allocation30 + $0x2f8] sm:$0xff]  }
 0xa96   : > { %v3300_v26 = vpack.c.bf16 %v3284_v19, %v3284_v19  ;;  %v3302_v27 = vpack.c.bf16 %v3286_v42, %v3286_v42  ;;  %v6264_v7 = vld [vmem:[#allocation30 + $0x2b0] sm:$0xff]   ;;  %v6268_v29 = vld [vmem:[#allocation30 + $0x2b8] sm:$0xff]  }
 0xa97   : > { %v3301_v21 = vpack.c.bf16 %v3285_v1, %v3285_v1  ;;  %v3303_v22 = vpack.c.bf16 %v3287_v20, %v3287_v20  ;;  %5552 = vmatpush3.bf16.msra.mxu1 %v6235_v18  ;;  %5574 = vmatpush3.bf16.msra.mxu0 %v6236_v63  ;;  %v6267_v63 = vld [vmem:[#allocation30 + $0x238] sm:$0xff]  }
 0xa98   : > { %5581 = vmatprep.subr.bf16.mxu1 %v6237_v62  ;;  %5603 = vmatprep.subr.bf16.mxu0 %v6238_v57  ;;  %v6269_v62 = vld [vmem:[#allocation30 + $0x340] sm:$0xff]  }
 0xa99   : > { %4455 = vmatprep.mubr.bf16.mxu1 %v3301_v21  ;;  %4495 = vmatprep.mubr.bf16.mxu0 %v3303_v22  ;;  %v6270_v57 = vld [vmem:[#allocation30 + $0x3c0] sm:$0xff]  }
 0xa9a   : > { %4456 = vmatmul.mubr.bf16.vlgmr.msra.gmra.mrb[44].mxu1 %v3300_v26  ;;  %4496 = vmatmul.mubr.bf16.vlgmr.msra.gmra.mrb[48].mxu0 %v3302_v27 }
 0xa9b   : > { %5582 = vmatpush3.bf16.msra.mxu1 %v6239_v23  ;;  %5604 = vmatpush3.bf16.msra.mxu0 %v6240_v24  ;;  %v6271_v23 = vld [vmem:[#allocation30 + $0x300] sm:$0xff]  }
 0xa9c   : > { %5583 = vmatprep.subr.bf16.mxu1 %v6241_v28  ;;  %5605 = vmatprep.subr.bf16.mxu0 %v6242_v30  ;;  %v6272_v24 = vld [vmem:[#allocation30 + $0x380] sm:$0xff]   ;;  %v6273_v28 = vld [vmem:[#allocation30 + $0x348] sm:$0xff]  }
 0xa9d   : > { %v6274_v30 = vld [vmem:[#allocation30 + $0x3c8] sm:$0xff]  }
 0xa9f   : > { %5584 = vmatpush3.bf16.msra.mxu1 %v6243_v32  ;;  %5606 = vmatpush3.bf16.msra.mxu0 %v6244_v33  ;;  %v6275_v32 = vld [vmem:[#allocation30 + $0x308] sm:$0xff]  }
 0xaa0   : > { %5585 = vmatprep.subr.bf16.mxu1 %v6245_v35  ;;  %5607 = vmatprep.subr.bf16.mxu0 %v6246_v36  ;;  %v6276_v33 = vld [vmem:[#allocation30 + $0x388] sm:$0xff]   ;;  %v6277_v35 = vld [vmem:[#allocation30 + $0x350] sm:$0xff]  }
 0xaa1   : > { %v6278_v36 = vld [vmem:[#allocation30 + $0x3d0] sm:$0xff]  }
 0xaa3   : > { %5586 = vmatpush3.bf16.msra.mxu1 %v6247_v38  ;;  %5608 = vmatpush3.bf16.msra.mxu0 %v6248_v39  ;;  %v6279_v38 = vld [vmem:[#allocation30 + $0x310] sm:$0xff]  }
 0xaa4   : > { %5587 = vmatprep.subr.bf16.mxu1 %v6249_v37  ;;  %5609 = vmatprep.subr.bf16.mxu0 %v6250_v40  ;;  %v6280_v39 = vld [vmem:[#allocation30 + $0x390] sm:$0xff]   ;;  %v6281_v37 = vld [vmem:[#allocation30 + $0x358] sm:$0xff]  }
 0xaa5   : > { %v6282_v40 = vld [vmem:[#allocation30 + $0x3d8] sm:$0xff]  }
 0xaa7   : > { %5588 = vmatpush3.bf16.msra.mxu1 %v6251_v41  ;;  %5610 = vmatpush3.bf16.msra.mxu0 %v6252_v43  ;;  %v6283_v41 = vld [vmem:[#allocation30 + $0x318] sm:$0xff]  }
 0xaa8   : > { %5589 = vmatprep.subr.bf16.mxu1 %v6253_v44  ;;  %5611 = vmatprep.subr.bf16.mxu0 %v6254_v45  ;;  %v6284_v43 = vld [vmem:[#allocation30 + $0x398] sm:$0xff]   ;;  %v6285_v44 = vld [vmem:[#allocation30 + $0x360] sm:$0xff]  }
 0xaa9   : > { %v6286_v45 = vld [vmem:[#allocation30 + $0x3e0] sm:$0xff]  }
 0xaab   : > { %5590 = vmatpush3.bf16.msra.mxu1 %v6255_v46  ;;  %5612 = vmatpush3.bf16.msra.mxu0 %v6256_v50  ;;  %v6287_v46 = vld [vmem:[#allocation30 + $0x320] sm:$0xff]  }
 0xaac   : > { %5591 = vmatprep.subr.bf16.mxu1 %v6257_v51  ;;  %5613 = vmatprep.subr.bf16.mxu0 %v6258_v55  ;;  %v6288_v50 = vld [vmem:[#allocation30 + $0x3a0] sm:$0xff]   ;;  %v6289_v51 = vld [vmem:[#allocation30 + $0x368] sm:$0xff]  }
 0xaad   : > { %v6290_v55 = vld [vmem:[#allocation30 + $0x3e8] sm:$0xff]  }
 0xaaf   : > { %5592 = vmatpush3.bf16.msra.mxu1 %v6259_v56  ;;  %5614 = vmatpush3.bf16.msra.mxu0 %v6260_v58  ;;  %v6291_v56 = vld [vmem:[#allocation30 + $0x328] sm:$0xff]  }
 0xab0   : > { %5593 = vmatprep.subr.bf16.mxu1 %v6261_v34  ;;  %5615 = vmatprep.subr.bf16.mxu0 %v6262_v60  ;;  %v6292_v58 = vld [vmem:[#allocation30 + $0x3a8] sm:$0xff]   ;;  %v6293_v34 = vld [vmem:[#allocation30 + $0x370] sm:$0xff]  }
 0xab1   : > { %v3150_v17 = vpop.f32.mrb[32].mxu1  ;;  %v3191_v10 = vpop.f32.mrb[36].mxu0  ;;  %v6294_v60 = vld [vmem:[#allocation30 + $0x3f0] sm:$0xff]  }
 0xab2   : > { %v3151_v11 = vadd.f32 %v3150_v17, %v2267_v2  ;;  %v3192_v12 = vadd.f32 %v3191_v10, %v2275_v3  ;;  %v3152_v61 = vpop.f32.mrb[33].mxu1  ;;  %v3193_v14 = vpop.f32.mrb[37].mxu0  ;;  %v2283_v2 = vrot.slane %v7872_v59, %v2250_v48  ;;  %v2291_v3 = vrot.slane %v7872_v59, %v2258_v49  ;;  %v6298_v48 = vld [vmem:[#allocation30 + $0x3f8] sm:$0xff]  }
 0xab3   : > { %v3153_v25 = vadd.f32 %v3152_v61, %v2271_v4  ;;  %v3194_v15 = vadd.f32 %v3193_v14, %v2279_v5  ;;  %v3154_v18 = vpop.f32.mrb[34].mxu1  ;;  %v3195_v16 = vpop.f32.mrb[38].mxu0  ;;  %5594 = vmatpush3.bf16.msra.mxu1 %v6263_v6  ;;  %5616 = vmatpush3.bf16.msra.mxu0 %v6264_v7  ;;  %v2287_v4 = vrot.slane %v7872_v59, %v2254_v53  ;;  %v6295_v6 = vld [vmem:[#allocation30 + $0x330] sm:$0xff]  }
 0xab4   : > { %v3288_v19 = vmax.f32 %v3151_v11, 0.0  ;;  %v3290_v42 = vmax.f32 %v3192_v12, 0.0  ;;  %v3155_v47 = vpop.f32.mrb[35].mxu1  ;;  %v3196_v52 = vpop.f32.mrb[39].mxu0  ;;  %5595 = vmatprep.subr.bf16.mxu1 %v6265_v8  ;;  %5617 = vmatprep.subr.bf16.mxu0 %v6266_v9  ;;  %v2295_v5 = vrot.slane %v7872_v59, %v2262_v54  ;;  %v6296_v7 = vld [vmem:[#allocation30 + $0x3b0] sm:$0xff]   ;;  %v6297_v8 = vld [vmem:[#allocation30 + $0x378] sm:$0xff]  }
 0xab5   : > { %v3289_v1 = vmax.f32 %v3153_v25, 0.0  ;;  %v3291_v20 = vmax.f32 %v3194_v15, 0.0  ;;  %v6300_v54 = vld [vmem:[#allocation30 + $0x3b8] sm:$0xff]  }
 0xab6   : > { %v3304_v26 = vpack.c.bf16 %v3288_v19, %v3288_v19  ;;  %v3306_v27 = vpack.c.bf16 %v3290_v42, %v3290_v42 }
 0xab7   : > { %v3305_v21 = vpack.c.bf16 %v3289_v1, %v3289_v1  ;;  %v3307_v22 = vpack.c.bf16 %v3291_v20, %v3291_v20  ;;  %5596 = vmatpush3.bf16.msra.mxu1 %v6267_v63  ;;  %5618 = vmatpush3.bf16.msra.mxu0 %v6268_v29  ;;  %v5277_v1 = vld [vmem:[#allocation31] ss:$0 sm:$0xff] }
 0xab8   : > { %5625 = vmatprep.subr.bf16.mxu1 %v6269_v62  ;;  %5647 = vmatprep.subr.bf16.mxu0 %v6270_v57 }
 0xab9   : > { %4535 = vmatprep.mubr.bf16.mxu1 %v3305_v21  ;;  %4575 = vmatprep.mubr.bf16.mxu0 %v3307_v22 }
 0xaba   : > { %4536 = vmatmul.mubr.bf16.vlgmr.msra.gmra.mrb[48].mxu1 %v3304_v26  ;;  %4576 = vmatmul.mubr.bf16.vlgmr.msra.gmra.mrb[52].mxu0 %v3306_v27 }
 0xabb   : > { %5626 = vmatpush3.bf16.msra.mxu1 %v6271_v23  ;;  %5648 = vmatpush3.bf16.msra.mxu0 %v6272_v24 }
 0xabc   : > { %5627 = vmatprep.subr.bf16.mxu1 %v6273_v28  ;;  %5649 = vmatprep.subr.bf16.mxu0 %v6274_v30 }
 0xabf   : > { %5628 = vmatpush3.bf16.msra.mxu1 %v6275_v32  ;;  %5650 = vmatpush3.bf16.msra.mxu0 %v6276_v33 }
 0xac0   : > { %5629 = vmatprep.subr.bf16.mxu1 %v6277_v35  ;;  %5651 = vmatprep.subr.bf16.mxu0 %v6278_v36 }
 0xac3   : > { %5630 = vmatpush3.bf16.msra.mxu1 %v6279_v38  ;;  %5652 = vmatpush3.bf16.msra.mxu0 %v6280_v39 }
 0xac4   : > { %5631 = vmatprep.subr.bf16.mxu1 %v6281_v37  ;;  %5653 = vmatprep.subr.bf16.mxu0 %v6282_v40 }
 0xac7   : > { %5632 = vmatpush3.bf16.msra.mxu1 %v6283_v41  ;;  %5654 = vmatpush3.bf16.msra.mxu0 %v6284_v43 }
 0xac8   : > { %5633 = vmatprep.subr.bf16.mxu1 %v6285_v44  ;;  %5655 = vmatprep.subr.bf16.mxu0 %v6286_v45 }
 0xacb   : > { %5634 = vmatpush3.bf16.msra.mxu1 %v6287_v46  ;;  %5656 = vmatpush3.bf16.msra.mxu0 %v6288_v50 }
 0xacc   : > { %5635 = vmatprep.subr.bf16.mxu1 %v6289_v51  ;;  %5657 = vmatprep.subr.bf16.mxu0 %v6290_v55 }
 0xacf   : > { %5636 = vmatpush3.bf16.msra.mxu1 %v6291_v56  ;;  %5658 = vmatpush3.bf16.msra.mxu0 %v6292_v58 }
 0xad0   : > { %5637 = vmatprep.subr.bf16.mxu1 %v6293_v34  ;;  %5659 = vmatprep.subr.bf16.mxu0 %v6294_v60 }
 0xad1   : > { %v3232_v9 = vpop.f32.mrb[36].mxu1  ;;  %v3273_v17 = vpop.f32.mrb[40].mxu0 }
 0xad2   : > { %v3233_v10 = vadd.f32 %v3232_v9, %v2283_v2  ;;  %v3274_v49 = vadd.f32 %v3273_v17, %v2291_v3  ;;  %v3234_v11 = vpop.f32.mrb[37].mxu1  ;;  %v3275_v12 = vpop.f32.mrb[41].mxu0 }
 0xad3   : > { %v3235_v61 = vadd.f32 %v3234_v11, %v2287_v4  ;;  %v3276_v14 = vadd.f32 %v3275_v12, %v2295_v5  ;;  %v3236_v25 = vpop.f32.mrb[38].mxu1  ;;  %v3277_v53 = vpop.f32.mrb[42].mxu0  ;;  %5638 = vmatpush3.bf16.msra.mxu1 %v6295_v6  ;;  %5660 = vmatpush3.bf16.msra.mxu0 %v6296_v7 }
 0xad4   : > { %v3292_v59 = vmax.f32 %v3233_v10, 0.0  ;;  %v3294_v15 = vmax.f32 %v3274_v49, 0.0  ;;  %v3237_v18 = vpop.f32.mrb[39].mxu1  ;;  %v3278_v16 = vpop.f32.mrb[43].mxu0  ;;  %5639 = vmatprep.subr.bf16.mxu1 %v6297_v8  ;;  %5661 = vmatprep.subr.bf16.mxu0 %v6298_v48 }
 0xad5   : > { %v3293_v63 = vmax.f32 %v3235_v61, 0.0  ;;  %v3295_v29 = vmax.f32 %v3276_v14, 0.0 }
 0xad6   : > { %v3308_v47 = vpack.c.bf16 %v3292_v59, %v3292_v59  ;;  %v3310_v52 = vpack.c.bf16 %v3294_v15, %v3294_v15 }
 0xad7   : > { %v3309_v19 = vpack.c.bf16 %v3293_v63, %v3293_v63  ;;  %v3311_v42 = vpack.c.bf16 %v3295_v29, %v3295_v29  ;;  %5640 = vmatpush3.bf16.msra.mxu1 %v6299_v13  ;;  %5662 = vmatpush3.bf16.msra.mxu0 %v6300_v54  ;;  %v6301_v13 = vld [vmem:[%s8063_s23] sm:$0xff]   ;;  %v6302_v54 = vld [vmem:[%s8063_s23 + $0x8] sm:$0xff]   ;;  %v6304_v63 = vld [vmem:[%s8063_s23 + $0x18] sm:$0xff]  }
 0xad8   : > { %5830 = vmatprep.subr.bf16.mxu1 %v6970_v0  ;;  %v6305_v29 = vld [vmem:[%s8063_s23 + $0x20] sm:$0xff]  }
 0xad9   : > { %4615 = vmatprep.mubr.bf16.mxu1 %v3309_v19  ;;  %4655 = vmatprep.mubr.bf16.mxu0 %v3311_v42  ;;  %v6306_v19 = vld [vmem:[%s8063_s23 + $0x28] sm:$0xff]   ;;  %v6307_v42 = vld [vmem:[%s8063_s23 + $0x30] sm:$0xff]  }
 0xada   : > { %4616 = vmatmul.mubr.bf16.vlgmr.msra.gmra.mrb[52].mxu1 %v3308_v47  ;;  %4656 = vmatmul.mubr.bf16.vlgmr.msra.gmra.mrb[56].mxu0 %v3310_v52  ;;  %v6308_v47 = vld [vmem:[%s8063_s23 + $0x38] sm:$0xff]  }
 0xadb   : > { %5846 = vmatprep.mubr.msk.bf16.mxu1 %vm6971_vm0, %v6970_v0  ;;  %5831 = vmatpush3.bf16.msra.mxu1 %v6301_v13 }
 0xadc   : > { %5832 = vmatprep.subr.bf16.mxu1 %v6970_v0 }
 0xadf   : > { %5833 = vmatpush3.bf16.msra.mxu1 %v6302_v54 }
 0xae0   : > { %5834 = vmatprep.subr.bf16.mxu1 %v6970_v0 }
 0xb4d   : > { %v5509_v62 = vpop.f32.mrb[40].mxu1  ;;  %v5531_v57 = vpop.f32.mrb[44].mxu0 }
 0xb4e   : > { %v5510_v20 = vpop.f32.mrb[41].mxu1  ;;  %v5532_v21 = vpop.f32.mrb[45].mxu0 }
 0xb4f   : > { %v5511_v22 = vadd.f32 %v5510_v20, %v5509_v62  ;;  %v5533_v23 = vadd.f32 %v5532_v21, %v5531_v57  ;;  %v5512_v24 = vpop.f32.mrb[42].mxu1  ;;  %v5534_v26 = vpop.f32.mrb[46].mxu0  ;;  %v5406_v20 = vld [vmem:[#allocation25] ss:$0 sm:$0xff] }
 0xb50   : > { %v5513_v27 = vpop.f32.mrb[43].mxu1  ;;  %v5535_v28 = vpop.f32.mrb[47].mxu0 }
 0xb51   : > { %v4378_v30 = vadd.f32 %v5511_v22, %v5277_v1  ;;  %v5407_v22 = vld [vmem:[#allocation27] ss:$0 sm:$0xff] }
 0xb53   : > { %v4418_v32 = vadd.f32 %v5533_v23, %v4378_v30 }
 0xb6d   : > { %v5553_v33 = vpop.f32.mrb[44].mxu1  ;;  %v5575_v35 = vpop.f32.mrb[48].mxu0 }
 0xb6e   : > { %v5554_v36 = vpop.f32.mrb[45].mxu1  ;;  %v5576_v38 = vpop.f32.mrb[49].mxu0 }
 0xb6f   : > { %v5555_v39 = vadd.f32 %v5554_v36, %v5553_v33  ;;  %v5577_v37 = vadd.f32 %v5576_v38, %v5575_v35  ;;  %v5556_v40 = vpop.f32.mrb[46].mxu1  ;;  %v5578_v41 = vpop.f32.mrb[50].mxu0 }
 0xb70   : > { %v5557_v43 = vpop.f32.mrb[47].mxu1  ;;  %v5579_v44 = vpop.f32.mrb[51].mxu0 }
 0xb71   : > { %v4458_v45 = vadd.f32 %v5555_v39, %v4418_v32 }
 0xb73   : > { %v4498_v46 = vadd.f32 %v5577_v37, %v4458_v45 }
 0xb8d   : > { %v5597_v50 = vpop.f32.mrb[48].mxu1  ;;  %v5619_v51 = vpop.f32.mrb[52].mxu0 }
 0xb8e   : > { %v5598_v55 = vpop.f32.mrb[49].mxu1  ;;  %v5620_v56 = vpop.f32.mrb[53].mxu0 }
 0xb8f   : > { %v5599_v58 = vadd.f32 %v5598_v55, %v5597_v50  ;;  %v5621_v34 = vadd.f32 %v5620_v56, %v5619_v51  ;;  %v5600_v60 = vpop.f32.mrb[50].mxu1  ;;  %v5622_v2 = vpop.f32.mrb[54].mxu0 }
 0xb90   : > { %v5601_v3 = vpop.f32.mrb[51].mxu1  ;;  %v5623_v4 = vpop.f32.mrb[55].mxu0 }
 0xb91   : > { %v4538_v5 = vadd.f32 %v5599_v58, %v4498_v46 }
 0xb93   : > { %v4578_v6 = vadd.f32 %v5621_v34, %v4538_v5 }
 0xbad   : > { %v5641_v7 = vpop.f32.mrb[52].mxu1  ;;  %v5663_v8 = vpop.f32.mrb[56].mxu0 }
 0xbae   : > { %v5642_v48 = vpop.f32.mrb[53].mxu1  ;;  %v5664_v9 = vpop.f32.mrb[57].mxu0 }
 0xbaf   : > { %v5643_v17 = vadd.f32 %v5642_v48, %v5641_v7  ;;  %v5665_v10 = vadd.f32 %v5664_v9, %v5663_v8  ;;  %v5644_v49 = vpop.f32.mrb[54].mxu1  ;;  %v5666_v11 = vpop.f32.mrb[58].mxu0 }
 0xbb0   : > { %v5645_v12 = vpop.f32.mrb[55].mxu1  ;;  %v5667_v61 = vpop.f32.mrb[59].mxu0 }
 0xbb1   : > { %v4618_v14 = vadd.f32 %v5643_v17, %v4578_v6 }
 0xbb3   : > { %v4658_v25 = vadd.f32 %v5665_v10, %v4618_v14 }
 0xbb5   : > { %v4663_v53 = vadd.f32 %v4658_v25, %v7816_v31  ;;  %v6303_v31 = vld [vmem:[%s8063_s23 + $0x10] sm:$0xff]  }
 0xbb6   : > { %5835 = vmatpush3.bf16.msra.mxu1 %v6303_v31 }
 0xbb7   : > { %4666 = vadd.xlane.f32.xlu0 %v4663_v53  ;;  %5836 = vmatprep.subr.bf16.mxu1 %v6970_v0 }
 0xbba   : > { %5837 = vmatpush3.bf16.msra.mxu1 %v6304_v63 }
 0xbbb   : > { %5838 = vmatprep.subr.bf16.mxu1 %v6970_v0 }
 0xbbe   : > { %5839 = vmatpush3.bf16.msra.mxu1 %v6305_v29 }
 0xbbf   : > { %5840 = vmatprep.subr.bf16.mxu1 %v6970_v0 }
 0xbc2   : > { %5841 = vmatpush3.bf16.msra.mxu1 %v6306_v19 }
 0xbc3   : > { %5842 = vmatprep.subr.bf16.mxu1 %v6970_v0 }
 0xbc6   : > { %5843 = vmatpush3.bf16.msra.mxu1 %v6307_v42 }
 0xbc7   : > { %5844 = vmatprep.subr.bf16.mxu1 %v6970_v0  ;;  %v5408_v0 = vld [vmem:[%s8064_s17] ss:$0 sm:$0xff] }
 0xbca   : > { %5845 = vmatpush3.bf16.msra.mxu1 %v6308_v47 }
 0xc44   : > { %v4667_v59 = vpop.xlane.xlu0 %4666 }
 0xc45   : > { %v4668_v15 = vmul.f32 0.0078125, %v4667_v59 }
 0xc47   : > { %v4669_v18 = vsub.f32 %v4663_v53, %v4668_v15 }
 0xc49   : > { %v4670_v16 = vmul.f32 %v4669_v18, %v4669_v18 }
 0xc4b   : > { %4671 = vadd.xlane.f32.xlu1 %v4670_v16 }
 0xcd8   : > { %v4672_v52 = vpop.xlane.xlu1 %4671 }
 0xcd9   : > { %v4673_v62 = vmul.f32 0.0078125, %v4672_v52 }
 0xcdb   : > { %v4674_v57 = vadd.f32 1e-05, %v4673_v62 }
 0xcdd   : > { %6331 = vrsqrt.f32 %v4674_v57 }
 0xce7   : > { %v6332_v1 = vpop.eup %6331 }
 0xce8   : > { %v4676_v21 = vmul.f32 %v6332_v1, %v4669_v18 }
 0xcea   : > { %v4683_v23 = vmul.f32 %v5406_v20, %v4676_v21 }
 0xcec   : > { %v4690_v24 = vadd.f32 %v5407_v22, %v4683_v23 }
 0xcee   : > { %v4691_v26 = vpack.c.bf16 %v4690_v24, %v4690_v24 }
 0xcf0   : > { %5847 = vmatmul.mubr.bf16.vlgmr.msra.gmra.mrb[56].mxu1 %v4691_v26 }
 0xdc3   : > { %v4797_v27 = vpop.f32.mrb[56].mxu1 }
 0xdc4   : > { %v4798_v28 = vadd.f32 %v5408_v0, %v4797_v27  ;;  %v5848_v30 = vpop.f32.mrb[57].mxu1 }
 0xdc5   : > { %v4800_v32 = vpop.f32.mrb[58].mxu1 }
 0xdc6   : > { %4804 = vst.msk [vmem:[%s1081_s29] sm:$0xff] %vm4803_vm5, %v4798_v28  ;;  %v5849_v33 = vpop.f32.mrb[59].mxu1 }
 0xdc7 PF: > { %s8066_s0 = sld [smem:[#allocation44_spill]] }
 0xdcd   : > { %s48_s7 = sadd.s32 1, %s8066_s0  }
 0xdce   : > { %p45_p12 = scmp.ge.s32.totalorder %s48_s7, 4  }
 0xdd0   :  { %47 = sbr.rel (!%p45_p12) target bundleno = 32 (0x20), region = 239 }
 0xdd7   :  { %4824 = vsyncpa [#allocation3], 1 }
 0xdd8   :  { %4826 = vsyncpa [#allocation3 + $0x1], 1 }
 0xdd9   :  { %4827 = vsyncpa [#allocation5], 1 }
 0xdda   :  { %4828 = vsyncpa [#allocation8], 1 }
 0xddb   :  { %4829 = vsyncpa [#allocation11], 1 }
 0xddc   :  { %4830 = vsyncpa [#allocation14], 1 }
 0xddd   :  { %4831 = vsyncpa [#allocation17], 1 }
 0xdde   :  { %4832 = vsyncpa [#allocation20], 1 }
 0xddf   :  { %4833 = vsyncpa [#allocation23], 1 }
 0xde0   :  { %4834 = vsyncpa [#allocation26], 1 }
 0xde1   :  { %4835 = vsyncpa [#allocation29], 1 }
 0xde2   :  { %4836 = vsyncpa [#allocation32], 1 }

</bundles_post_ra>
